<compile_context>
chip_gen: v7x
topology: tpu7x:2x2x1
jax: 0.10.0
libtpu: 0.0.40
codegen_flags: <defaults>
</compile_context>

<pallas_src>
import math

import jax
import jax.numpy as jnp
from jax.experimental import pallas as pl
from jax.experimental.pallas import tpu as pltpu

# ----------------------------- config ---------------------------------------
VOCAB = 50
VPAD = 128                        # lane-dense classifier output width (>= VOCAB)
D_MODEL = 32
NHEAD = 4
NUM_LAYERS = 2
D_FF = 4 * D_MODEL
LAYER_NORM_EPS = 1e-5
MAX_SEQ = 10                      # MAX_LEN = config max_len + 2
IMG_C, IMG_HW = 3, 16
PATCH = 4
N_PATCH = (IMG_HW // PATCH) ** 2
PATCH_DIM = IMG_C * PATCH * PATCH
MASK_NEG = -1e30                  # additive mask value (== -inf after softmax)


# ----------------------------- fused Pallas kernel ---------------------------
def _fused_lm_kernel(x_ref, patches_ref, mask_ref,
                     img_w_ref, img_b_ref,
                     ln_g_ref, ln_b_ref,
                     wqkv_s_ref, bqkv_s_ref, wo_s_ref, bo_s_ref,
                     wq_c_ref, bq_c_ref, wkv_c_ref, bkv_c_ref, wo_c_ref, bo_c_ref,
                     w1_ref, b1_ref, w2_ref, b2_ref,
                     fin_g_ref, fin_b_ref, cls_w_ref, cls_b_ref,
                     out_ref):
    B, L, d = x_ref.shape
    S = patches_ref.shape[1]
    H = NHEAD
    Dh = d // H
    scale = 1.0 / math.sqrt(Dh)

    def mm(a, w):  # 2-D matmul, f32 accumulation on the MXU
        return jnp.dot(a, w, preferred_element_type=jnp.float32)

    def layer_norm(xf, g, b):  # xf [R, d], g/b [1, d]
        mu = jnp.mean(xf, axis=-1, keepdims=True)
        var = jnp.mean(jnp.square(xf - mu), axis=-1, keepdims=True)
        return (xf - mu) * jax.lax.rsqrt(var + LAYER_NORM_EPS) * g + b

    def gelu_erf(v):
        # exact-erf GELU; erf via Abramowitz-Stegun 7.1.26 polynomial (|err|<1.5e-7)
        # so it lowers with plain exp/mul/where (no lax.erf dependency in Mosaic).
        z = v * 0.7071067811865476
        az = jnp.abs(z)
        t = 1.0 / (1.0 + 0.3275911 * az)
        poly = t * (0.254829592 + t * (-0.284496736 + t * (1.421413741
               + t * (-1.453152027 + t * 1.061405429))))
        erf_abs = 1.0 - poly * jnp.exp(-az * az)
        erf = jnp.where(z >= 0.0, erf_abs, -erf_abs)
        return 0.5 * v * (1.0 + erf)

    def softmax_rows(s):
        s = s - jnp.max(s, axis=-1, keepdims=True)
        p = jnp.exp(s)
        return p * pl.reciprocal(jnp.sum(p, axis=-1, keepdims=True), approx=True)

    # ---- image encoder stand-in: patch-embedding projection -> memory --------
    # TODO(synk): real DinoResEncoder / ViTEncoder backbones are not defined in
    # the reference file; a deterministic patch-embed projection is used instead.
    mem2 = mm(patches_ref[...].reshape(B * S, PATCH_DIM), img_w_ref[...]) + img_b_ref[...]

    mask = mask_ref[...]                       # [B, L, L] additive self-attn mask
    x2 = x_ref[...].reshape(B * L, d)          # activations as flat [rows, d]

    for l in range(NUM_LAYERS):
        lg = ln_g_ref[l]                       # (3, d): ln1/ln2/ln3 gains
        lb = ln_b_ref[l]

        # ---- self attention (pre-norm), fused QKV ----
        h = layer_norm(x2, lg[0:1, :], lb[0:1, :])
        qkv = mm(h, wqkv_s_ref[l]) + bqkv_s_ref[l]          # [B*L, 3d]
        qkv3 = qkv.reshape(B, L, 3 * d)
        wo = wo_s_ref[l]                                    # (d, d)
        acc = jnp.zeros((B * L, d), jnp.float32)
        for hd in range(H):
            qh = qkv3[:, :, hd * Dh:(hd + 1) * Dh]
            kh = qkv3[:, :, d + hd * Dh:d + (hd + 1) * Dh]
            vh = qkv3[:, :, 2 * d + hd * Dh:2 * d + (hd + 1) * Dh]
            s = jnp.einsum('bld,bsd->bls', qh, kh,
                           preferred_element_type=jnp.float32) * scale + mask
            p = softmax_rows(s)
            oh = jnp.einsum('bls,bsd->bld', p, vh,
                            preferred_element_type=jnp.float32)
            acc = acc + mm(oh.reshape(B * L, Dh), wo[hd * Dh:(hd + 1) * Dh, :])
        x2 = x2 + acc + bo_s_ref[l]

        # ---- cross attention over image memory (no mask), fused KV ----
        h = layer_norm(x2, lg[1:2, :], lb[1:2, :])
        q3 = (mm(h, wq_c_ref[l]) + bq_c_ref[l]).reshape(B, L, d)
        kv3 = (mm(mem2, wkv_c_ref[l]) + bkv_c_ref[l]).reshape(B, S, 2 * d)
        wo = wo_c_ref[l]
        acc = jnp.zeros((B * L, d), jnp.float32)
        for hd in range(H):
            qh = q3[:, :, hd * Dh:(hd + 1) * Dh]
            kh = kv3[:, :, hd * Dh:(hd + 1) * Dh]
            vh = kv3[:, :, d + hd * Dh:d + (hd + 1) * Dh]
            s = jnp.einsum('bld,bsd->bls', qh, kh,
                           preferred_element_type=jnp.float32) * scale
            p = softmax_rows(s)
            oh = jnp.einsum('bls,bsd->bld', p, vh,
                            preferred_element_type=jnp.float32)
            acc = acc + mm(oh.reshape(B * L, Dh), wo[hd * Dh:(hd + 1) * Dh, :])
        x2 = x2 + acc + bo_c_ref[l]

        # ---- feed-forward (fused matmul -> exact-erf GELU -> matmul) ----
        h = layer_norm(x2, lg[2:3, :], lb[2:3, :])
        f = gelu_erf(mm(h, w1_ref[l]) + b1_ref[l])
        x2 = x2 + mm(f, w2_ref[l]) + b2_ref[l]

    # ---- final decoder norm + classifier (lane-dense padded to VPAD=128) ----
    h = layer_norm(x2, fin_g_ref[...], fin_b_ref[...])
    logits = mm(h, cls_w_ref[...]) + cls_b_ref[...]
    out_ref[...] = logits.reshape(B, L, VPAD)


def fused_forward_core(params, x, patches, self_mask):
    B, L, _ = x.shape
    out = pl.pallas_call(
        _fused_lm_kernel,
        out_shape=jax.ShapeDtypeStruct((B, L, VPAD), jnp.float32),
        compiler_params=pltpu.CompilerParams(vmem_limit_bytes=8 * 1024 * 1024),
    )(x, patches, self_mask,
      params["img_w"], params["img_b"],
      params["ln_g"], params["ln_b"],
      params["wqkv_s"], params["bqkv_s"], params["wo_s"], params["bo_s"],
      params["wq_c"], params["bq_c"], params["wkv_c"], params["bkv_c"],
      params["wo_c"], params["bo_c"],
      params["w1"], params["b1"], params["w2"], params["b2"],
      params["fin_g"], params["fin_b"], params["cls_w"], params["cls_b"])
    return out[:, :, :VOCAB]


# ----------------------------- params ----------------------------------------
def make_positional_encoding(max_len, d_model):
    position = jnp.arange(max_len, dtype=jnp.float32)[:, None]
    div_term = jnp.exp(jnp.arange(0, d_model, 2, dtype=jnp.float32)
                       * (-math.log(10000.0) / d_model))
    pe = jnp.zeros((max_len, d_model), jnp.float32)
    pe = pe.at[:, 0::2].set(jnp.sin(position * div_term))
    pe = pe.at[:, 1::2].set(jnp.cos(position * div_term))
    return pe


def init_params(key):
    ks = iter(jax.random.split(key, 64))

    def u(shape, a):
        return jax.random.uniform(next(ks), shape, jnp.float32, -a, a)

    d, dff, NL = D_MODEL, D_FF, NUM_LAYERS
    a_d = 1.0 / math.sqrt(d)
    a_ff = 1.0 / math.sqrt(dff)
    cls_w = jnp.zeros((d, VPAD), jnp.float32).at[:, :VOCAB].set(u((d, VOCAB), 0.1))
    return {
        "embed": u((VOCAB, d), 0.1),                 # init_weights(): uniform(-0.1, 0.1)
        "pe": make_positional_encoding(MAX_SEQ, d),
        "img_w": u((PATCH_DIM, d), 1.0 / math.sqrt(PATCH_DIM)),
        "img_b": jnp.zeros((1, d), jnp.float32),
        "ln_g": jnp.ones((NL, 3, d), jnp.float32),
        "ln_b": jnp.zeros((NL, 3, d), jnp.float32),
        "wqkv_s": u((NL, d, 3 * d), a_d), "bqkv_s": jnp.zeros((NL, 1, 3 * d), jnp.float32),
        "wo_s": u((NL, d, d), a_d),       "bo_s": jnp.zeros((NL, 1, d), jnp.float32),
        "wq_c": u((NL, d, d), a_d),       "bq_c": jnp.zeros((NL, 1, d), jnp.float32),
        "wkv_c": u((NL, d, 2 * d), a_d),  "bkv_c": jnp.zeros((NL, 1, 2 * d), jnp.float32),
        "wo_c": u((NL, d, d), a_d),       "bo_c": jnp.zeros((NL, 1, d), jnp.float32),
        "w1": u((NL, d, dff), a_d),       "b1": jnp.zeros((NL, 1, dff), jnp.float32),
        "w2": u((NL, dff, d), a_ff),      "b2": jnp.zeros((NL, 1, d), jnp.float32),
        "fin_g": jnp.ones((1, d), jnp.float32), "fin_b": jnp.zeros((1, d), jnp.float32),
        "cls_w": cls_w, "cls_b": jnp.zeros((1, VPAD), jnp.float32),  # classifier bias = 0
    }


# ----------------------------- forward pass ----------------------------------
@jax.jit
def _model_core(params, imgs_sorted, seq_t, pad_mask):
    B, L = seq_t.shape

    # token embedding + positional encoding (dropout == identity)
    x = jnp.take(params["embed"], seq_t, axis=0) + params["pe"][:L][None, :, :]

    # patchify NCHW images -> [B, Np, C*P*P] (plain-JAX layout glue)
    P = PATCH
    patches = imgs_sorted.reshape(B, IMG_C, IMG_HW // P, P, IMG_HW // P, P)
    patches = patches.transpose(0, 2, 4, 1, 3, 5).reshape(B, N_PATCH, PATCH_DIM)

    # additive self-attn mask: causal (strictly upper) + key padding (True = pad)
    idx = jnp.arange(L)
    causal = jnp.where(idx[None, :] > idx[:, None], MASK_NEG, 0.0).astype(jnp.float32)
    kpm = jnp.where(pad_mask, MASK_NEG, 0.0).astype(jnp.float32)      # [B, L]
    self_mask = causal[None, :, :] + kpm[:, None, :]                  # [B, L, L]

    return fused_forward_core(params, x.astype(jnp.float32),
                              patches.astype(jnp.float32), self_mask)


def transformer_conditioned_lm_forward(params, imgs, seq, seq_padding_mask, seq_len):
    # device-side sort, mirrors torch seq_len.sort(descending=True)
    sort_ind = jnp.argsort(-seq_len)
    seq_len_sorted = seq_len[sort_ind]
    imgs_sorted = imgs[sort_ind]
    encoded_seq = seq[sort_ind]

    # single host pull: the reference module's output length is data-dependent
    # (max(decode_lengths) sets the truncated sequence length / output shape).
    decode_lengths = [int(v) for v in jax.device_get(seq_len_sorted - 1)]
    max_length = max(decode_lengths)

    seq_t = encoded_seq[:, :max_length]
    # NOTE: faithful to the reference — the padding mask is truncated but NOT
    # re-ordered by sort_ind (this bug exists in the original PyTorch module).
    pad_mask = seq_padding_mask[:, :max_length]

    logits = _model_core(params, imgs_sorted, seq_t, pad_mask)
    return logits, encoded_seq, decode_lengths, sort_ind


# ----------------------------- main ------------------------------------------
if __name__ == "__main__":
    key = jax.random.PRNGKey(0)
    kp, ki, ks = jax.random.split(key, 3)
    params = init_params(kp)

    B = 2
    imgs = jax.random.normal(ki, (B, IMG_C, IMG_HW, IMG_HW), jnp.float32)  # NCHW
    seq = jax.random.randint(ks, (B, MAX_SEQ), 0, VOCAB, dtype=jnp.int32)
    seq_len = jnp.array([7, 9], dtype=jnp.int32)
    positions = jnp.arange(MAX_SEQ)[None, :]
    seq_padding_mask = positions >= seq_len[:, None]   # True == pad

    out, encoded_seq, decode_lengths, sort_ind = transformer_conditioned_lm_forward(
        params, imgs, seq, seq_padding_mask, seq_len
    )
    jax.block_until_ready(out)
    assert out.shape == (B, max(decode_lengths), VOCAB)
    assert bool(jnp.all(jnp.isfinite(out)))
    print("KERNEL_OK")
</pallas_src>

<mosaic_0001>
module attributes {stable_mosaic.version = 11 : i64} {
  func.func @_fused_lm_kernel(%arg0: memref<2x8x32xf32, #tpu.memory_space<vmem>>, %arg1: memref<2x16x48xf32, #tpu.memory_space<vmem>>, %arg2: memref<2x8x8xf32, #tpu.memory_space<vmem>>, %arg3: memref<48x32xf32, #tpu.memory_space<vmem>>, %arg4: memref<1x32xf32, #tpu.memory_space<vmem>>, %arg5: memref<2x3x32xf32, #tpu.memory_space<vmem>>, %arg6: memref<2x3x32xf32, #tpu.memory_space<vmem>>, %arg7: memref<2x32x96xf32, #tpu.memory_space<vmem>>, %arg8: memref<2x1x96xf32, #tpu.memory_space<vmem>>, %arg9: memref<2x32x32xf32, #tpu.memory_space<vmem>>, %arg10: memref<2x1x32xf32, #tpu.memory_space<vmem>>, %arg11: memref<2x32x32xf32, #tpu.memory_space<vmem>>, %arg12: memref<2x1x32xf32, #tpu.memory_space<vmem>>, %arg13: memref<2x32x64xf32, #tpu.memory_space<vmem>>, %arg14: memref<2x1x64xf32, #tpu.memory_space<vmem>>, %arg15: memref<2x32x32xf32, #tpu.memory_space<vmem>>, %arg16: memref<2x1x32xf32, #tpu.memory_space<vmem>>, %arg17: memref<2x32x128xf32, #tpu.memory_space<vmem>>, %arg18: memref<2x1x128xf32, #tpu.memory_space<vmem>>, %arg19: memref<2x128x32xf32, #tpu.memory_space<vmem>>, %arg20: memref<2x1x32xf32, #tpu.memory_space<vmem>>, %arg21: memref<1x32xf32, #tpu.memory_space<vmem>>, %arg22: memref<1x32xf32, #tpu.memory_space<vmem>>, %arg23: memref<32x128xf32, #tpu.memory_space<vmem>>, %arg24: memref<1x128xf32, #tpu.memory_space<vmem>>, %arg25: memref<2x8x128xf32, #tpu.memory_space<vmem>>) attributes {dimension_semantics = [], scalar_prefetch = 0 : i64, scratch_operands = 0 : i64, tpu.core_type = #tpu.core_type<tc>} {
    %c0 = arith.constant 0 : index
    %c0_0 = arith.constant 0 : index
    %c0_1 = arith.constant 0 : index
    %0 = vector.load %arg1[%c0, %c0_0, %c0_1] : memref<2x16x48xf32, #tpu.memory_space<vmem>>, vector<2x16x48xf32>
    %1 = vector.shape_cast %0 : vector<2x16x48xf32> to vector<32x48xf32>
    %c0_2 = arith.constant 0 : index
    %c0_3 = arith.constant 0 : index
    %2 = vector.load %arg3[%c0_2, %c0_3] : memref<48x32xf32, #tpu.memory_space<vmem>>, vector<48x32xf32>
    %cst = arith.constant dense<0.000000e+00> : vector<32x32xf32>
    %3 = tpu.matmul %1, %2, %cst {dimension_numbers = #tpu.dot_dimension_numbers<[1], [0], [0], [1], [0, 0, 1, 1], [], []>} : vector<32x48xf32>, vector<48x32xf32>, vector<32x32xf32> -> vector<32x32xf32>
    %c0_4 = arith.constant 0 : index
    %c0_5 = arith.constant 0 : index
    %4 = vector.load %arg4[%c0_4, %c0_5] : memref<1x32xf32, #tpu.memory_space<vmem>>, vector<1x32xf32>
    %5 = vector.broadcast %4 : vector<1x32xf32> to vector<32x32xf32>
    %6 = arith.addf %3, %5 : vector<32x32xf32>
    %c0_6 = arith.constant 0 : index
    %c0_7 = arith.constant 0 : index
    %c0_8 = arith.constant 0 : index
    %7 = vector.load %arg2[%c0_6, %c0_7, %c0_8] : memref<2x8x8xf32, #tpu.memory_space<vmem>>, vector<2x8x8xf32>
    %c0_9 = arith.constant 0 : index
    %c0_10 = arith.constant 0 : index
    %c0_11 = arith.constant 0 : index
    %8 = vector.load %arg0[%c0_9, %c0_10, %c0_11] : memref<2x8x32xf32, #tpu.memory_space<vmem>>, vector<2x8x32xf32>
    %9 = vector.shape_cast %8 : vector<2x8x32xf32> to vector<16x32xf32>
    %c0_12 = arith.constant 0 : index
    %c0_13 = arith.constant 0 : index
    %c0_14 = arith.constant 0 : index
    %10 = vector.load %arg5[%c0_12, %c0_13, %c0_14] : memref<2x3x32xf32, #tpu.memory_space<vmem>>, vector<1x3x32xf32>
    %11 = vector.shape_cast %10 : vector<1x3x32xf32> to vector<3x32xf32>
    %c0_15 = arith.constant 0 : index
    %c0_16 = arith.constant 0 : index
    %c0_17 = arith.constant 0 : index
    %12 = vector.load %arg6[%c0_15, %c0_16, %c0_17] : memref<2x3x32xf32, #tpu.memory_space<vmem>>, vector<1x3x32xf32>
    %13 = vector.shape_cast %12 : vector<1x3x32xf32> to vector<3x32xf32>
    %14 = vector.extract_strided_slice %11 {offsets = [0, 0], sizes = [1, 32], strides = [1, 1]} : vector<3x32xf32> to vector<1x32xf32>
    %15 = vector.extract_strided_slice %13 {offsets = [0, 0], sizes = [1, 32], strides = [1, 1]} : vector<3x32xf32> to vector<1x32xf32>
    %cst_18 = arith.constant dense<0.000000e+00> : vector<16xf32>
    %16 = vector.multi_reduction <add>, %9, %cst_18 [1] : vector<16x32xf32> to vector<16xf32>
    %17 = vector.shape_cast %16 : vector<16xf32> to vector<16x1xf32>
    %cst_19 = arith.constant 3.200000e+01 : f32
    %18 = vector.broadcast %cst_19 : f32 to vector<16x1xf32>
    %19 = arith.divf %17, %18 : vector<16x1xf32>
    %20 = vector.broadcast %19 : vector<16x1xf32> to vector<16x32xf32>
    %21 = arith.subf %9, %20 : vector<16x32xf32>
    %22 = arith.mulf %21, %21 : vector<16x32xf32>
    %cst_20 = arith.constant dense<0.000000e+00> : vector<16xf32>
    %23 = vector.multi_reduction <add>, %22, %cst_20 [1] : vector<16x32xf32> to vector<16xf32>
    %24 = vector.shape_cast %23 : vector<16xf32> to vector<16x1xf32>
    %cst_21 = arith.constant 3.200000e+01 : f32
    %25 = vector.broadcast %cst_21 : f32 to vector<16x1xf32>
    %26 = arith.divf %24, %25 : vector<16x1xf32>
    %27 = vector.broadcast %19 : vector<16x1xf32> to vector<16x32xf32>
    %28 = arith.subf %9, %27 : vector<16x32xf32>
    %cst_22 = arith.constant 9.99999974E-6 : f32
    %29 = vector.broadcast %cst_22 : f32 to vector<16x1xf32>
    %30 = arith.addf %26, %29 : vector<16x1xf32>
    %31 = math.rsqrt %30 : vector<16x1xf32>
    %32 = vector.broadcast %31 : vector<16x1xf32> to vector<16x32xf32>
    %33 = arith.mulf %28, %32 : vector<16x32xf32>
    %34 = vector.broadcast %14 : vector<1x32xf32> to vector<16x32xf32>
    %35 = arith.mulf %33, %34 : vector<16x32xf32>
    %36 = vector.broadcast %15 : vector<1x32xf32> to vector<16x32xf32>
    %37 = arith.addf %35, %36 : vector<16x32xf32>
    %c0_23 = arith.constant 0 : index
    %c0_24 = arith.constant 0 : index
    %c0_25 = arith.constant 0 : index
    %38 = vector.load %arg7[%c0_23, %c0_24, %c0_25] : memref<2x32x96xf32, #tpu.memory_space<vmem>>, vector<1x32x96xf32>
    %39 = vector.shape_cast %38 : vector<1x32x96xf32> to vector<32x96xf32>
    %cst_26 = arith.constant dense<0.000000e+00> : vector<16x96xf32>
    %40 = tpu.matmul %37, %39, %cst_26 {dimension_numbers = #tpu.dot_dimension_numbers<[1], [0], [0], [1], [0, 0, 1, 1], [], []>} : vector<16x32xf32>, vector<32x96xf32>, vector<16x96xf32> -> vector<16x96xf32>
    %c0_27 = arith.constant 0 : index
    %c0_28 = arith.constant 0 : index
    %c0_29 = arith.constant 0 : index
    %41 = vector.load %arg8[%c0_27, %c0_28, %c0_29] : memref<2x1x96xf32, #tpu.memory_space<vmem>>, vector<1x1x96xf32>
    %42 = vector.shape_cast %41 : vector<1x1x96xf32> to vector<1x96xf32>
    %43 = vector.broadcast %42 : vector<1x96xf32> to vector<16x96xf32>
    %44 = arith.addf %40, %43 : vector<16x96xf32>
    %45 = vector.shape_cast %44 : vector<16x96xf32> to vector<2x8x96xf32>
    %c0_30 = arith.constant 0 : index
    %c0_31 = arith.constant 0 : index
    %c0_32 = arith.constant 0 : index
    %46 = vector.load %arg9[%c0_30, %c0_31, %c0_32] : memref<2x32x32xf32, #tpu.memory_space<vmem>>, vector<1x32x32xf32>
    %47 = vector.shape_cast %46 : vector<1x32x32xf32> to vector<32x32xf32>
    %cst_33 = arith.constant 0.000000e+00 : f32
    %48 = vector.broadcast %cst_33 : f32 to vector<16x32xf32>
    %49 = vector.extract_strided_slice %45 {offsets = [0, 0, 0], sizes = [2, 8, 8], strides = [1, 1, 1]} : vector<2x8x96xf32> to vector<2x8x8xf32>
    %50 = vector.extract_strided_slice %45 {offsets = [0, 0, 32], sizes = [2, 8, 8], strides = [1, 1, 1]} : vector<2x8x96xf32> to vector<2x8x8xf32>
    %51 = vector.extract_strided_slice %45 {offsets = [0, 0, 64], sizes = [2, 8, 8], strides = [1, 1, 1]} : vector<2x8x96xf32> to vector<2x8x8xf32>
    "tpu.trace_start"() <{level = 10 : i32, message = "bld,bsd->bls"}> : () -> ()
    %cst_34 = arith.constant dense<0.000000e+00> : vector<2x8x8xf32>
    %52 = tpu.matmul %49, %50, %cst_34 {dimension_numbers = #tpu.dot_dimension_numbers<[2], [2], [1], [1], [0, 0, 0, 1, 1, 1], [0], [0]>} : vector<2x8x8xf32>, vector<2x8x8xf32>, vector<2x8x8xf32> -> vector<2x8x8xf32>
    "tpu.trace_stop"() : () -> ()
    %cst_35 = arith.constant 0.353553385 : f32
    %53 = vector.broadcast %cst_35 : f32 to vector<2x8x8xf32>
    %54 = arith.mulf %52, %53 : vector<2x8x8xf32>
    %55 = arith.addf %54, %7 : vector<2x8x8xf32>
    %cst_36 = arith.constant dense<0xFF800000> : vector<2x8xf32>
    %56 = vector.multi_reduction <maximumf>, %55, %cst_36 [2] : vector<2x8x8xf32> to vector<2x8xf32>
    %57 = vector.shape_cast %56 : vector<2x8xf32> to vector<2x8x1xf32>
    %58 = vector.broadcast %57 : vector<2x8x1xf32> to vector<2x8x8xf32>
    %59 = arith.subf %55, %58 : vector<2x8x8xf32>
    %60 = math.exp %59 : vector<2x8x8xf32>
    %cst_37 = arith.constant dense<0.000000e+00> : vector<2x8xf32>
    %61 = vector.multi_reduction <add>, %60, %cst_37 [2] : vector<2x8x8xf32> to vector<2x8xf32>
    %62 = vector.shape_cast %61 : vector<2x8xf32> to vector<2x8x1xf32>
    %63 = tpu.reciprocal %62 {approx = true} : vector<2x8x1xf32> -> vector<2x8x1xf32>
    %64 = vector.broadcast %63 : vector<2x8x1xf32> to vector<2x8x8xf32>
    %65 = arith.mulf %60, %64 : vector<2x8x8xf32>
    "tpu.trace_start"() <{level = 10 : i32, message = "bls,bsd->bld"}> : () -> ()
    %cst_38 = arith.constant dense<0.000000e+00> : vector<2x8x8xf32>
    %66 = tpu.matmul %65, %51, %cst_38 {dimension_numbers = #tpu.dot_dimension_numbers<[2], [1], [1], [2], [0, 0, 0, 1, 1, 2], [0], [0]>} : vector<2x8x8xf32>, vector<2x8x8xf32>, vector<2x8x8xf32> -> vector<2x8x8xf32>
    "tpu.trace_stop"() : () -> ()
    %67 = vector.shape_cast %66 : vector<2x8x8xf32> to vector<16x8xf32>
    %68 = vector.extract_strided_slice %47 {offsets = [0, 0], sizes = [8, 32], strides = [1, 1]} : vector<32x32xf32> to vector<8x32xf32>
    %cst_39 = arith.constant dense<0.000000e+00> : vector<16x32xf32>
    %69 = tpu.matmul %67, %68, %cst_39 {dimension_numbers = #tpu.dot_dimension_numbers<[1], [0], [0], [1], [0, 0, 1, 1], [], []>} : vector<16x8xf32>, vector<8x32xf32>, vector<16x32xf32> -> vector<16x32xf32>
    %70 = arith.addf %48, %69 : vector<16x32xf32>
    %71 = vector.extract_strided_slice %45 {offsets = [0, 0, 8], sizes = [2, 8, 8], strides = [1, 1, 1]} : vector<2x8x96xf32> to vector<2x8x8xf32>
    %72 = vector.extract_strided_slice %45 {offsets = [0, 0, 40], sizes = [2, 8, 8], strides = [1, 1, 1]} : vector<2x8x96xf32> to vector<2x8x8xf32>
    %73 = vector.extract_strided_slice %45 {offsets = [0, 0, 72], sizes = [2, 8, 8], strides = [1, 1, 1]} : vector<2x8x96xf32> to vector<2x8x8xf32>
    "tpu.trace_start"() <{level = 10 : i32, message = "bld,bsd->bls"}> : () -> ()
    %cst_40 = arith.constant dense<0.000000e+00> : vector<2x8x8xf32>
    %74 = tpu.matmul %71, %72, %cst_40 {dimension_numbers = #tpu.dot_dimension_numbers<[2], [2], [1], [1], [0, 0, 0, 1, 1, 1], [0], [0]>} : vector<2x8x8xf32>, vector<2x8x8xf32>, vector<2x8x8xf32> -> vector<2x8x8xf32>
    "tpu.trace_stop"() : () -> ()
    %cst_41 = arith.constant 0.353553385 : f32
    %75 = vector.broadcast %cst_41 : f32 to vector<2x8x8xf32>
    %76 = arith.mulf %74, %75 : vector<2x8x8xf32>
    %77 = arith.addf %76, %7 : vector<2x8x8xf32>
    %cst_42 = arith.constant dense<0xFF800000> : vector<2x8xf32>
    %78 = vector.multi_reduction <maximumf>, %77, %cst_42 [2] : vector<2x8x8xf32> to vector<2x8xf32>
    %79 = vector.shape_cast %78 : vector<2x8xf32> to vector<2x8x1xf32>
    %80 = vector.broadcast %79 : vector<2x8x1xf32> to vector<2x8x8xf32>
    %81 = arith.subf %77, %80 : vector<2x8x8xf32>
    %82 = math.exp %81 : vector<2x8x8xf32>
    %cst_43 = arith.constant dense<0.000000e+00> : vector<2x8xf32>
    %83 = vector.multi_reduction <add>, %82, %cst_43 [2] : vector<2x8x8xf32> to vector<2x8xf32>
    %84 = vector.shape_cast %83 : vector<2x8xf32> to vector<2x8x1xf32>
    %85 = tpu.reciprocal %84 {approx = true} : vector<2x8x1xf32> -> vector<2x8x1xf32>
    %86 = vector.broadcast %85 : vector<2x8x1xf32> to vector<2x8x8xf32>
    %87 = arith.mulf %82, %86 : vector<2x8x8xf32>
    "tpu.trace_start"() <{level = 10 : i32, message = "bls,bsd->bld"}> : () -> ()
    %cst_44 = arith.constant dense<0.000000e+00> : vector<2x8x8xf32>
    %88 = tpu.matmul %87, %73, %cst_44 {dimension_numbers = #tpu.dot_dimension_numbers<[2], [1], [1], [2], [0, 0, 0, 1, 1, 2], [0], [0]>} : vector<2x8x8xf32>, vector<2x8x8xf32>, vector<2x8x8xf32> -> vector<2x8x8xf32>
    "tpu.trace_stop"() : () -> ()
    %89 = vector.shape_cast %88 : vector<2x8x8xf32> to vector<16x8xf32>
    %90 = vector.extract_strided_slice %47 {offsets = [8, 0], sizes = [8, 32], strides = [1, 1]} : vector<32x32xf32> to vector<8x32xf32>
    %cst_45 = arith.constant dense<0.000000e+00> : vector<16x32xf32>
    %91 = tpu.matmul %89, %90, %cst_45 {dimension_numbers = #tpu.dot_dimension_numbers<[1], [0], [0], [1], [0, 0, 1, 1], [], []>} : vector<16x8xf32>, vector<8x32xf32>, vector<16x32xf32> -> vector<16x32xf32>
    %92 = arith.addf %70, %91 : vector<16x32xf32>
    %93 = vector.extract_strided_slice %45 {offsets = [0, 0, 16], sizes = [2, 8, 8], strides = [1, 1, 1]} : vector<2x8x96xf32> to vector<2x8x8xf32>
    %94 = vector.extract_strided_slice %45 {offsets = [0, 0, 48], sizes = [2, 8, 8], strides = [1, 1, 1]} : vector<2x8x96xf32> to vector<2x8x8xf32>
    %95 = vector.extract_strided_slice %45 {offsets = [0, 0, 80], sizes = [2, 8, 8], strides = [1, 1, 1]} : vector<2x8x96xf32> to vector<2x8x8xf32>
    "tpu.trace_start"() <{level = 10 : i32, message = "bld,bsd->bls"}> : () -> ()
    %cst_46 = arith.constant dense<0.000000e+00> : vector<2x8x8xf32>
    %96 = tpu.matmul %93, %94, %cst_46 {dimension_numbers = #tpu.dot_dimension_numbers<[2], [2], [1], [1], [0, 0, 0, 1, 1, 1], [0], [0]>} : vector<2x8x8xf32>, vector<2x8x8xf32>, vector<2x8x8xf32> -> vector<2x8x8xf32>
    "tpu.trace_stop"() : () -> ()
    %cst_47 = arith.constant 0.353553385 : f32
    %97 = vector.broadcast %cst_47 : f32 to vector<2x8x8xf32>
    %98 = arith.mulf %96, %97 : vector<2x8x8xf32>
    %99 = arith.addf %98, %7 : vector<2x8x8xf32>
    %cst_48 = arith.constant dense<0xFF800000> : vector<2x8xf32>
    %100 = vector.multi_reduction <maximumf>, %99, %cst_48 [2] : vector<2x8x8xf32> to vector<2x8xf32>
    %101 = vector.shape_cast %100 : vector<2x8xf32> to vector<2x8x1xf32>
    %102 = vector.broadcast %101 : vector<2x8x1xf32> to vector<2x8x8xf32>
    %103 = arith.subf %99, %102 : vector<2x8x8xf32>
    %104 = math.exp %103 : vector<2x8x8xf32>
    %cst_49 = arith.constant dense<0.000000e+00> : vector<2x8xf32>
    %105 = vector.multi_reduction <add>, %104, %cst_49 [2] : vector<2x8x8xf32> to vector<2x8xf32>
    %106 = vector.shape_cast %105 : vector<2x8xf32> to vector<2x8x1xf32>
    %107 = tpu.reciprocal %106 {approx = true} : vector<2x8x1xf32> -> vector<2x8x1xf32>
    %108 = vector.broadcast %107 : vector<2x8x1xf32> to vector<2x8x8xf32>
    %109 = arith.mulf %104, %108 : vector<2x8x8xf32>
    "tpu.trace_start"() <{level = 10 : i32, message = "bls,bsd->bld"}> : () -> ()
    %cst_50 = arith.constant dense<0.000000e+00> : vector<2x8x8xf32>
    %110 = tpu.matmul %109, %95, %cst_50 {dimension_numbers = #tpu.dot_dimension_numbers<[2], [1], [1], [2], [0, 0, 0, 1, 1, 2], [0], [0]>} : vector<2x8x8xf32>, vector<2x8x8xf32>, vector<2x8x8xf32> -> vector<2x8x8xf32>
    "tpu.trace_stop"() : () -> ()
    %111 = vector.shape_cast %110 : vector<2x8x8xf32> to vector<16x8xf32>
    %112 = vector.extract_strided_slice %47 {offsets = [16, 0], sizes = [8, 32], strides = [1, 1]} : vector<32x32xf32> to vector<8x32xf32>
    %cst_51 = arith.constant dense<0.000000e+00> : vector<16x32xf32>
    %113 = tpu.matmul %111, %112, %cst_51 {dimension_numbers = #tpu.dot_dimension_numbers<[1], [0], [0], [1], [0, 0, 1, 1], [], []>} : vector<16x8xf32>, vector<8x32xf32>, vector<16x32xf32> -> vector<16x32xf32>
    %114 = arith.addf %92, %113 : vector<16x32xf32>
    %115 = vector.extract_strided_slice %45 {offsets = [0, 0, 24], sizes = [2, 8, 8], strides = [1, 1, 1]} : vector<2x8x96xf32> to vector<2x8x8xf32>
    %116 = vector.extract_strided_slice %45 {offsets = [0, 0, 56], sizes = [2, 8, 8], strides = [1, 1, 1]} : vector<2x8x96xf32> to vector<2x8x8xf32>
    %117 = vector.extract_strided_slice %45 {offsets = [0, 0, 88], sizes = [2, 8, 8], strides = [1, 1, 1]} : vector<2x8x96xf32> to vector<2x8x8xf32>
    "tpu.trace_start"() <{level = 10 : i32, message = "bld,bsd->bls"}> : () -> ()
    %cst_52 = arith.constant dense<0.000000e+00> : vector<2x8x8xf32>
    %118 = tpu.matmul %115, %116, %cst_52 {dimension_numbers = #tpu.dot_dimension_numbers<[2], [2], [1], [1], [0, 0, 0, 1, 1, 1], [0], [0]>} : vector<2x8x8xf32>, vector<2x8x8xf32>, vector<2x8x8xf32> -> vector<2x8x8xf32>
    "tpu.trace_stop"() : () -> ()
    %cst_53 = arith.constant 0.353553385 : f32
    %119 = vector.broadcast %cst_53 : f32 to vector<2x8x8xf32>
    %120 = arith.mulf %118, %119 : vector<2x8x8xf32>
    %121 = arith.addf %120, %7 : vector<2x8x8xf32>
    %cst_54 = arith.constant dense<0xFF800000> : vector<2x8xf32>
    %122 = vector.multi_reduction <maximumf>, %121, %cst_54 [2] : vector<2x8x8xf32> to vector<2x8xf32>
    %123 = vector.shape_cast %122 : vector<2x8xf32> to vector<2x8x1xf32>
    %124 = vector.broadcast %123 : vector<2x8x1xf32> to vector<2x8x8xf32>
    %125 = arith.subf %121, %124 : vector<2x8x8xf32>
    %126 = math.exp %125 : vector<2x8x8xf32>
    %cst_55 = arith.constant dense<0.000000e+00> : vector<2x8xf32>
    %127 = vector.multi_reduction <add>, %126, %cst_55 [2] : vector<2x8x8xf32> to vector<2x8xf32>
    %128 = vector.shape_cast %127 : vector<2x8xf32> to vector<2x8x1xf32>
    %129 = tpu.reciprocal %128 {approx = true} : vector<2x8x1xf32> -> vector<2x8x1xf32>
    %130 = vector.broadcast %129 : vector<2x8x1xf32> to vector<2x8x8xf32>
    %131 = arith.mulf %126, %130 : vector<2x8x8xf32>
    "tpu.trace_start"() <{level = 10 : i32, message = "bls,bsd->bld"}> : () -> ()
    %cst_56 = arith.constant dense<0.000000e+00> : vector<2x8x8xf32>
    %132 = tpu.matmul %131, %117, %cst_56 {dimension_numbers = #tpu.dot_dimension_numbers<[2], [1], [1], [2], [0, 0, 0, 1, 1, 2], [0], [0]>} : vector<2x8x8xf32>, vector<2x8x8xf32>, vector<2x8x8xf32> -> vector<2x8x8xf32>
    "tpu.trace_stop"() : () -> ()
    %133 = vector.shape_cast %132 : vector<2x8x8xf32> to vector<16x8xf32>
    %134 = vector.extract_strided_slice %47 {offsets = [24, 0], sizes = [8, 32], strides = [1, 1]} : vector<32x32xf32> to vector<8x32xf32>
    %cst_57 = arith.constant dense<0.000000e+00> : vector<16x32xf32>
    %135 = tpu.matmul %133, %134, %cst_57 {dimension_numbers = #tpu.dot_dimension_numbers<[1], [0], [0], [1], [0, 0, 1, 1], [], []>} : vector<16x8xf32>, vector<8x32xf32>, vector<16x32xf32> -> vector<16x32xf32>
    %136 = arith.addf %114, %135 : vector<16x32xf32>
    %137 = arith.addf %9, %136 : vector<16x32xf32>
    %c0_58 = arith.constant 0 : index
    %c0_59 = arith.constant 0 : index
    %c0_60 = arith.constant 0 : index
    %138 = vector.load %arg10[%c0_58, %c0_59, %c0_60] : memref<2x1x32xf32, #tpu.memory_space<vmem>>, vector<1x1x32xf32>
    %139 = vector.shape_cast %138 : vector<1x1x32xf32> to vector<1x32xf32>
    %140 = vector.broadcast %139 : vector<1x32xf32> to vector<16x32xf32>
    %141 = arith.addf %137, %140 : vector<16x32xf32>
    %142 = vector.extract_strided_slice %11 {offsets = [1, 0], sizes = [1, 32], strides = [1, 1]} : vector<3x32xf32> to vector<1x32xf32>
    %143 = vector.extract_strided_slice %13 {offsets = [1, 0], sizes = [1, 32], strides = [1, 1]} : vector<3x32xf32> to vector<1x32xf32>
    %cst_61 = arith.constant dense<0.000000e+00> : vector<16xf32>
    %144 = vector.multi_reduction <add>, %141, %cst_61 [1] : vector<16x32xf32> to vector<16xf32>
    %145 = vector.shape_cast %144 : vector<16xf32> to vector<16x1xf32>
    %cst_62 = arith.constant 3.200000e+01 : f32
    %146 = vector.broadcast %cst_62 : f32 to vector<16x1xf32>
    %147 = arith.divf %145, %146 : vector<16x1xf32>
    %148 = vector.broadcast %147 : vector<16x1xf32> to vector<16x32xf32>
    %149 = arith.subf %141, %148 : vector<16x32xf32>
    %150 = arith.mulf %149, %149 : vector<16x32xf32>
    %cst_63 = arith.constant dense<0.000000e+00> : vector<16xf32>
    %151 = vector.multi_reduction <add>, %150, %cst_63 [1] : vector<16x32xf32> to vector<16xf32>
    %152 = vector.shape_cast %151 : vector<16xf32> to vector<16x1xf32>
    %cst_64 = arith.constant 3.200000e+01 : f32
    %153 = vector.broadcast %cst_64 : f32 to vector<16x1xf32>
    %154 = arith.divf %152, %153 : vector<16x1xf32>
    %155 = vector.broadcast %147 : vector<16x1xf32> to vector<16x32xf32>
    %156 = arith.subf %141, %155 : vector<16x32xf32>
    %cst_65 = arith.constant 9.99999974E-6 : f32
    %157 = vector.broadcast %cst_65 : f32 to vector<16x1xf32>
    %158 = arith.addf %154, %157 : vector<16x1xf32>
    %159 = math.rsqrt %158 : vector<16x1xf32>
    %160 = vector.broadcast %159 : vector<16x1xf32> to vector<16x32xf32>
    %161 = arith.mulf %156, %160 : vector<16x32xf32>
    %162 = vector.broadcast %142 : vector<1x32xf32> to vector<16x32xf32>
    %163 = arith.mulf %161, %162 : vector<16x32xf32>
    %164 = vector.broadcast %143 : vector<1x32xf32> to vector<16x32xf32>
    %165 = arith.addf %163, %164 : vector<16x32xf32>
    %c0_66 = arith.constant 0 : index
    %c0_67 = arith.constant 0 : index
    %c0_68 = arith.constant 0 : index
    %166 = vector.load %arg11[%c0_66, %c0_67, %c0_68] : memref<2x32x32xf32, #tpu.memory_space<vmem>>, vector<1x32x32xf32>
    %167 = vector.shape_cast %166 : vector<1x32x32xf32> to vector<32x32xf32>
    %cst_69 = arith.constant dense<0.000000e+00> : vector<16x32xf32>
    %168 = tpu.matmul %165, %167, %cst_69 {dimension_numbers = #tpu.dot_dimension_numbers<[1], [0], [0], [1], [0, 0, 1, 1], [], []>} : vector<16x32xf32>, vector<32x32xf32>, vector<16x32xf32> -> vector<16x32xf32>
    %c0_70 = arith.constant 0 : index
    %c0_71 = arith.constant 0 : index
    %c0_72 = arith.constant 0 : index
    %169 = vector.load %arg12[%c0_70, %c0_71, %c0_72] : memref<2x1x32xf32, #tpu.memory_space<vmem>>, vector<1x1x32xf32>
    %170 = vector.shape_cast %169 : vector<1x1x32xf32> to vector<1x32xf32>
    %171 = vector.broadcast %170 : vector<1x32xf32> to vector<16x32xf32>
    %172 = arith.addf %168, %171 : vector<16x32xf32>
    %173 = vector.shape_cast %172 : vector<16x32xf32> to vector<2x8x32xf32>
    %c0_73 = arith.constant 0 : index
    %c0_74 = arith.constant 0 : index
    %c0_75 = arith.constant 0 : index
    %174 = vector.load %arg13[%c0_73, %c0_74, %c0_75] : memref<2x32x64xf32, #tpu.memory_space<vmem>>, vector<1x32x64xf32>
    %175 = vector.shape_cast %174 : vector<1x32x64xf32> to vector<32x64xf32>
    %cst_76 = arith.constant dense<0.000000e+00> : vector<32x64xf32>
    %176 = tpu.matmul %6, %175, %cst_76 {dimension_numbers = #tpu.dot_dimension_numbers<[1], [0], [0], [1], [0, 0, 1, 1], [], []>} : vector<32x32xf32>, vector<32x64xf32>, vector<32x64xf32> -> vector<32x64xf32>
    %c0_77 = arith.constant 0 : index
    %c0_78 = arith.constant 0 : index
    %c0_79 = arith.constant 0 : index
    %177 = vector.load %arg14[%c0_77, %c0_78, %c0_79] : memref<2x1x64xf32, #tpu.memory_space<vmem>>, vector<1x1x64xf32>
    %178 = vector.shape_cast %177 : vector<1x1x64xf32> to vector<1x64xf32>
    %179 = vector.broadcast %178 : vector<1x64xf32> to vector<32x64xf32>
    %180 = arith.addf %176, %179 : vector<32x64xf32>
    %181 = vector.shape_cast %180 : vector<32x64xf32> to vector<2x16x64xf32>
    %c0_80 = arith.constant 0 : index
    %c0_81 = arith.constant 0 : index
    %c0_82 = arith.constant 0 : index
    %182 = vector.load %arg15[%c0_80, %c0_81, %c0_82] : memref<2x32x32xf32, #tpu.memory_space<vmem>>, vector<1x32x32xf32>
    %183 = vector.shape_cast %182 : vector<1x32x32xf32> to vector<32x32xf32>
    %cst_83 = arith.constant 0.000000e+00 : f32
    %184 = vector.broadcast %cst_83 : f32 to vector<16x32xf32>
    %185 = vector.extract_strided_slice %173 {offsets = [0, 0, 0], sizes = [2, 8, 8], strides = [1, 1, 1]} : vector<2x8x32xf32> to vector<2x8x8xf32>
    %186 = vector.extract_strided_slice %181 {offsets = [0, 0, 0], sizes = [2, 16, 8], strides = [1, 1, 1]} : vector<2x16x64xf32> to vector<2x16x8xf32>
    %187 = vector.extract_strided_slice %181 {offsets = [0, 0, 32], sizes = [2, 16, 8], strides = [1, 1, 1]} : vector<2x16x64xf32> to vector<2x16x8xf32>
    "tpu.trace_start"() <{level = 10 : i32, message = "bld,bsd->bls"}> : () -> ()
    %cst_84 = arith.constant dense<0.000000e+00> : vector<2x8x16xf32>
    %188 = tpu.matmul %185, %186, %cst_84 {dimension_numbers = #tpu.dot_dimension_numbers<[2], [2], [1], [1], [0, 0, 0, 1, 1, 1], [0], [0]>} : vector<2x8x8xf32>, vector<2x16x8xf32>, vector<2x8x16xf32> -> vector<2x8x16xf32>
    "tpu.trace_stop"() : () -> ()
    %cst_85 = arith.constant 0.353553385 : f32
    %189 = vector.broadcast %cst_85 : f32 to vector<2x8x16xf32>
    %190 = arith.mulf %188, %189 : vector<2x8x16xf32>
    %cst_86 = arith.constant dense<0xFF800000> : vector<2x8xf32>
    %191 = vector.multi_reduction <maximumf>, %190, %cst_86 [2] : vector<2x8x16xf32> to vector<2x8xf32>
    %192 = vector.shape_cast %191 : vector<2x8xf32> to vector<2x8x1xf32>
    %193 = vector.broadcast %192 : vector<2x8x1xf32> to vector<2x8x16xf32>
    %194 = arith.subf %190, %193 : vector<2x8x16xf32>
    %195 = math.exp %194 : vector<2x8x16xf32>
    %cst_87 = arith.constant dense<0.000000e+00> : vector<2x8xf32>
    %196 = vector.multi_reduction <add>, %195, %cst_87 [2] : vector<2x8x16xf32> to vector<2x8xf32>
    %197 = vector.shape_cast %196 : vector<2x8xf32> to vector<2x8x1xf32>
    %198 = tpu.reciprocal %197 {approx = true} : vector<2x8x1xf32> -> vector<2x8x1xf32>
    %199 = vector.broadcast %198 : vector<2x8x1xf32> to vector<2x8x16xf32>
    %200 = arith.mulf %195, %199 : vector<2x8x16xf32>
    "tpu.trace_start"() <{level = 10 : i32, message = "bls,bsd->bld"}> : () -> ()
    %cst_88 = arith.constant dense<0.000000e+00> : vector<2x8x8xf32>
    %201 = tpu.matmul %200, %187, %cst_88 {dimension_numbers = #tpu.dot_dimension_numbers<[2], [1], [1], [2], [0, 0, 0, 1, 1, 2], [0], [0]>} : vector<2x8x16xf32>, vector<2x16x8xf32>, vector<2x8x8xf32> -> vector<2x8x8xf32>
    "tpu.trace_stop"() : () -> ()
    %202 = vector.shape_cast %201 : vector<2x8x8xf32> to vector<16x8xf32>
    %203 = vector.extract_strided_slice %183 {offsets = [0, 0], sizes = [8, 32], strides = [1, 1]} : vector<32x32xf32> to vector<8x32xf32>
    %cst_89 = arith.constant dense<0.000000e+00> : vector<16x32xf32>
    %204 = tpu.matmul %202, %203, %cst_89 {dimension_numbers = #tpu.dot_dimension_numbers<[1], [0], [0], [1], [0, 0, 1, 1], [], []>} : vector<16x8xf32>, vector<8x32xf32>, vector<16x32xf32> -> vector<16x32xf32>
    %205 = arith.addf %184, %204 : vector<16x32xf32>
    %206 = vector.extract_strided_slice %173 {offsets = [0, 0, 8], sizes = [2, 8, 8], strides = [1, 1, 1]} : vector<2x8x32xf32> to vector<2x8x8xf32>
    %207 = vector.extract_strided_slice %181 {offsets = [0, 0, 8], sizes = [2, 16, 8], strides = [1, 1, 1]} : vector<2x16x64xf32> to vector<2x16x8xf32>
    %208 = vector.extract_strided_slice %181 {offsets = [0, 0, 40], sizes = [2, 16, 8], strides = [1, 1, 1]} : vector<2x16x64xf32> to vector<2x16x8xf32>
    "tpu.trace_start"() <{level = 10 : i32, message = "bld,bsd->bls"}> : () -> ()
    %cst_90 = arith.constant dense<0.000000e+00> : vector<2x8x16xf32>
    %209 = tpu.matmul %206, %207, %cst_90 {dimension_numbers = #tpu.dot_dimension_numbers<[2], [2], [1], [1], [0, 0, 0, 1, 1, 1], [0], [0]>} : vector<2x8x8xf32>, vector<2x16x8xf32>, vector<2x8x16xf32> -> vector<2x8x16xf32>
    "tpu.trace_stop"() : () -> ()
    %cst_91 = arith.constant 0.353553385 : f32
    %210 = vector.broadcast %cst_91 : f32 to vector<2x8x16xf32>
    %211 = arith.mulf %209, %210 : vector<2x8x16xf32>
    %cst_92 = arith.constant dense<0xFF800000> : vector<2x8xf32>
    %212 = vector.multi_reduction <maximumf>, %211, %cst_92 [2] : vector<2x8x16xf32> to vector<2x8xf32>
    %213 = vector.shape_cast %212 : vector<2x8xf32> to vector<2x8x1xf32>
    %214 = vector.broadcast %213 : vector<2x8x1xf32> to vector<2x8x16xf32>
    %215 = arith.subf %211, %214 : vector<2x8x16xf32>
    %216 = math.exp %215 : vector<2x8x16xf32>
    %cst_93 = arith.constant dense<0.000000e+00> : vector<2x8xf32>
    %217 = vector.multi_reduction <add>, %216, %cst_93 [2] : vector<2x8x16xf32> to vector<2x8xf32>
    %218 = vector.shape_cast %217 : vector<2x8xf32> to vector<2x8x1xf32>
    %219 = tpu.reciprocal %218 {approx = true} : vector<2x8x1xf32> -> vector<2x8x1xf32>
    %220 = vector.broadcast %219 : vector<2x8x1xf32> to vector<2x8x16xf32>
    %221 = arith.mulf %216, %220 : vector<2x8x16xf32>
    "tpu.trace_start"() <{level = 10 : i32, message = "bls,bsd->bld"}> : () -> ()
    %cst_94 = arith.constant dense<0.000000e+00> : vector<2x8x8xf32>
    %222 = tpu.matmul %221, %208, %cst_94 {dimension_numbers = #tpu.dot_dimension_numbers<[2], [1], [1], [2], [0, 0, 0, 1, 1, 2], [0], [0]>} : vector<2x8x16xf32>, vector<2x16x8xf32>, vector<2x8x8xf32> -> vector<2x8x8xf32>
    "tpu.trace_stop"() : () -> ()
    %223 = vector.shape_cast %222 : vector<2x8x8xf32> to vector<16x8xf32>
    %224 = vector.extract_strided_slice %183 {offsets = [8, 0], sizes = [8, 32], strides = [1, 1]} : vector<32x32xf32> to vector<8x32xf32>
    %cst_95 = arith.constant dense<0.000000e+00> : vector<16x32xf32>
    %225 = tpu.matmul %223, %224, %cst_95 {dimension_numbers = #tpu.dot_dimension_numbers<[1], [0], [0], [1], [0, 0, 1, 1], [], []>} : vector<16x8xf32>, vector<8x32xf32>, vector<16x32xf32> -> vector<16x32xf32>
    %226 = arith.addf %205, %225 : vector<16x32xf32>
    %227 = vector.extract_strided_slice %173 {offsets = [0, 0, 16], sizes = [2, 8, 8], strides = [1, 1, 1]} : vector<2x8x32xf32> to vector<2x8x8xf32>
    %228 = vector.extract_strided_slice %181 {offsets = [0, 0, 16], sizes = [2, 16, 8], strides = [1, 1, 1]} : vector<2x16x64xf32> to vector<2x16x8xf32>
    %229 = vector.extract_strided_slice %181 {offsets = [0, 0, 48], sizes = [2, 16, 8], strides = [1, 1, 1]} : vector<2x16x64xf32> to vector<2x16x8xf32>
    "tpu.trace_start"() <{level = 10 : i32, message = "bld,bsd->bls"}> : () -> ()
    %cst_96 = arith.constant dense<0.000000e+00> : vector<2x8x16xf32>
    %230 = tpu.matmul %227, %228, %cst_96 {dimension_numbers = #tpu.dot_dimension_numbers<[2], [2], [1], [1], [0, 0, 0, 1, 1, 1], [0], [0]>} : vector<2x8x8xf32>, vector<2x16x8xf32>, vector<2x8x16xf32> -> vector<2x8x16xf32>
    "tpu.trace_stop"() : () -> ()
    %cst_97 = arith.constant 0.353553385 : f32
    %231 = vector.broadcast %cst_97 : f32 to vector<2x8x16xf32>
    %232 = arith.mulf %230, %231 : vector<2x8x16xf32>
    %cst_98 = arith.constant dense<0xFF800000> : vector<2x8xf32>
    %233 = vector.multi_reduction <maximumf>, %232, %cst_98 [2] : vector<2x8x16xf32> to vector<2x8xf32>
    %234 = vector.shape_cast %233 : vector<2x8xf32> to vector<2x8x1xf32>
    %235 = vector.broadcast %234 : vector<2x8x1xf32> to vector<2x8x16xf32>
    %236 = arith.subf %232, %235 : vector<2x8x16xf32>
    %237 = math.exp %236 : vector<2x8x16xf32>
    %cst_99 = arith.constant dense<0.000000e+00> : vector<2x8xf32>
    %238 = vector.multi_reduction <add>, %237, %cst_99 [2] : vector<2x8x16xf32> to vector<2x8xf32>
    %239 = vector.shape_cast %238 : vector<2x8xf32> to vector<2x8x1xf32>
    %240 = tpu.reciprocal %239 {approx = true} : vector<2x8x1xf32> -> vector<2x8x1xf32>
    %241 = vector.broadcast %240 : vector<2x8x1xf32> to vector<2x8x16xf32>
    %242 = arith.mulf %237, %241 : vector<2x8x16xf32>
    "tpu.trace_start"() <{level = 10 : i32, message = "bls,bsd->bld"}> : () -> ()
    %cst_100 = arith.constant dense<0.000000e+00> : vector<2x8x8xf32>
    %243 = tpu.matmul %242, %229, %cst_100 {dimension_numbers = #tpu.dot_dimension_numbers<[2], [1], [1], [2], [0, 0, 0, 1, 1, 2], [0], [0]>} : vector<2x8x16xf32>, vector<2x16x8xf32>, vector<2x8x8xf32> -> vector<2x8x8xf32>
    "tpu.trace_stop"() : () -> ()
    %244 = vector.shape_cast %243 : vector<2x8x8xf32> to vector<16x8xf32>
    %245 = vector.extract_strided_slice %183 {offsets = [16, 0], sizes = [8, 32], strides = [1, 1]} : vector<32x32xf32> to vector<8x32xf32>
    %cst_101 = arith.constant dense<0.000000e+00> : vector<16x32xf32>
    %246 = tpu.matmul %244, %245, %cst_101 {dimension_numbers = #tpu.dot_dimension_numbers<[1], [0], [0], [1], [0, 0, 1, 1], [], []>} : vector<16x8xf32>, vector<8x32xf32>, vector<16x32xf32> -> vector<16x32xf32>
    %247 = arith.addf %226, %246 : vector<16x32xf32>
    %248 = vector.extract_strided_slice %173 {offsets = [0, 0, 24], sizes = [2, 8, 8], strides = [1, 1, 1]} : vector<2x8x32xf32> to vector<2x8x8xf32>
    %249 = vector.extract_strided_slice %181 {offsets = [0, 0, 24], sizes = [2, 16, 8], strides = [1, 1, 1]} : vector<2x16x64xf32> to vector<2x16x8xf32>
    %250 = vector.extract_strided_slice %181 {offsets = [0, 0, 56], sizes = [2, 16, 8], strides = [1, 1, 1]} : vector<2x16x64xf32> to vector<2x16x8xf32>
    "tpu.trace_start"() <{level = 10 : i32, message = "bld,bsd->bls"}> : () -> ()
    %cst_102 = arith.constant dense<0.000000e+00> : vector<2x8x16xf32>
    %251 = tpu.matmul %248, %249, %cst_102 {dimension_numbers = #tpu.dot_dimension_numbers<[2], [2], [1], [1], [0, 0, 0, 1, 1, 1], [0], [0]>} : vector<2x8x8xf32>, vector<2x16x8xf32>, vector<2x8x16xf32> -> vector<2x8x16xf32>
    "tpu.trace_stop"() : () -> ()
    %cst_103 = arith.constant 0.353553385 : f32
    %252 = vector.broadcast %cst_103 : f32 to vector<2x8x16xf32>
    %253 = arith.mulf %251, %252 : vector<2x8x16xf32>
    %cst_104 = arith.constant dense<0xFF800000> : vector<2x8xf32>
    %254 = vector.multi_reduction <maximumf>, %253, %cst_104 [2] : vector<2x8x16xf32> to vector<2x8xf32>
    %255 = vector.shape_cast %254 : vector<2x8xf32> to vector<2x8x1xf32>
    %256 = vector.broadcast %255 : vector<2x8x1xf32> to vector<2x8x16xf32>
    %257 = arith.subf %253, %256 : vector<2x8x16xf32>
    %258 = math.exp %257 : vector<2x8x16xf32>
    %cst_105 = arith.constant dense<0.000000e+00> : vector<2x8xf32>
    %259 = vector.multi_reduction <add>, %258, %cst_105 [2] : vector<2x8x16xf32> to vector<2x8xf32>
    %260 = vector.shape_cast %259 : vector<2x8xf32> to vector<2x8x1xf32>
    %261 = tpu.reciprocal %260 {approx = true} : vector<2x8x1xf32> -> vector<2x8x1xf32>
    %262 = vector.broadcast %261 : vector<2x8x1xf32> to vector<2x8x16xf32>
    %263 = arith.mulf %258, %262 : vector<2x8x16xf32>
    "tpu.trace_start"() <{level = 10 : i32, message = "bls,bsd->bld"}> : () -> ()
    %cst_106 = arith.constant dense<0.000000e+00> : vector<2x8x8xf32>
    %264 = tpu.matmul %263, %250, %cst_106 {dimension_numbers = #tpu.dot_dimension_numbers<[2], [1], [1], [2], [0, 0, 0, 1, 1, 2], [0], [0]>} : vector<2x8x16xf32>, vector<2x16x8xf32>, vector<2x8x8xf32> -> vector<2x8x8xf32>
    "tpu.trace_stop"() : () -> ()
    %265 = vector.shape_cast %264 : vector<2x8x8xf32> to vector<16x8xf32>
    %266 = vector.extract_strided_slice %183 {offsets = [24, 0], sizes = [8, 32], strides = [1, 1]} : vector<32x32xf32> to vector<8x32xf32>
    %cst_107 = arith.constant dense<0.000000e+00> : vector<16x32xf32>
    %267 = tpu.matmul %265, %266, %cst_107 {dimension_numbers = #tpu.dot_dimension_numbers<[1], [0], [0], [1], [0, 0, 1, 1], [], []>} : vector<16x8xf32>, vector<8x32xf32>, vector<16x32xf32> -> vector<16x32xf32>
    %268 = arith.addf %247, %267 : vector<16x32xf32>
    %269 = arith.addf %141, %268 : vector<16x32xf32>
    %c0_108 = arith.constant 0 : index
    %c0_109 = arith.constant 0 : index
    %c0_110 = arith.constant 0 : index
    %270 = vector.load %arg16[%c0_108, %c0_109, %c0_110] : memref<2x1x32xf32, #tpu.memory_space<vmem>>, vector<1x1x32xf32>
    %271 = vector.shape_cast %270 : vector<1x1x32xf32> to vector<1x32xf32>
    %272 = vector.broadcast %271 : vector<1x32xf32> to vector<16x32xf32>
    %273 = arith.addf %269, %272 : vector<16x32xf32>
    %274 = vector.extract_strided_slice %11 {offsets = [2, 0], sizes = [1, 32], strides = [1, 1]} : vector<3x32xf32> to vector<1x32xf32>
    %275 = vector.extract_strided_slice %13 {offsets = [2, 0], sizes = [1, 32], strides = [1, 1]} : vector<3x32xf32> to vector<1x32xf32>
    %cst_111 = arith.constant dense<0.000000e+00> : vector<16xf32>
    %276 = vector.multi_reduction <add>, %273, %cst_111 [1] : vector<16x32xf32> to vector<16xf32>
    %277 = vector.shape_cast %276 : vector<16xf32> to vector<16x1xf32>
    %cst_112 = arith.constant 3.200000e+01 : f32
    %278 = vector.broadcast %cst_112 : f32 to vector<16x1xf32>
    %279 = arith.divf %277, %278 : vector<16x1xf32>
    %280 = vector.broadcast %279 : vector<16x1xf32> to vector<16x32xf32>
    %281 = arith.subf %273, %280 : vector<16x32xf32>
    %282 = arith.mulf %281, %281 : vector<16x32xf32>
    %cst_113 = arith.constant dense<0.000000e+00> : vector<16xf32>
    %283 = vector.multi_reduction <add>, %282, %cst_113 [1] : vector<16x32xf32> to vector<16xf32>
    %284 = vector.shape_cast %283 : vector<16xf32> to vector<16x1xf32>
    %cst_114 = arith.constant 3.200000e+01 : f32
    %285 = vector.broadcast %cst_114 : f32 to vector<16x1xf32>
    %286 = arith.divf %284, %285 : vector<16x1xf32>
    %287 = vector.broadcast %279 : vector<16x1xf32> to vector<16x32xf32>
    %288 = arith.subf %273, %287 : vector<16x32xf32>
    %cst_115 = arith.constant 9.99999974E-6 : f32
    %289 = vector.broadcast %cst_115 : f32 to vector<16x1xf32>
    %290 = arith.addf %286, %289 : vector<16x1xf32>
    %291 = math.rsqrt %290 : vector<16x1xf32>
    %292 = vector.broadcast %291 : vector<16x1xf32> to vector<16x32xf32>
    %293 = arith.mulf %288, %292 : vector<16x32xf32>
    %294 = vector.broadcast %274 : vector<1x32xf32> to vector<16x32xf32>
    %295 = arith.mulf %293, %294 : vector<16x32xf32>
    %296 = vector.broadcast %275 : vector<1x32xf32> to vector<16x32xf32>
    %297 = arith.addf %295, %296 : vector<16x32xf32>
    %c0_116 = arith.constant 0 : index
    %c0_117 = arith.constant 0 : index
    %c0_118 = arith.constant 0 : index
    %298 = vector.load %arg17[%c0_116, %c0_117, %c0_118] : memref<2x32x128xf32, #tpu.memory_space<vmem>>, vector<1x32x128xf32>
    %299 = vector.shape_cast %298 : vector<1x32x128xf32> to vector<32x128xf32>
    %cst_119 = arith.constant dense<0.000000e+00> : vector<16x128xf32>
    %300 = tpu.matmul %297, %299, %cst_119 {dimension_numbers = #tpu.dot_dimension_numbers<[1], [0], [0], [1], [0, 0, 1, 1], [], []>} : vector<16x32xf32>, vector<32x128xf32>, vector<16x128xf32> -> vector<16x128xf32>
    %c0_120 = arith.constant 0 : index
    %c0_121 = arith.constant 0 : index
    %c0_122 = arith.constant 0 : index
    %301 = vector.load %arg18[%c0_120, %c0_121, %c0_122] : memref<2x1x128xf32, #tpu.memory_space<vmem>>, vector<1x1x128xf32>
    %302 = vector.shape_cast %301 : vector<1x1x128xf32> to vector<1x128xf32>
    %303 = vector.broadcast %302 : vector<1x128xf32> to vector<16x128xf32>
    %304 = arith.addf %300, %303 : vector<16x128xf32>
    %cst_123 = arith.constant 0.707106769 : f32
    %305 = vector.broadcast %cst_123 : f32 to vector<16x128xf32>
    %306 = arith.mulf %304, %305 : vector<16x128xf32>
    %307 = math.absf %306 : vector<16x128xf32>
    %cst_124 = arith.constant 0.327591091 : f32
    %308 = vector.broadcast %cst_124 : f32 to vector<16x128xf32>
    %309 = arith.mulf %308, %307 : vector<16x128xf32>
    %cst_125 = arith.constant 1.000000e+00 : f32
    %310 = vector.broadcast %cst_125 : f32 to vector<16x128xf32>
    %311 = arith.addf %310, %309 : vector<16x128xf32>
    %cst_126 = arith.constant 1.000000e+00 : f32
    %312 = vector.broadcast %cst_126 : f32 to vector<16x128xf32>
    %313 = arith.divf %312, %311 : vector<16x128xf32>
    %cst_127 = arith.constant 1.06140542 : f32
    %314 = vector.broadcast %cst_127 : f32 to vector<16x128xf32>
    %315 = arith.mulf %313, %314 : vector<16x128xf32>
    %cst_128 = arith.constant -1.45315206 : f32
    %316 = vector.broadcast %cst_128 : f32 to vector<16x128xf32>
    %317 = arith.addf %316, %315 : vector<16x128xf32>
    %318 = arith.mulf %313, %317 : vector<16x128xf32>
    %cst_129 = arith.constant 1.42141378 : f32
    %319 = vector.broadcast %cst_129 : f32 to vector<16x128xf32>
    %320 = arith.addf %319, %318 : vector<16x128xf32>
    %321 = arith.mulf %313, %320 : vector<16x128xf32>
    %cst_130 = arith.constant -0.284496725 : f32
    %322 = vector.broadcast %cst_130 : f32 to vector<16x128xf32>
    %323 = arith.addf %322, %321 : vector<16x128xf32>
    %324 = arith.mulf %313, %323 : vector<16x128xf32>
    %cst_131 = arith.constant 0.254829586 : f32
    %325 = vector.broadcast %cst_131 : f32 to vector<16x128xf32>
    %326 = arith.addf %325, %324 : vector<16x128xf32>
    %327 = arith.mulf %313, %326 : vector<16x128xf32>
    %cst_132 = arith.constant 0.000000e+00 : f32
    %328 = vector.broadcast %cst_132 : f32 to vector<16x128xf32>
    %329 = arith.subf %328, %307 : vector<16x128xf32>
    %330 = arith.mulf %329, %307 : vector<16x128xf32>
    %331 = math.exp %330 : vector<16x128xf32>
    %332 = arith.mulf %327, %331 : vector<16x128xf32>
    %cst_133 = arith.constant 1.000000e+00 : f32
    %333 = vector.broadcast %cst_133 : f32 to vector<16x128xf32>
    %334 = arith.subf %333, %332 : vector<16x128xf32>
    %cst_134 = arith.constant 0.000000e+00 : f32
    %335 = vector.broadcast %cst_134 : f32 to vector<16x128xf32>
    %336 = arith.cmpf oge, %306, %335 : vector<16x128xf32>
    %cst_135 = arith.constant 0.000000e+00 : f32
    %337 = vector.broadcast %cst_135 : f32 to vector<16x128xf32>
    %338 = arith.subf %337, %334 : vector<16x128xf32>
    %339 = arith.select %336, %334, %338 : vector<16x128xi1>, vector<16x128xf32>
    %cst_136 = arith.constant 5.000000e-01 : f32
    %340 = vector.broadcast %cst_136 : f32 to vector<16x128xf32>
    %341 = arith.mulf %340, %304 : vector<16x128xf32>
    %cst_137 = arith.constant 1.000000e+00 : f32
    %342 = vector.broadcast %cst_137 : f32 to vector<16x128xf32>
    %343 = arith.addf %342, %339 : vector<16x128xf32>
    %344 = arith.mulf %341, %343 : vector<16x128xf32>
    %c0_138 = arith.constant 0 : index
    %c0_139 = arith.constant 0 : index
    %c0_140 = arith.constant 0 : index
    %345 = vector.load %arg19[%c0_138, %c0_139, %c0_140] : memref<2x128x32xf32, #tpu.memory_space<vmem>>, vector<1x128x32xf32>
    %346 = vector.shape_cast %345 : vector<1x128x32xf32> to vector<128x32xf32>
    %cst_141 = arith.constant dense<0.000000e+00> : vector<16x32xf32>
    %347 = tpu.matmul %344, %346, %cst_141 {dimension_numbers = #tpu.dot_dimension_numbers<[1], [0], [0], [1], [0, 0, 1, 1], [], []>} : vector<16x128xf32>, vector<128x32xf32>, vector<16x32xf32> -> vector<16x32xf32>
    %348 = arith.addf %273, %347 : vector<16x32xf32>
    %c0_142 = arith.constant 0 : index
    %c0_143 = arith.constant 0 : index
    %c0_144 = arith.constant 0 : index
    %349 = vector.load %arg20[%c0_142, %c0_143, %c0_144] : memref<2x1x32xf32, #tpu.memory_space<vmem>>, vector<1x1x32xf32>
    %350 = vector.shape_cast %349 : vector<1x1x32xf32> to vector<1x32xf32>
    %351 = vector.broadcast %350 : vector<1x32xf32> to vector<16x32xf32>
    %352 = arith.addf %348, %351 : vector<16x32xf32>
    %c1 = arith.constant 1 : index
    %c0_145 = arith.constant 0 : index
    %c0_146 = arith.constant 0 : index
    %353 = vector.load %arg5[%c1, %c0_145, %c0_146] : memref<2x3x32xf32, #tpu.memory_space<vmem>>, vector<1x3x32xf32>
    %354 = vector.shape_cast %353 : vector<1x3x32xf32> to vector<3x32xf32>
    %c1_147 = arith.constant 1 : index
    %c0_148 = arith.constant 0 : index
    %c0_149 = arith.constant 0 : index
    %355 = vector.load %arg6[%c1_147, %c0_148, %c0_149] : memref<2x3x32xf32, #tpu.memory_space<vmem>>, vector<1x3x32xf32>
    %356 = vector.shape_cast %355 : vector<1x3x32xf32> to vector<3x32xf32>
    %357 = vector.extract_strided_slice %354 {offsets = [0, 0], sizes = [1, 32], strides = [1, 1]} : vector<3x32xf32> to vector<1x32xf32>
    %358 = vector.extract_strided_slice %356 {offsets = [0, 0], sizes = [1, 32], strides = [1, 1]} : vector<3x32xf32> to vector<1x32xf32>
    %cst_150 = arith.constant dense<0.000000e+00> : vector<16xf32>
    %359 = vector.multi_reduction <add>, %352, %cst_150 [1] : vector<16x32xf32> to vector<16xf32>
    %360 = vector.shape_cast %359 : vector<16xf32> to vector<16x1xf32>
    %cst_151 = arith.constant 3.200000e+01 : f32
    %361 = vector.broadcast %cst_151 : f32 to vector<16x1xf32>
    %362 = arith.divf %360, %361 : vector<16x1xf32>
    %363 = vector.broadcast %362 : vector<16x1xf32> to vector<16x32xf32>
    %364 = arith.subf %352, %363 : vector<16x32xf32>
    %365 = arith.mulf %364, %364 : vector<16x32xf32>
    %cst_152 = arith.constant dense<0.000000e+00> : vector<16xf32>
    %366 = vector.multi_reduction <add>, %365, %cst_152 [1] : vector<16x32xf32> to vector<16xf32>
    %367 = vector.shape_cast %366 : vector<16xf32> to vector<16x1xf32>
    %cst_153 = arith.constant 3.200000e+01 : f32
    %368 = vector.broadcast %cst_153 : f32 to vector<16x1xf32>
    %369 = arith.divf %367, %368 : vector<16x1xf32>
    %370 = vector.broadcast %362 : vector<16x1xf32> to vector<16x32xf32>
    %371 = arith.subf %352, %370 : vector<16x32xf32>
    %cst_154 = arith.constant 9.99999974E-6 : f32
    %372 = vector.broadcast %cst_154 : f32 to vector<16x1xf32>
    %373 = arith.addf %369, %372 : vector<16x1xf32>
    %374 = math.rsqrt %373 : vector<16x1xf32>
    %375 = vector.broadcast %374 : vector<16x1xf32> to vector<16x32xf32>
    %376 = arith.mulf %371, %375 : vector<16x32xf32>
    %377 = vector.broadcast %357 : vector<1x32xf32> to vector<16x32xf32>
    %378 = arith.mulf %376, %377 : vector<16x32xf32>
    %379 = vector.broadcast %358 : vector<1x32xf32> to vector<16x32xf32>
    %380 = arith.addf %378, %379 : vector<16x32xf32>
    %c1_155 = arith.constant 1 : index
    %c0_156 = arith.constant 0 : index
    %c0_157 = arith.constant 0 : index
    %381 = vector.load %arg7[%c1_155, %c0_156, %c0_157] : memref<2x32x96xf32, #tpu.memory_space<vmem>>, vector<1x32x96xf32>
    %382 = vector.shape_cast %381 : vector<1x32x96xf32> to vector<32x96xf32>
    %cst_158 = arith.constant dense<0.000000e+00> : vector<16x96xf32>
    %383 = tpu.matmul %380, %382, %cst_158 {dimension_numbers = #tpu.dot_dimension_numbers<[1], [0], [0], [1], [0, 0, 1, 1], [], []>} : vector<16x32xf32>, vector<32x96xf32>, vector<16x96xf32> -> vector<16x96xf32>
    %c1_159 = arith.constant 1 : index
    %c0_160 = arith.constant 0 : index
    %c0_161 = arith.constant 0 : index
    %384 = vector.load %arg8[%c1_159, %c0_160, %c0_161] : memref<2x1x96xf32, #tpu.memory_space<vmem>>, vector<1x1x96xf32>
    %385 = vector.shape_cast %384 : vector<1x1x96xf32> to vector<1x96xf32>
    %386 = vector.broadcast %385 : vector<1x96xf32> to vector<16x96xf32>
    %387 = arith.addf %383, %386 : vector<16x96xf32>
    %388 = vector.shape_cast %387 : vector<16x96xf32> to vector<2x8x96xf32>
    %c1_162 = arith.constant 1 : index
    %c0_163 = arith.constant 0 : index
    %c0_164 = arith.constant 0 : index
    %389 = vector.load %arg9[%c1_162, %c0_163, %c0_164] : memref<2x32x32xf32, #tpu.memory_space<vmem>>, vector<1x32x32xf32>
    %390 = vector.shape_cast %389 : vector<1x32x32xf32> to vector<32x32xf32>
    %cst_165 = arith.constant 0.000000e+00 : f32
    %391 = vector.broadcast %cst_165 : f32 to vector<16x32xf32>
    %392 = vector.extract_strided_slice %388 {offsets = [0, 0, 0], sizes = [2, 8, 8], strides = [1, 1, 1]} : vector<2x8x96xf32> to vector<2x8x8xf32>
    %393 = vector.extract_strided_slice %388 {offsets = [0, 0, 32], sizes = [2, 8, 8], strides = [1, 1, 1]} : vector<2x8x96xf32> to vector<2x8x8xf32>
    %394 = vector.extract_strided_slice %388 {offsets = [0, 0, 64], sizes = [2, 8, 8], strides = [1, 1, 1]} : vector<2x8x96xf32> to vector<2x8x8xf32>
    "tpu.trace_start"() <{level = 10 : i32, message = "bld,bsd->bls"}> : () -> ()
    %cst_166 = arith.constant dense<0.000000e+00> : vector<2x8x8xf32>
    %395 = tpu.matmul %392, %393, %cst_166 {dimension_numbers = #tpu.dot_dimension_numbers<[2], [2], [1], [1], [0, 0, 0, 1, 1, 1], [0], [0]>} : vector<2x8x8xf32>, vector<2x8x8xf32>, vector<2x8x8xf32> -> vector<2x8x8xf32>
    "tpu.trace_stop"() : () -> ()
    %cst_167 = arith.constant 0.353553385 : f32
    %396 = vector.broadcast %cst_167 : f32 to vector<2x8x8xf32>
    %397 = arith.mulf %395, %396 : vector<2x8x8xf32>
    %398 = arith.addf %397, %7 : vector<2x8x8xf32>
    %cst_168 = arith.constant dense<0xFF800000> : vector<2x8xf32>
    %399 = vector.multi_reduction <maximumf>, %398, %cst_168 [2] : vector<2x8x8xf32> to vector<2x8xf32>
    %400 = vector.shape_cast %399 : vector<2x8xf32> to vector<2x8x1xf32>
    %401 = vector.broadcast %400 : vector<2x8x1xf32> to vector<2x8x8xf32>
    %402 = arith.subf %398, %401 : vector<2x8x8xf32>
    %403 = math.exp %402 : vector<2x8x8xf32>
    %cst_169 = arith.constant dense<0.000000e+00> : vector<2x8xf32>
    %404 = vector.multi_reduction <add>, %403, %cst_169 [2] : vector<2x8x8xf32> to vector<2x8xf32>
    %405 = vector.shape_cast %404 : vector<2x8xf32> to vector<2x8x1xf32>
    %406 = tpu.reciprocal %405 {approx = true} : vector<2x8x1xf32> -> vector<2x8x1xf32>
    %407 = vector.broadcast %406 : vector<2x8x1xf32> to vector<2x8x8xf32>
    %408 = arith.mulf %403, %407 : vector<2x8x8xf32>
    "tpu.trace_start"() <{level = 10 : i32, message = "bls,bsd->bld"}> : () -> ()
    %cst_170 = arith.constant dense<0.000000e+00> : vector<2x8x8xf32>
    %409 = tpu.matmul %408, %394, %cst_170 {dimension_numbers = #tpu.dot_dimension_numbers<[2], [1], [1], [2], [0, 0, 0, 1, 1, 2], [0], [0]>} : vector<2x8x8xf32>, vector<2x8x8xf32>, vector<2x8x8xf32> -> vector<2x8x8xf32>
    "tpu.trace_stop"() : () -> ()
    %410 = vector.shape_cast %409 : vector<2x8x8xf32> to vector<16x8xf32>
    %411 = vector.extract_strided_slice %390 {offsets = [0, 0], sizes = [8, 32], strides = [1, 1]} : vector<32x32xf32> to vector<8x32xf32>
    %cst_171 = arith.constant dense<0.000000e+00> : vector<16x32xf32>
    %412 = tpu.matmul %410, %411, %cst_171 {dimension_numbers = #tpu.dot_dimension_numbers<[1], [0], [0], [1], [0, 0, 1, 1], [], []>} : vector<16x8xf32>, vector<8x32xf32>, vector<16x32xf32> -> vector<16x32xf32>
    %413 = arith.addf %391, %412 : vector<16x32xf32>
    %414 = vector.extract_strided_slice %388 {offsets = [0, 0, 8], sizes = [2, 8, 8], strides = [1, 1, 1]} : vector<2x8x96xf32> to vector<2x8x8xf32>
    %415 = vector.extract_strided_slice %388 {offsets = [0, 0, 40], sizes = [2, 8, 8], strides = [1, 1, 1]} : vector<2x8x96xf32> to vector<2x8x8xf32>
    %416 = vector.extract_strided_slice %388 {offsets = [0, 0, 72], sizes = [2, 8, 8], strides = [1, 1, 1]} : vector<2x8x96xf32> to vector<2x8x8xf32>
    "tpu.trace_start"() <{level = 10 : i32, message = "bld,bsd->bls"}> : () -> ()
    %cst_172 = arith.constant dense<0.000000e+00> : vector<2x8x8xf32>
    %417 = tpu.matmul %414, %415, %cst_172 {dimension_numbers = #tpu.dot_dimension_numbers<[2], [2], [1], [1], [0, 0, 0, 1, 1, 1], [0], [0]>} : vector<2x8x8xf32>, vector<2x8x8xf32>, vector<2x8x8xf32> -> vector<2x8x8xf32>
    "tpu.trace_stop"() : () -> ()
    %cst_173 = arith.constant 0.353553385 : f32
    %418 = vector.broadcast %cst_173 : f32 to vector<2x8x8xf32>
    %419 = arith.mulf %417, %418 : vector<2x8x8xf32>
    %420 = arith.addf %419, %7 : vector<2x8x8xf32>
    %cst_174 = arith.constant dense<0xFF800000> : vector<2x8xf32>
    %421 = vector.multi_reduction <maximumf>, %420, %cst_174 [2] : vector<2x8x8xf32> to vector<2x8xf32>
    %422 = vector.shape_cast %421 : vector<2x8xf32> to vector<2x8x1xf32>
    %423 = vector.broadcast %422 : vector<2x8x1xf32> to vector<2x8x8xf32>
    %424 = arith.subf %420, %423 : vector<2x8x8xf32>
    %425 = math.exp %424 : vector<2x8x8xf32>
    %cst_175 = arith.constant dense<0.000000e+00> : vector<2x8xf32>
    %426 = vector.multi_reduction <add>, %425, %cst_175 [2] : vector<2x8x8xf32> to vector<2x8xf32>
    %427 = vector.shape_cast %426 : vector<2x8xf32> to vector<2x8x1xf32>
    %428 = tpu.reciprocal %427 {approx = true} : vector<2x8x1xf32> -> vector<2x8x1xf32>
    %429 = vector.broadcast %428 : vector<2x8x1xf32> to vector<2x8x8xf32>
    %430 = arith.mulf %425, %429 : vector<2x8x8xf32>
    "tpu.trace_start"() <{level = 10 : i32, message = "bls,bsd->bld"}> : () -> ()
    %cst_176 = arith.constant dense<0.000000e+00> : vector<2x8x8xf32>
    %431 = tpu.matmul %430, %416, %cst_176 {dimension_numbers = #tpu.dot_dimension_numbers<[2], [1], [1], [2], [0, 0, 0, 1, 1, 2], [0], [0]>} : vector<2x8x8xf32>, vector<2x8x8xf32>, vector<2x8x8xf32> -> vector<2x8x8xf32>
    "tpu.trace_stop"() : () -> ()
    %432 = vector.shape_cast %431 : vector<2x8x8xf32> to vector<16x8xf32>
    %433 = vector.extract_strided_slice %390 {offsets = [8, 0], sizes = [8, 32], strides = [1, 1]} : vector<32x32xf32> to vector<8x32xf32>
    %cst_177 = arith.constant dense<0.000000e+00> : vector<16x32xf32>
    %434 = tpu.matmul %432, %433, %cst_177 {dimension_numbers = #tpu.dot_dimension_numbers<[1], [0], [0], [1], [0, 0, 1, 1], [], []>} : vector<16x8xf32>, vector<8x32xf32>, vector<16x32xf32> -> vector<16x32xf32>
    %435 = arith.addf %413, %434 : vector<16x32xf32>
    %436 = vector.extract_strided_slice %388 {offsets = [0, 0, 16], sizes = [2, 8, 8], strides = [1, 1, 1]} : vector<2x8x96xf32> to vector<2x8x8xf32>
    %437 = vector.extract_strided_slice %388 {offsets = [0, 0, 48], sizes = [2, 8, 8], strides = [1, 1, 1]} : vector<2x8x96xf32> to vector<2x8x8xf32>
    %438 = vector.extract_strided_slice %388 {offsets = [0, 0, 80], sizes = [2, 8, 8], strides = [1, 1, 1]} : vector<2x8x96xf32> to vector<2x8x8xf32>
    "tpu.trace_start"() <{level = 10 : i32, message = "bld,bsd->bls"}> : () -> ()
    %cst_178 = arith.constant dense<0.000000e+00> : vector<2x8x8xf32>
    %439 = tpu.matmul %436, %437, %cst_178 {dimension_numbers = #tpu.dot_dimension_numbers<[2], [2], [1], [1], [0, 0, 0, 1, 1, 1], [0], [0]>} : vector<2x8x8xf32>, vector<2x8x8xf32>, vector<2x8x8xf32> -> vector<2x8x8xf32>
    "tpu.trace_stop"() : () -> ()
    %cst_179 = arith.constant 0.353553385 : f32
    %440 = vector.broadcast %cst_179 : f32 to vector<2x8x8xf32>
    %441 = arith.mulf %439, %440 : vector<2x8x8xf32>
    %442 = arith.addf %441, %7 : vector<2x8x8xf32>
    %cst_180 = arith.constant dense<0xFF800000> : vector<2x8xf32>
    %443 = vector.multi_reduction <maximumf>, %442, %cst_180 [2] : vector<2x8x8xf32> to vector<2x8xf32>
    %444 = vector.shape_cast %443 : vector<2x8xf32> to vector<2x8x1xf32>
    %445 = vector.broadcast %444 : vector<2x8x1xf32> to vector<2x8x8xf32>
    %446 = arith.subf %442, %445 : vector<2x8x8xf32>
    %447 = math.exp %446 : vector<2x8x8xf32>
    %cst_181 = arith.constant dense<0.000000e+00> : vector<2x8xf32>
    %448 = vector.multi_reduction <add>, %447, %cst_181 [2] : vector<2x8x8xf32> to vector<2x8xf32>
    %449 = vector.shape_cast %448 : vector<2x8xf32> to vector<2x8x1xf32>
    %450 = tpu.reciprocal %449 {approx = true} : vector<2x8x1xf32> -> vector<2x8x1xf32>
    %451 = vector.broadcast %450 : vector<2x8x1xf32> to vector<2x8x8xf32>
    %452 = arith.mulf %447, %451 : vector<2x8x8xf32>
    "tpu.trace_start"() <{level = 10 : i32, message = "bls,bsd->bld"}> : () -> ()
    %cst_182 = arith.constant dense<0.000000e+00> : vector<2x8x8xf32>
    %453 = tpu.matmul %452, %438, %cst_182 {dimension_numbers = #tpu.dot_dimension_numbers<[2], [1], [1], [2], [0, 0, 0, 1, 1, 2], [0], [0]>} : vector<2x8x8xf32>, vector<2x8x8xf32>, vector<2x8x8xf32> -> vector<2x8x8xf32>
    "tpu.trace_stop"() : () -> ()
    %454 = vector.shape_cast %453 : vector<2x8x8xf32> to vector<16x8xf32>
    %455 = vector.extract_strided_slice %390 {offsets = [16, 0], sizes = [8, 32], strides = [1, 1]} : vector<32x32xf32> to vector<8x32xf32>
    %cst_183 = arith.constant dense<0.000000e+00> : vector<16x32xf32>
    %456 = tpu.matmul %454, %455, %cst_183 {dimension_numbers = #tpu.dot_dimension_numbers<[1], [0], [0], [1], [0, 0, 1, 1], [], []>} : vector<16x8xf32>, vector<8x32xf32>, vector<16x32xf32> -> vector<16x32xf32>
    %457 = arith.addf %435, %456 : vector<16x32xf32>
    %458 = vector.extract_strided_slice %388 {offsets = [0, 0, 24], sizes = [2, 8, 8], strides = [1, 1, 1]} : vector<2x8x96xf32> to vector<2x8x8xf32>
    %459 = vector.extract_strided_slice %388 {offsets = [0, 0, 56], sizes = [2, 8, 8], strides = [1, 1, 1]} : vector<2x8x96xf32> to vector<2x8x8xf32>
    %460 = vector.extract_strided_slice %388 {offsets = [0, 0, 88], sizes = [2, 8, 8], strides = [1, 1, 1]} : vector<2x8x96xf32> to vector<2x8x8xf32>
    "tpu.trace_start"() <{level = 10 : i32, message = "bld,bsd->bls"}> : () -> ()
    %cst_184 = arith.constant dense<0.000000e+00> : vector<2x8x8xf32>
    %461 = tpu.matmul %458, %459, %cst_184 {dimension_numbers = #tpu.dot_dimension_numbers<[2], [2], [1], [1], [0, 0, 0, 1, 1, 1], [0], [0]>} : vector<2x8x8xf32>, vector<2x8x8xf32>, vector<2x8x8xf32> -> vector<2x8x8xf32>
    "tpu.trace_stop"() : () -> ()
    %cst_185 = arith.constant 0.353553385 : f32
    %462 = vector.broadcast %cst_185 : f32 to vector<2x8x8xf32>
    %463 = arith.mulf %461, %462 : vector<2x8x8xf32>
    %464 = arith.addf %463, %7 : vector<2x8x8xf32>
    %cst_186 = arith.constant dense<0xFF800000> : vector<2x8xf32>
    %465 = vector.multi_reduction <maximumf>, %464, %cst_186 [2] : vector<2x8x8xf32> to vector<2x8xf32>
    %466 = vector.shape_cast %465 : vector<2x8xf32> to vector<2x8x1xf32>
    %467 = vector.broadcast %466 : vector<2x8x1xf32> to vector<2x8x8xf32>
    %468 = arith.subf %464, %467 : vector<2x8x8xf32>
    %469 = math.exp %468 : vector<2x8x8xf32>
    %cst_187 = arith.constant dense<0.000000e+00> : vector<2x8xf32>
    %470 = vector.multi_reduction <add>, %469, %cst_187 [2] : vector<2x8x8xf32> to vector<2x8xf32>
    %471 = vector.shape_cast %470 : vector<2x8xf32> to vector<2x8x1xf32>
    %472 = tpu.reciprocal %471 {approx = true} : vector<2x8x1xf32> -> vector<2x8x1xf32>
    %473 = vector.broadcast %472 : vector<2x8x1xf32> to vector<2x8x8xf32>
    %474 = arith.mulf %469, %473 : vector<2x8x8xf32>
    "tpu.trace_start"() <{level = 10 : i32, message = "bls,bsd->bld"}> : () -> ()
    %cst_188 = arith.constant dense<0.000000e+00> : vector<2x8x8xf32>
    %475 = tpu.matmul %474, %460, %cst_188 {dimension_numbers = #tpu.dot_dimension_numbers<[2], [1], [1], [2], [0, 0, 0, 1, 1, 2], [0], [0]>} : vector<2x8x8xf32>, vector<2x8x8xf32>, vector<2x8x8xf32> -> vector<2x8x8xf32>
    "tpu.trace_stop"() : () -> ()
    %476 = vector.shape_cast %475 : vector<2x8x8xf32> to vector<16x8xf32>
    %477 = vector.extract_strided_slice %390 {offsets = [24, 0], sizes = [8, 32], strides = [1, 1]} : vector<32x32xf32> to vector<8x32xf32>
    %cst_189 = arith.constant dense<0.000000e+00> : vector<16x32xf32>
    %478 = tpu.matmul %476, %477, %cst_189 {dimension_numbers = #tpu.dot_dimension_numbers<[1], [0], [0], [1], [0, 0, 1, 1], [], []>} : vector<16x8xf32>, vector<8x32xf32>, vector<16x32xf32> -> vector<16x32xf32>
    %479 = arith.addf %457, %478 : vector<16x32xf32>
    %480 = arith.addf %352, %479 : vector<16x32xf32>
    %c1_190 = arith.constant 1 : index
    %c0_191 = arith.constant 0 : index
    %c0_192 = arith.constant 0 : index
    %481 = vector.load %arg10[%c1_190, %c0_191, %c0_192] : memref<2x1x32xf32, #tpu.memory_space<vmem>>, vector<1x1x32xf32>
    %482 = vector.shape_cast %481 : vector<1x1x32xf32> to vector<1x32xf32>
    %483 = vector.broadcast %482 : vector<1x32xf32> to vector<16x32xf32>
    %484 = arith.addf %480, %483 : vector<16x32xf32>
    %485 = vector.extract_strided_slice %354 {offsets = [1, 0], sizes = [1, 32], strides = [1, 1]} : vector<3x32xf32> to vector<1x32xf32>
    %486 = vector.extract_strided_slice %356 {offsets = [1, 0], sizes = [1, 32], strides = [1, 1]} : vector<3x32xf32> to vector<1x32xf32>
    %cst_193 = arith.constant dense<0.000000e+00> : vector<16xf32>
    %487 = vector.multi_reduction <add>, %484, %cst_193 [1] : vector<16x32xf32> to vector<16xf32>
    %488 = vector.shape_cast %487 : vector<16xf32> to vector<16x1xf32>
    %cst_194 = arith.constant 3.200000e+01 : f32
    %489 = vector.broadcast %cst_194 : f32 to vector<16x1xf32>
    %490 = arith.divf %488, %489 : vector<16x1xf32>
    %491 = vector.broadcast %490 : vector<16x1xf32> to vector<16x32xf32>
    %492 = arith.subf %484, %491 : vector<16x32xf32>
    %493 = arith.mulf %492, %492 : vector<16x32xf32>
    %cst_195 = arith.constant dense<0.000000e+00> : vector<16xf32>
    %494 = vector.multi_reduction <add>, %493, %cst_195 [1] : vector<16x32xf32> to vector<16xf32>
    %495 = vector.shape_cast %494 : vector<16xf32> to vector<16x1xf32>
    %cst_196 = arith.constant 3.200000e+01 : f32
    %496 = vector.broadcast %cst_196 : f32 to vector<16x1xf32>
    %497 = arith.divf %495, %496 : vector<16x1xf32>
    %498 = vector.broadcast %490 : vector<16x1xf32> to vector<16x32xf32>
    %499 = arith.subf %484, %498 : vector<16x32xf32>
    %cst_197 = arith.constant 9.99999974E-6 : f32
    %500 = vector.broadcast %cst_197 : f32 to vector<16x1xf32>
    %501 = arith.addf %497, %500 : vector<16x1xf32>
    %502 = math.rsqrt %501 : vector<16x1xf32>
    %503 = vector.broadcast %502 : vector<16x1xf32> to vector<16x32xf32>
    %504 = arith.mulf %499, %503 : vector<16x32xf32>
    %505 = vector.broadcast %485 : vector<1x32xf32> to vector<16x32xf32>
    %506 = arith.mulf %504, %505 : vector<16x32xf32>
    %507 = vector.broadcast %486 : vector<1x32xf32> to vector<16x32xf32>
    %508 = arith.addf %506, %507 : vector<16x32xf32>
    %c1_198 = arith.constant 1 : index
    %c0_199 = arith.constant 0 : index
    %c0_200 = arith.constant 0 : index
    %509 = vector.load %arg11[%c1_198, %c0_199, %c0_200] : memref<2x32x32xf32, #tpu.memory_space<vmem>>, vector<1x32x32xf32>
    %510 = vector.shape_cast %509 : vector<1x32x32xf32> to vector<32x32xf32>
    %cst_201 = arith.constant dense<0.000000e+00> : vector<16x32xf32>
    %511 = tpu.matmul %508, %510, %cst_201 {dimension_numbers = #tpu.dot_dimension_numbers<[1], [0], [0], [1], [0, 0, 1, 1], [], []>} : vector<16x32xf32>, vector<32x32xf32>, vector<16x32xf32> -> vector<16x32xf32>
    %c1_202 = arith.constant 1 : index
    %c0_203 = arith.constant 0 : index
    %c0_204 = arith.constant 0 : index
    %512 = vector.load %arg12[%c1_202, %c0_203, %c0_204] : memref<2x1x32xf32, #tpu.memory_space<vmem>>, vector<1x1x32xf32>
    %513 = vector.shape_cast %512 : vector<1x1x32xf32> to vector<1x32xf32>
    %514 = vector.broadcast %513 : vector<1x32xf32> to vector<16x32xf32>
    %515 = arith.addf %511, %514 : vector<16x32xf32>
    %516 = vector.shape_cast %515 : vector<16x32xf32> to vector<2x8x32xf32>
    %c1_205 = arith.constant 1 : index
    %c0_206 = arith.constant 0 : index
    %c0_207 = arith.constant 0 : index
    %517 = vector.load %arg13[%c1_205, %c0_206, %c0_207] : memref<2x32x64xf32, #tpu.memory_space<vmem>>, vector<1x32x64xf32>
    %518 = vector.shape_cast %517 : vector<1x32x64xf32> to vector<32x64xf32>
    %cst_208 = arith.constant dense<0.000000e+00> : vector<32x64xf32>
    %519 = tpu.matmul %6, %518, %cst_208 {dimension_numbers = #tpu.dot_dimension_numbers<[1], [0], [0], [1], [0, 0, 1, 1], [], []>} : vector<32x32xf32>, vector<32x64xf32>, vector<32x64xf32> -> vector<32x64xf32>
    %c1_209 = arith.constant 1 : index
    %c0_210 = arith.constant 0 : index
    %c0_211 = arith.constant 0 : index
    %520 = vector.load %arg14[%c1_209, %c0_210, %c0_211] : memref<2x1x64xf32, #tpu.memory_space<vmem>>, vector<1x1x64xf32>
    %521 = vector.shape_cast %520 : vector<1x1x64xf32> to vector<1x64xf32>
    %522 = vector.broadcast %521 : vector<1x64xf32> to vector<32x64xf32>
    %523 = arith.addf %519, %522 : vector<32x64xf32>
    %524 = vector.shape_cast %523 : vector<32x64xf32> to vector<2x16x64xf32>
    %c1_212 = arith.constant 1 : index
    %c0_213 = arith.constant 0 : index
    %c0_214 = arith.constant 0 : index
    %525 = vector.load %arg15[%c1_212, %c0_213, %c0_214] : memref<2x32x32xf32, #tpu.memory_space<vmem>>, vector<1x32x32xf32>
    %526 = vector.shape_cast %525 : vector<1x32x32xf32> to vector<32x32xf32>
    %cst_215 = arith.constant 0.000000e+00 : f32
    %527 = vector.broadcast %cst_215 : f32 to vector<16x32xf32>
    %528 = vector.extract_strided_slice %516 {offsets = [0, 0, 0], sizes = [2, 8, 8], strides = [1, 1, 1]} : vector<2x8x32xf32> to vector<2x8x8xf32>
    %529 = vector.extract_strided_slice %524 {offsets = [0, 0, 0], sizes = [2, 16, 8], strides = [1, 1, 1]} : vector<2x16x64xf32> to vector<2x16x8xf32>
    %530 = vector.extract_strided_slice %524 {offsets = [0, 0, 32], sizes = [2, 16, 8], strides = [1, 1, 1]} : vector<2x16x64xf32> to vector<2x16x8xf32>
    "tpu.trace_start"() <{level = 10 : i32, message = "bld,bsd->bls"}> : () -> ()
    %cst_216 = arith.constant dense<0.000000e+00> : vector<2x8x16xf32>
    %531 = tpu.matmul %528, %529, %cst_216 {dimension_numbers = #tpu.dot_dimension_numbers<[2], [2], [1], [1], [0, 0, 0, 1, 1, 1], [0], [0]>} : vector<2x8x8xf32>, vector<2x16x8xf32>, vector<2x8x16xf32> -> vector<2x8x16xf32>
    "tpu.trace_stop"() : () -> ()
    %cst_217 = arith.constant 0.353553385 : f32
    %532 = vector.broadcast %cst_217 : f32 to vector<2x8x16xf32>
    %533 = arith.mulf %531, %532 : vector<2x8x16xf32>
    %cst_218 = arith.constant dense<0xFF800000> : vector<2x8xf32>
    %534 = vector.multi_reduction <maximumf>, %533, %cst_218 [2] : vector<2x8x16xf32> to vector<2x8xf32>
    %535 = vector.shape_cast %534 : vector<2x8xf32> to vector<2x8x1xf32>
    %536 = vector.broadcast %535 : vector<2x8x1xf32> to vector<2x8x16xf32>
    %537 = arith.subf %533, %536 : vector<2x8x16xf32>
    %538 = math.exp %537 : vector<2x8x16xf32>
    %cst_219 = arith.constant dense<0.000000e+00> : vector<2x8xf32>
    %539 = vector.multi_reduction <add>, %538, %cst_219 [2] : vector<2x8x16xf32> to vector<2x8xf32>
    %540 = vector.shape_cast %539 : vector<2x8xf32> to vector<2x8x1xf32>
    %541 = tpu.reciprocal %540 {approx = true} : vector<2x8x1xf32> -> vector<2x8x1xf32>
    %542 = vector.broadcast %541 : vector<2x8x1xf32> to vector<2x8x16xf32>
    %543 = arith.mulf %538, %542 : vector<2x8x16xf32>
    "tpu.trace_start"() <{level = 10 : i32, message = "bls,bsd->bld"}> : () -> ()
    %cst_220 = arith.constant dense<0.000000e+00> : vector<2x8x8xf32>
    %544 = tpu.matmul %543, %530, %cst_220 {dimension_numbers = #tpu.dot_dimension_numbers<[2], [1], [1], [2], [0, 0, 0, 1, 1, 2], [0], [0]>} : vector<2x8x16xf32>, vector<2x16x8xf32>, vector<2x8x8xf32> -> vector<2x8x8xf32>
    "tpu.trace_stop"() : () -> ()
    %545 = vector.shape_cast %544 : vector<2x8x8xf32> to vector<16x8xf32>
    %546 = vector.extract_strided_slice %526 {offsets = [0, 0], sizes = [8, 32], strides = [1, 1]} : vector<32x32xf32> to vector<8x32xf32>
    %cst_221 = arith.constant dense<0.000000e+00> : vector<16x32xf32>
    %547 = tpu.matmul %545, %546, %cst_221 {dimension_numbers = #tpu.dot_dimension_numbers<[1], [0], [0], [1], [0, 0, 1, 1], [], []>} : vector<16x8xf32>, vector<8x32xf32>, vector<16x32xf32> -> vector<16x32xf32>
    %548 = arith.addf %527, %547 : vector<16x32xf32>
    %549 = vector.extract_strided_slice %516 {offsets = [0, 0, 8], sizes = [2, 8, 8], strides = [1, 1, 1]} : vector<2x8x32xf32> to vector<2x8x8xf32>
    %550 = vector.extract_strided_slice %524 {offsets = [0, 0, 8], sizes = [2, 16, 8], strides = [1, 1, 1]} : vector<2x16x64xf32> to vector<2x16x8xf32>
    %551 = vector.extract_strided_slice %524 {offsets = [0, 0, 40], sizes = [2, 16, 8], strides = [1, 1, 1]} : vector<2x16x64xf32> to vector<2x16x8xf32>
    "tpu.trace_start"() <{level = 10 : i32, message = "bld,bsd->bls"}> : () -> ()
    %cst_222 = arith.constant dense<0.000000e+00> : vector<2x8x16xf32>
    %552 = tpu.matmul %549, %550, %cst_222 {dimension_numbers = #tpu.dot_dimension_numbers<[2], [2], [1], [1], [0, 0, 0, 1, 1, 1], [0], [0]>} : vector<2x8x8xf32>, vector<2x16x8xf32>, vector<2x8x16xf32> -> vector<2x8x16xf32>
    "tpu.trace_stop"() : () -> ()
    %cst_223 = arith.constant 0.353553385 : f32
    %553 = vector.broadcast %cst_223 : f32 to vector<2x8x16xf32>
    %554 = arith.mulf %552, %553 : vector<2x8x16xf32>
    %cst_224 = arith.constant dense<0xFF800000> : vector<2x8xf32>
    %555 = vector.multi_reduction <maximumf>, %554, %cst_224 [2] : vector<2x8x16xf32> to vector<2x8xf32>
    %556 = vector.shape_cast %555 : vector<2x8xf32> to vector<2x8x1xf32>
    %557 = vector.broadcast %556 : vector<2x8x1xf32> to vector<2x8x16xf32>
    %558 = arith.subf %554, %557 : vector<2x8x16xf32>
    %559 = math.exp %558 : vector<2x8x16xf32>
    %cst_225 = arith.constant dense<0.000000e+00> : vector<2x8xf32>
    %560 = vector.multi_reduction <add>, %559, %cst_225 [2] : vector<2x8x16xf32> to vector<2x8xf32>
    %561 = vector.shape_cast %560 : vector<2x8xf32> to vector<2x8x1xf32>
    %562 = tpu.reciprocal %561 {approx = true} : vector<2x8x1xf32> -> vector<2x8x1xf32>
    %563 = vector.broadcast %562 : vector<2x8x1xf32> to vector<2x8x16xf32>
    %564 = arith.mulf %559, %563 : vector<2x8x16xf32>
    "tpu.trace_start"() <{level = 10 : i32, message = "bls,bsd->bld"}> : () -> ()
    %cst_226 = arith.constant dense<0.000000e+00> : vector<2x8x8xf32>
    %565 = tpu.matmul %564, %551, %cst_226 {dimension_numbers = #tpu.dot_dimension_numbers<[2], [1], [1], [2], [0, 0, 0, 1, 1, 2], [0], [0]>} : vector<2x8x16xf32>, vector<2x16x8xf32>, vector<2x8x8xf32> -> vector<2x8x8xf32>
    "tpu.trace_stop"() : () -> ()
    %566 = vector.shape_cast %565 : vector<2x8x8xf32> to vector<16x8xf32>
    %567 = vector.extract_strided_slice %526 {offsets = [8, 0], sizes = [8, 32], strides = [1, 1]} : vector<32x32xf32> to vector<8x32xf32>
    %cst_227 = arith.constant dense<0.000000e+00> : vector<16x32xf32>
    %568 = tpu.matmul %566, %567, %cst_227 {dimension_numbers = #tpu.dot_dimension_numbers<[1], [0], [0], [1], [0, 0, 1, 1], [], []>} : vector<16x8xf32>, vector<8x32xf32>, vector<16x32xf32> -> vector<16x32xf32>
    %569 = arith.addf %548, %568 : vector<16x32xf32>
    %570 = vector.extract_strided_slice %516 {offsets = [0, 0, 16], sizes = [2, 8, 8], strides = [1, 1, 1]} : vector<2x8x32xf32> to vector<2x8x8xf32>
    %571 = vector.extract_strided_slice %524 {offsets = [0, 0, 16], sizes = [2, 16, 8], strides = [1, 1, 1]} : vector<2x16x64xf32> to vector<2x16x8xf32>
    %572 = vector.extract_strided_slice %524 {offsets = [0, 0, 48], sizes = [2, 16, 8], strides = [1, 1, 1]} : vector<2x16x64xf32> to vector<2x16x8xf32>
    "tpu.trace_start"() <{level = 10 : i32, message = "bld,bsd->bls"}> : () -> ()
    %cst_228 = arith.constant dense<0.000000e+00> : vector<2x8x16xf32>
    %573 = tpu.matmul %570, %571, %cst_228 {dimension_numbers = #tpu.dot_dimension_numbers<[2], [2], [1], [1], [0, 0, 0, 1, 1, 1], [0], [0]>} : vector<2x8x8xf32>, vector<2x16x8xf32>, vector<2x8x16xf32> -> vector<2x8x16xf32>
    "tpu.trace_stop"() : () -> ()
    %cst_229 = arith.constant 0.353553385 : f32
    %574 = vector.broadcast %cst_229 : f32 to vector<2x8x16xf32>
    %575 = arith.mulf %573, %574 : vector<2x8x16xf32>
    %cst_230 = arith.constant dense<0xFF800000> : vector<2x8xf32>
    %576 = vector.multi_reduction <maximumf>, %575, %cst_230 [2] : vector<2x8x16xf32> to vector<2x8xf32>
    %577 = vector.shape_cast %576 : vector<2x8xf32> to vector<2x8x1xf32>
    %578 = vector.broadcast %577 : vector<2x8x1xf32> to vector<2x8x16xf32>
    %579 = arith.subf %575, %578 : vector<2x8x16xf32>
    %580 = math.exp %579 : vector<2x8x16xf32>
    %cst_231 = arith.constant dense<0.000000e+00> : vector<2x8xf32>
    %581 = vector.multi_reduction <add>, %580, %cst_231 [2] : vector<2x8x16xf32> to vector<2x8xf32>
    %582 = vector.shape_cast %581 : vector<2x8xf32> to vector<2x8x1xf32>
    %583 = tpu.reciprocal %582 {approx = true} : vector<2x8x1xf32> -> vector<2x8x1xf32>
    %584 = vector.broadcast %583 : vector<2x8x1xf32> to vector<2x8x16xf32>
    %585 = arith.mulf %580, %584 : vector<2x8x16xf32>
    "tpu.trace_start"() <{level = 10 : i32, message = "bls,bsd->bld"}> : () -> ()
    %cst_232 = arith.constant dense<0.000000e+00> : vector<2x8x8xf32>
    %586 = tpu.matmul %585, %572, %cst_232 {dimension_numbers = #tpu.dot_dimension_numbers<[2], [1], [1], [2], [0, 0, 0, 1, 1, 2], [0], [0]>} : vector<2x8x16xf32>, vector<2x16x8xf32>, vector<2x8x8xf32> -> vector<2x8x8xf32>
    "tpu.trace_stop"() : () -> ()
    %587 = vector.shape_cast %586 : vector<2x8x8xf32> to vector<16x8xf32>
    %588 = vector.extract_strided_slice %526 {offsets = [16, 0], sizes = [8, 32], strides = [1, 1]} : vector<32x32xf32> to vector<8x32xf32>
    %cst_233 = arith.constant dense<0.000000e+00> : vector<16x32xf32>
    %589 = tpu.matmul %587, %588, %cst_233 {dimension_numbers = #tpu.dot_dimension_numbers<[1], [0], [0], [1], [0, 0, 1, 1], [], []>} : vector<16x8xf32>, vector<8x32xf32>, vector<16x32xf32> -> vector<16x32xf32>
    %590 = arith.addf %569, %589 : vector<16x32xf32>
    %591 = vector.extract_strided_slice %516 {offsets = [0, 0, 24], sizes = [2, 8, 8], strides = [1, 1, 1]} : vector<2x8x32xf32> to vector<2x8x8xf32>
    %592 = vector.extract_strided_slice %524 {offsets = [0, 0, 24], sizes = [2, 16, 8], strides = [1, 1, 1]} : vector<2x16x64xf32> to vector<2x16x8xf32>
    %593 = vector.extract_strided_slice %524 {offsets = [0, 0, 56], sizes = [2, 16, 8], strides = [1, 1, 1]} : vector<2x16x64xf32> to vector<2x16x8xf32>
    "tpu.trace_start"() <{level = 10 : i32, message = "bld,bsd->bls"}> : () -> ()
    %cst_234 = arith.constant dense<0.000000e+00> : vector<2x8x16xf32>
    %594 = tpu.matmul %591, %592, %cst_234 {dimension_numbers = #tpu.dot_dimension_numbers<[2], [2], [1], [1], [0, 0, 0, 1, 1, 1], [0], [0]>} : vector<2x8x8xf32>, vector<2x16x8xf32>, vector<2x8x16xf32> -> vector<2x8x16xf32>
    "tpu.trace_stop"() : () -> ()
    %cst_235 = arith.constant 0.353553385 : f32
    %595 = vector.broadcast %cst_235 : f32 to vector<2x8x16xf32>
    %596 = arith.mulf %594, %595 : vector<2x8x16xf32>
    %cst_236 = arith.constant dense<0xFF800000> : vector<2x8xf32>
    %597 = vector.multi_reduction <maximumf>, %596, %cst_236 [2] : vector<2x8x16xf32> to vector<2x8xf32>
    %598 = vector.shape_cast %597 : vector<2x8xf32> to vector<2x8x1xf32>
    %599 = vector.broadcast %598 : vector<2x8x1xf32> to vector<2x8x16xf32>
    %600 = arith.subf %596, %599 : vector<2x8x16xf32>
    %601 = math.exp %600 : vector<2x8x16xf32>
    %cst_237 = arith.constant dense<0.000000e+00> : vector<2x8xf32>
    %602 = vector.multi_reduction <add>, %601, %cst_237 [2] : vector<2x8x16xf32> to vector<2x8xf32>
    %603 = vector.shape_cast %602 : vector<2x8xf32> to vector<2x8x1xf32>
    %604 = tpu.reciprocal %603 {approx = true} : vector<2x8x1xf32> -> vector<2x8x1xf32>
    %605 = vector.broadcast %604 : vector<2x8x1xf32> to vector<2x8x16xf32>
    %606 = arith.mulf %601, %605 : vector<2x8x16xf32>
    "tpu.trace_start"() <{level = 10 : i32, message = "bls,bsd->bld"}> : () -> ()
    %cst_238 = arith.constant dense<0.000000e+00> : vector<2x8x8xf32>
    %607 = tpu.matmul %606, %593, %cst_238 {dimension_numbers = #tpu.dot_dimension_numbers<[2], [1], [1], [2], [0, 0, 0, 1, 1, 2], [0], [0]>} : vector<2x8x16xf32>, vector<2x16x8xf32>, vector<2x8x8xf32> -> vector<2x8x8xf32>
    "tpu.trace_stop"() : () -> ()
    %608 = vector.shape_cast %607 : vector<2x8x8xf32> to vector<16x8xf32>
    %609 = vector.extract_strided_slice %526 {offsets = [24, 0], sizes = [8, 32], strides = [1, 1]} : vector<32x32xf32> to vector<8x32xf32>
    %cst_239 = arith.constant dense<0.000000e+00> : vector<16x32xf32>
    %610 = tpu.matmul %608, %609, %cst_239 {dimension_numbers = #tpu.dot_dimension_numbers<[1], [0], [0], [1], [0, 0, 1, 1], [], []>} : vector<16x8xf32>, vector<8x32xf32>, vector<16x32xf32> -> vector<16x32xf32>
    %611 = arith.addf %590, %610 : vector<16x32xf32>
    %612 = arith.addf %484, %611 : vector<16x32xf32>
    %c1_240 = arith.constant 1 : index
    %c0_241 = arith.constant 0 : index
    %c0_242 = arith.constant 0 : index
    %613 = vector.load %arg16[%c1_240, %c0_241, %c0_242] : memref<2x1x32xf32, #tpu.memory_space<vmem>>, vector<1x1x32xf32>
    %614 = vector.shape_cast %613 : vector<1x1x32xf32> to vector<1x32xf32>
    %615 = vector.broadcast %614 : vector<1x32xf32> to vector<16x32xf32>
    %616 = arith.addf %612, %615 : vector<16x32xf32>
    %617 = vector.extract_strided_slice %354 {offsets = [2, 0], sizes = [1, 32], strides = [1, 1]} : vector<3x32xf32> to vector<1x32xf32>
    %618 = vector.extract_strided_slice %356 {offsets = [2, 0], sizes = [1, 32], strides = [1, 1]} : vector<3x32xf32> to vector<1x32xf32>
    %cst_243 = arith.constant dense<0.000000e+00> : vector<16xf32>
    %619 = vector.multi_reduction <add>, %616, %cst_243 [1] : vector<16x32xf32> to vector<16xf32>
    %620 = vector.shape_cast %619 : vector<16xf32> to vector<16x1xf32>
    %cst_244 = arith.constant 3.200000e+01 : f32
    %621 = vector.broadcast %cst_244 : f32 to vector<16x1xf32>
    %622 = arith.divf %620, %621 : vector<16x1xf32>
    %623 = vector.broadcast %622 : vector<16x1xf32> to vector<16x32xf32>
    %624 = arith.subf %616, %623 : vector<16x32xf32>
    %625 = arith.mulf %624, %624 : vector<16x32xf32>
    %cst_245 = arith.constant dense<0.000000e+00> : vector<16xf32>
    %626 = vector.multi_reduction <add>, %625, %cst_245 [1] : vector<16x32xf32> to vector<16xf32>
    %627 = vector.shape_cast %626 : vector<16xf32> to vector<16x1xf32>
    %cst_246 = arith.constant 3.200000e+01 : f32
    %628 = vector.broadcast %cst_246 : f32 to vector<16x1xf32>
    %629 = arith.divf %627, %628 : vector<16x1xf32>
    %630 = vector.broadcast %622 : vector<16x1xf32> to vector<16x32xf32>
    %631 = arith.subf %616, %630 : vector<16x32xf32>
    %cst_247 = arith.constant 9.99999974E-6 : f32
    %632 = vector.broadcast %cst_247 : f32 to vector<16x1xf32>
    %633 = arith.addf %629, %632 : vector<16x1xf32>
    %634 = math.rsqrt %633 : vector<16x1xf32>
    %635 = vector.broadcast %634 : vector<16x1xf32> to vector<16x32xf32>
    %636 = arith.mulf %631, %635 : vector<16x32xf32>
    %637 = vector.broadcast %617 : vector<1x32xf32> to vector<16x32xf32>
    %638 = arith.mulf %636, %637 : vector<16x32xf32>
    %639 = vector.broadcast %618 : vector<1x32xf32> to vector<16x32xf32>
    %640 = arith.addf %638, %639 : vector<16x32xf32>
    %c1_248 = arith.constant 1 : index
    %c0_249 = arith.constant 0 : index
    %c0_250 = arith.constant 0 : index
    %641 = vector.load %arg17[%c1_248, %c0_249, %c0_250] : memref<2x32x128xf32, #tpu.memory_space<vmem>>, vector<1x32x128xf32>
    %642 = vector.shape_cast %641 : vector<1x32x128xf32> to vector<32x128xf32>
    %cst_251 = arith.constant dense<0.000000e+00> : vector<16x128xf32>
    %643 = tpu.matmul %640, %642, %cst_251 {dimension_numbers = #tpu.dot_dimension_numbers<[1], [0], [0], [1], [0, 0, 1, 1], [], []>} : vector<16x32xf32>, vector<32x128xf32>, vector<16x128xf32> -> vector<16x128xf32>
    %c1_252 = arith.constant 1 : index
    %c0_253 = arith.constant 0 : index
    %c0_254 = arith.constant 0 : index
    %644 = vector.load %arg18[%c1_252, %c0_253, %c0_254] : memref<2x1x128xf32, #tpu.memory_space<vmem>>, vector<1x1x128xf32>
    %645 = vector.shape_cast %644 : vector<1x1x128xf32> to vector<1x128xf32>
    %646 = vector.broadcast %645 : vector<1x128xf32> to vector<16x128xf32>
    %647 = arith.addf %643, %646 : vector<16x128xf32>
    %cst_255 = arith.constant 0.707106769 : f32
    %648 = vector.broadcast %cst_255 : f32 to vector<16x128xf32>
    %649 = arith.mulf %647, %648 : vector<16x128xf32>
    %650 = math.absf %649 : vector<16x128xf32>
    %cst_256 = arith.constant 0.327591091 : f32
    %651 = vector.broadcast %cst_256 : f32 to vector<16x128xf32>
    %652 = arith.mulf %651, %650 : vector<16x128xf32>
    %cst_257 = arith.constant 1.000000e+00 : f32
    %653 = vector.broadcast %cst_257 : f32 to vector<16x128xf32>
    %654 = arith.addf %653, %652 : vector<16x128xf32>
    %cst_258 = arith.constant 1.000000e+00 : f32
    %655 = vector.broadcast %cst_258 : f32 to vector<16x128xf32>
    %656 = arith.divf %655, %654 : vector<16x128xf32>
    %cst_259 = arith.constant 1.06140542 : f32
    %657 = vector.broadcast %cst_259 : f32 to vector<16x128xf32>
    %658 = arith.mulf %656, %657 : vector<16x128xf32>
    %cst_260 = arith.constant -1.45315206 : f32
    %659 = vector.broadcast %cst_260 : f32 to vector<16x128xf32>
    %660 = arith.addf %659, %658 : vector<16x128xf32>
    %661 = arith.mulf %656, %660 : vector<16x128xf32>
    %cst_261 = arith.constant 1.42141378 : f32
    %662 = vector.broadcast %cst_261 : f32 to vector<16x128xf32>
    %663 = arith.addf %662, %661 : vector<16x128xf32>
    %664 = arith.mulf %656, %663 : vector<16x128xf32>
    %cst_262 = arith.constant -0.284496725 : f32
    %665 = vector.broadcast %cst_262 : f32 to vector<16x128xf32>
    %666 = arith.addf %665, %664 : vector<16x128xf32>
    %667 = arith.mulf %656, %666 : vector<16x128xf32>
    %cst_263 = arith.constant 0.254829586 : f32
    %668 = vector.broadcast %cst_263 : f32 to vector<16x128xf32>
    %669 = arith.addf %668, %667 : vector<16x128xf32>
    %670 = arith.mulf %656, %669 : vector<16x128xf32>
    %cst_264 = arith.constant 0.000000e+00 : f32
    %671 = vector.broadcast %cst_264 : f32 to vector<16x128xf32>
    %672 = arith.subf %671, %650 : vector<16x128xf32>
    %673 = arith.mulf %672, %650 : vector<16x128xf32>
    %674 = math.exp %673 : vector<16x128xf32>
    %675 = arith.mulf %670, %674 : vector<16x128xf32>
    %cst_265 = arith.constant 1.000000e+00 : f32
    %676 = vector.broadcast %cst_265 : f32 to vector<16x128xf32>
    %677 = arith.subf %676, %675 : vector<16x128xf32>
    %cst_266 = arith.constant 0.000000e+00 : f32
    %678 = vector.broadcast %cst_266 : f32 to vector<16x128xf32>
    %679 = arith.cmpf oge, %649, %678 : vector<16x128xf32>
    %cst_267 = arith.constant 0.000000e+00 : f32
    %680 = vector.broadcast %cst_267 : f32 to vector<16x128xf32>
    %681 = arith.subf %680, %677 : vector<16x128xf32>
    %682 = arith.select %679, %677, %681 : vector<16x128xi1>, vector<16x128xf32>
    %cst_268 = arith.constant 5.000000e-01 : f32
    %683 = vector.broadcast %cst_268 : f32 to vector<16x128xf32>
    %684 = arith.mulf %683, %647 : vector<16x128xf32>
    %cst_269 = arith.constant 1.000000e+00 : f32
    %685 = vector.broadcast %cst_269 : f32 to vector<16x128xf32>
    %686 = arith.addf %685, %682 : vector<16x128xf32>
    %687 = arith.mulf %684, %686 : vector<16x128xf32>
    %c1_270 = arith.constant 1 : index
    %c0_271 = arith.constant 0 : index
    %c0_272 = arith.constant 0 : index
    %688 = vector.load %arg19[%c1_270, %c0_271, %c0_272] : memref<2x128x32xf32, #tpu.memory_space<vmem>>, vector<1x128x32xf32>
    %689 = vector.shape_cast %688 : vector<1x128x32xf32> to vector<128x32xf32>
    %cst_273 = arith.constant dense<0.000000e+00> : vector<16x32xf32>
    %690 = tpu.matmul %687, %689, %cst_273 {dimension_numbers = #tpu.dot_dimension_numbers<[1], [0], [0], [1], [0, 0, 1, 1], [], []>} : vector<16x128xf32>, vector<128x32xf32>, vector<16x32xf32> -> vector<16x32xf32>
    %691 = arith.addf %616, %690 : vector<16x32xf32>
    %c1_274 = arith.constant 1 : index
    %c0_275 = arith.constant 0 : index
    %c0_276 = arith.constant 0 : index
    %692 = vector.load %arg20[%c1_274, %c0_275, %c0_276] : memref<2x1x32xf32, #tpu.memory_space<vmem>>, vector<1x1x32xf32>
    %693 = vector.shape_cast %692 : vector<1x1x32xf32> to vector<1x32xf32>
    %694 = vector.broadcast %693 : vector<1x32xf32> to vector<16x32xf32>
    %695 = arith.addf %691, %694 : vector<16x32xf32>
    %c0_277 = arith.constant 0 : index
    %c0_278 = arith.constant 0 : index
    %696 = vector.load %arg21[%c0_277, %c0_278] : memref<1x32xf32, #tpu.memory_space<vmem>>, vector<1x32xf32>
    %c0_279 = arith.constant 0 : index
    %c0_280 = arith.constant 0 : index
    %697 = vector.load %arg22[%c0_279, %c0_280] : memref<1x32xf32, #tpu.memory_space<vmem>>, vector<1x32xf32>
    %cst_281 = arith.constant dense<0.000000e+00> : vector<16xf32>
    %698 = vector.multi_reduction <add>, %695, %cst_281 [1] : vector<16x32xf32> to vector<16xf32>
    %699 = vector.shape_cast %698 : vector<16xf32> to vector<16x1xf32>
    %cst_282 = arith.constant 3.200000e+01 : f32
    %700 = vector.broadcast %cst_282 : f32 to vector<16x1xf32>
    %701 = arith.divf %699, %700 : vector<16x1xf32>
    %702 = vector.broadcast %701 : vector<16x1xf32> to vector<16x32xf32>
    %703 = arith.subf %695, %702 : vector<16x32xf32>
    %704 = arith.mulf %703, %703 : vector<16x32xf32>
    %cst_283 = arith.constant dense<0.000000e+00> : vector<16xf32>
    %705 = vector.multi_reduction <add>, %704, %cst_283 [1] : vector<16x32xf32> to vector<16xf32>
    %706 = vector.shape_cast %705 : vector<16xf32> to vector<16x1xf32>
    %cst_284 = arith.constant 3.200000e+01 : f32
    %707 = vector.broadcast %cst_284 : f32 to vector<16x1xf32>
    %708 = arith.divf %706, %707 : vector<16x1xf32>
    %709 = vector.broadcast %701 : vector<16x1xf32> to vector<16x32xf32>
    %710 = arith.subf %695, %709 : vector<16x32xf32>
    %cst_285 = arith.constant 9.99999974E-6 : f32
    %711 = vector.broadcast %cst_285 : f32 to vector<16x1xf32>
    %712 = arith.addf %708, %711 : vector<16x1xf32>
    %713 = math.rsqrt %712 : vector<16x1xf32>
    %714 = vector.broadcast %713 : vector<16x1xf32> to vector<16x32xf32>
    %715 = arith.mulf %710, %714 : vector<16x32xf32>
    %716 = vector.broadcast %696 : vector<1x32xf32> to vector<16x32xf32>
    %717 = arith.mulf %715, %716 : vector<16x32xf32>
    %718 = vector.broadcast %697 : vector<1x32xf32> to vector<16x32xf32>
    %719 = arith.addf %717, %718 : vector<16x32xf32>
    %c0_286 = arith.constant 0 : index
    %c0_287 = arith.constant 0 : index
    %720 = vector.load %arg23[%c0_286, %c0_287] : memref<32x128xf32, #tpu.memory_space<vmem>>, vector<32x128xf32>
    %cst_288 = arith.constant dense<0.000000e+00> : vector<16x128xf32>
    %721 = tpu.matmul %719, %720, %cst_288 {dimension_numbers = #tpu.dot_dimension_numbers<[1], [0], [0], [1], [0, 0, 1, 1], [], []>} : vector<16x32xf32>, vector<32x128xf32>, vector<16x128xf32> -> vector<16x128xf32>
    %c0_289 = arith.constant 0 : index
    %c0_290 = arith.constant 0 : index
    %722 = vector.load %arg24[%c0_289, %c0_290] : memref<1x128xf32, #tpu.memory_space<vmem>>, vector<1x128xf32>
    %723 = vector.broadcast %722 : vector<1x128xf32> to vector<16x128xf32>
    %724 = arith.addf %721, %723 : vector<16x128xf32>
    %725 = vector.shape_cast %724 : vector<16x128xf32> to vector<2x8x128xf32>
    %c0_291 = arith.constant 0 : index
    %c0_292 = arith.constant 0 : index
    %c0_293 = arith.constant 0 : index
    %726 = vector.load %arg25[%c0_291, %c0_292, %c0_293] : memref<2x8x128xf32, #tpu.memory_space<vmem>>, vector<2x8x128xf32>
    tpu.vector_store %arg25[%c0_291, %c0_292, %c0_293], %725 {strides = array<i32>} : memref<2x8x128xf32, #tpu.memory_space<vmem>>, vector<2x8x128xf32>,
    return
  }
}

</mosaic_0001>

<bundles_post_ra>
// kernel: _model_core.1
= control target key start
LH: loop header
LB: loop body
LE: loop exit
PB: predicated region body
PF: predicated region fallthrough
CT: control target
= control target key end

     0   :  { %s11687_s0 = inlined_call_operand.vmem [shape: f32[2,8,32], index: 0, kind: input, shape index: {}]   ;;  %s11688_s1 = inlined_call_operand.vmem [shape: f32[2,16,48], index: 1, kind: input, shape index: {}]   ;;  %s11689_s2 = inlined_call_operand.vmem [shape: f32[2,8,8], index: 2, kind: input, shape index: {}]   ;;  %s11690_s3 = inlined_call_operand.vmem [shape: f32[48,32], index: 3, kind: input, shape index: {}]   ;;  %s11691_s4 = inlined_call_operand.vmem [shape: f32[1,32], index: 4, kind: input, shape index: {}]   ;;  %s11692_s5 = inlined_call_operand.vmem [shape: f32[2,3,32], index: 5, kind: input, shape index: {}]   ;;  %s11693_s6 = inlined_call_operand.vmem [shape: f32[2,3,32], index: 6, kind: input, shape index: {}]   ;;  %s11694_s7 = inlined_call_operand.vmem [shape: f32[2,32,96], index: 7, kind: input, shape index: {}]   ;;  %s11695_s8 = inlined_call_operand.vmem [shape: f32[2,1,96], index: 8, kind: input, shape index: {}]   ;;  %s11696_s9 = inlined_call_operand.vmem [shape: f32[2,32,32], index: 9, kind: input, shape index: {}]   ;;  %s11697_s10 = inlined_call_operand.vmem [shape: f32[2,1,32], index: 10, kind: input, shape index: {}]   ;;  %s11698_s11 = inlined_call_operand.vmem [shape: f32[2,32,32], index: 11, kind: input, shape index: {}]   ;;  %s11699_s12 = inlined_call_operand.vmem [shape: f32[2,1,32], index: 12, kind: input, shape index: {}]   ;;  %s11700_s13 = inlined_call_operand.vmem [shape: f32[2,32,64], index: 13, kind: input, shape index: {}]   ;;  %s11701_s14 = inlined_call_operand.vmem [shape: f32[2,1,64], index: 14, kind: input, shape index: {}]   ;;  %s11702_s15 = inlined_call_operand.vmem [shape: f32[2,32,32], index: 15, kind: input, shape index: {}]   ;;  %s11703_s16 = inlined_call_operand.vmem [shape: f32[2,1,32], index: 16, kind: input, shape index: {}]   ;;  %s11704_s17 = inlined_call_operand.vmem [shape: f32[2,32,128], index: 17, kind: input, shape index: {}]   ;;  %s11705_s18 = inlined_call_operand.vmem [shape: f32[2,1,128], index: 18, kind: input, shape index: {}]   ;;  %s11706_s19 = inlined_call_operand.vmem [shape: f32[2,128,32], index: 19, kind: input, shape index: {}]   ;;  %s11707_s20 = inlined_call_operand.vmem [shape: f32[2,1,32], index: 20, kind: input, shape index: {}]   ;;  %s11708_s21 = inlined_call_operand.vmem [shape: f32[1,32], index: 21, kind: input, shape index: {}]   ;;  %s11709_s22 = inlined_call_operand.vmem [shape: f32[1,32], index: 22, kind: input, shape index: {}]   ;;  %s11710_s23 = inlined_call_operand.vmem [shape: f32[32,128], index: 23, kind: input, shape index: {}]   ;;  %s11711_s24 = inlined_call_operand.vmem [shape: f32[1,128], index: 24, kind: input, shape index: {}]   ;;  %s11712_s25 = inlined_call_operand.hbm [shape: f32[2,8,128], index: 25, kind: output, shape index: {}]  }
   0x1   :  { %11747 = sst [smem:[#allocation5_spill]] %s11687_s0 }
   0x2   :  { %11748 = sst [smem:[#allocation6_spill]] %s11688_s1 }
   0x3   :  { %11749 = sst [smem:[#allocation7_spill]] %s11689_s2 }
   0x4   :  { %11750 = sst [smem:[#allocation8_spill]] %s11690_s3 }
   0x5   :  { %11751 = sst [smem:[#allocation9_spill]] %s11691_s4 }
   0x6   :  { %11752 = sst [smem:[#allocation10_spill]] %s11692_s5 }
   0x7   :  { %11753 = sst [smem:[#allocation11_spill]] %s11693_s6 }
   0x8   :  { %11754 = sst [smem:[#allocation12_spill]] %s11694_s7 }
   0x9   :  { %11755 = sst [smem:[#allocation13_spill]] %s11695_s8 }
   0xa   :  { %11756 = sst [smem:[#allocation14_spill]] %s11696_s9 }
   0xb   :  { %11757 = sst [smem:[#allocation15_spill]] %s11703_s16 }
   0xc   :  { %11758 = sst [smem:[#allocation16_spill]] %s11708_s21 }
   0xd   :  { %11759 = sst [smem:[#allocation17_spill]] %s11709_s22 }
   0xe   :  { %11760 = sst [smem:[#allocation18_spill]] %s11710_s23 }
   0xf   :  { %11761 = sst [smem:[#allocation19_spill]] %s11711_s24 }
  0x10   :  { %11762 = sst [smem:[#allocation20_spill]] %s11712_s25 }
  0x11   :  { %s11763_s6 = sld [smem:[#allocation5_spill]]  ;;  %vm202_vm0 = vcmask 261120  }
  0x17   :  { %v10469_v0 = vld [vmem:[%s11763_s6] sm:$0xff]  ;;  %v10474_v1 = vld [vmem:[%s11763_s6 + $0x8] sm:$0xff] }
  0x18   :  { %30 = vsyncpa [#allocation3], 0  ;;  %v203_v2 = vsel %vm202_vm0, %v10469_v0, 0.0  ;;  %v206_v3 = vsel %vm202_vm0, %v10474_v1, 0.0  ;;  %s11764_s1 = sld [smem:[#allocation8_spill]]  ;;  %s11765_s3 = sld [smem:[#allocation6_spill]]  ;;  %v230_v35 = vlaneseq }
  0x19   :  { %204 = vadd.xlane.f32.xlu0 %v203_v2  ;;  %vm98_vm1 = vcmask 392192   ;;  %s11766_s27 = sld [smem:[#allocation12_spill]]  ;;  %s11767_s4 = sld [smem:[#allocation10_spill]]  ;;  %v10319_v58 = vmov 0.0   ;;  %vm10320_vm2 = vmmov 0   ;;  %vm341_vm3 = vcmask 64512  }
  0x1a   :  { %v10526_v39 = vshrl.u32 %v230_v35, 7  ;;  %s11768_s5 = sld [smem:[#allocation11_spill]]  ;;  %9058 = vmatprep.subr.mxu0 %v10319_v58  ;;  %9060 = vmatprep.mubr.msk.f32.mxu0 %vm10320_vm2, %v10319_v58  ;;  %s11769_s29 = sld [smem:[#allocation13_spill]]  ;;  %vm10798_vm4 = vmpackc.low %vm341_vm3, %vm341_vm3  ;;  %vm2414_vm5 = vcmask 130048  }
  0x1b   :  { %s11742_s2 = smov 96   ;;  %s11738_s6 = smov 88  }
  0x1c   :  { %v10529_v41 = vsub.s32 0, %v10526_v39  ;;  %s11740_s30 = smov 120   ;;  %s11770_s8 = sld [smem:[#allocation7_spill]] }
  0x1d   :  { %207 = vadd.xlane.f32.xlu0 %v206_v3  ;;  %s11724_s9 = smov 64   ;;  %s11722_s0 = smov 56  }
  0x1e   :  { %v85_v14 = vld [vmem:[%s11764_s1] sm:$0xff]  ;;  %v86_v15 = vld [vmem:[%s11764_s1 + $0x8] sm:$0xff]  ;;  %v87_v17 = vld [vmem:[%s11764_s1 + $0x10] sm:$0xff]  ;;  %s11730_s7 = smov 112   ;;  %s11734_s26 = smov 48  }
  0x1f   :  { %v9676_v16 = vpack.c.bf16 %v86_v15, %v85_v14  ;;  %v88_v18 = vld [vmem:[%s11764_s1 + $0x18] sm:$0xff]  ;;  %v89_v20 = vld [vmem:[%s11764_s1 + $0x20] sm:$0xff]  ;;  %v90_v21 = vld [vmem:[%s11764_s1 + $0x28] sm:$0xff]  ;;  %s11728_s1 = smov 80   ;;  %s11736_s28 = smov 104  }
  0x20   :  { %v9680_v19 = vpack.c.bf16 %v88_v18, %v87_v17  ;;  %v9684_v22 = vpack.c.bf16 %v90_v21, %v89_v20  ;;  %v81_v23 = vld [vmem:[%s11765_s3] sm:$0xff]  ;;  %v243_v25 = vld [vmem:[%s11766_s27 + $0x8] sm:$0xff]  ;;  %v83_v28 = vld [vmem:[%s11765_s3 + $0x10] sm:$0xff]  ;;  %s11782_s21 = smov 64   ;;  %s11784_s22 = smov 48  }
  0x21   :  { %9677 = vmatprep.subr.bf16.mxu1 %v9676_v16  ;;  %v242_v24 = vld [vmem:[%s11766_s27] sm:$0xff]  ;;  %9031 = vmatprep.mubr.msk.f32.mxu1 %vm98_vm1, %v81_v23  ;;  %v82_v26 = vld [vmem:[%s11765_s3 + $0x8] sm:$0xff]  ;;  %v244_v29 = vld [vmem:[%s11766_s27 + $0x10] sm:$0xff] }
  0x22   :  { %9679 = vmatpush3.bf16.msra.mxu1 %v9676_v16  ;;  %v9688_v27 = vpack.c.bf16 %v243_v25, %v242_v24  ;;  %v245_v30 = vld [vmem:[%s11766_s27 + $0x18] sm:$0xff]  ;;  %v10534_v42 = vld [vmem:[%s11767_s4] sm:$0x7] }
  0x23   :  { %9681 = vmatprep.subr.bf16.mxu1 %v9680_v19  ;;  %v84_v31 = vld [vmem:[%s11765_s3 + $0x18] sm:$0xff]  ;;  %v9692_v32 = vpack.c.bf16 %v245_v30, %v244_v29  ;;  %v10539_v43 = vld [vmem:[%s11768_s5] sm:$0x7]  ;;  %v233_v44 = vrot.slane %v10534_v42, %v10529_v41  ;;  %s11726_s3 = smov 72  }
  0x24   :  { %v239_v47 = vrot.slane %v10539_v43, %v10529_v41  ;;  %v8475_v59 = vld [vmem:[%s11769_s29] ss:$0 sm:$0xff] }
  0x26   :  { %9683 = vmatpush3.bf16.msra.mxu1 %v9680_v19 }
  0x27   :  { %9685 = vmatprep.subr.bf16.mxu1 %v9684_v22 }
  0x2a   :  { %9687 = vmatpush3.bf16.msra.mxu1 %v9684_v22 }
  0x2b   :  { %9689 = vmatprep.subr.bf16.mxu1 %v9688_v27 }
  0x2d   :  { %9032 = vmatmul.mubr.msk.f32.vlgmr.msra.gmra.mrb[0].mxu1 %vm98_vm1, %v82_v26 }
  0x2e   :  { %9691 = vmatpush3.bf16.msra.mxu1 %v9688_v27  ;;  %9034 = vmatprep.mubr.msk.f32.mxu1 %vm98_vm1, %v83_v28 }
  0x2f   :  { %9693 = vmatprep.subr.bf16.mxu1 %v9692_v32 }
  0x31   :  { %9035 = vmatmul.mubr.msk.f32.gmra.mrb[2].mxu1 %vm98_vm1, %v84_v31 }
  0x32   :  { %9695 = vmatpush3.bf16.msra.mxu1 %v9692_v32 }
  0x33   :  { %9048 = vmatprep.subr.mxu1 %v10319_v58 }
  0xa6   :  { %v205_v4 = vpop.xlane.xlu0 %204 }
  0xa7   :  { %v210_v5 = vmul.f32 0.03125, %v205_v4 }
  0xa9   :  { %v212_v6 = vsub.f32 %v10469_v0, %v210_v5 }
  0xaa   :  { %v208_v7 = vpop.xlane.xlu0 %207 }
  0xab   :  { %v211_v8 = vmul.f32 0.03125, %v208_v7  ;;  %v214_v9 = vmul.f32 %v212_v6, %v212_v6  ;;  %v10596_v7 = vld [vmem:[%s11770_s8] sm:$0xff] }
  0xad   :  { %v213_v10 = vsub.f32 %v10474_v1, %v211_v8  ;;  %v216_v11 = vsel %vm202_vm0, %v214_v9, 0.0 }
  0xae   :  { %217 = vadd.xlane.f32.xlu1 %v216_v11 }
  0xaf   :  { %v215_v12 = vmul.f32 %v213_v10, %v213_v10 }
  0xb1   :  { %v219_v13 = vsel %vm202_vm0, %v215_v12, 0.0  ;;  %v10602_v12 = vld [vmem:[%s11770_s8 + $0x8] sm:$0xff] }
  0xb2   :  { %220 = vadd.xlane.f32.xlu1 %v219_v13 }
 0x100   :  { %v10547_v54 = vpop.f32.mrb[0].mxu1 }
 0x101   :  { %v10549_v55 = vpop.f32.mrb[1].mxu1 }
 0x104   :  { %v10551_v56 = vpop.f32.mrb[2].mxu1 }
 0x105   :  { %v10553_v57 = vpop.f32.mrb[3].mxu1 }
 0x13b   :  { %v218_v33 = vpop.xlane.xlu1 %217 }
 0x13c   :  { %v222_v34 = vmul.f32 0.03125, %v218_v33 }
 0x13e   :  { %v224_v36 = vadd.f32 1e-05, %v222_v34 }
 0x13f   :  { %v221_v37 = vpop.xlane.xlu1 %220 }
 0x140   :  { %10117 = vrsqrt.f32 %v224_v36  ;;  %v223_v38 = vmul.f32 0.03125, %v221_v37 }
 0x142   :  { %v225_v40 = vadd.f32 1e-05, %v223_v38 }
 0x144   :  { %10119 = vrsqrt.f32 %v225_v40 }
 0x14a   :  { %v10118_v45 = vpop.eup %10117 }
 0x14b   :  { %v228_v46 = vmul.f32 %v10118_v45, %v212_v6 }
 0x14d   :  { %v234_v48 = vmul.f32 %v233_v44, %v228_v46 }
 0x14e   :  { %v10120_v49 = vpop.eup %10119 }
 0x14f   :  { %v229_v50 = vmul.f32 %v10120_v49, %v213_v10  ;;  %v240_v51 = vadd.f32 %v239_v47, %v234_v48 }
 0x151   :  { %v235_v52 = vmul.f32 %v233_v44, %v229_v50  ;;  %9045 = vmatprep.mubr.msk.f32.mxu1 %vm202_vm0, %v240_v51 }
 0x153   :  { %v241_v53 = vadd.f32 %v239_v47, %v235_v52 }
 0x155   :  { %9046 = vmatmul.mubr.msk.f32.vlgmr.msra.gmra.mrb[4].mxu1 %vm202_vm0, %v241_v53 }
 0x156   :  { %9050 = vmatprep.mubr.msk.f32.mxu1 %vm10320_vm2, %v10319_v58 }
 0x228   :  { %v9047_v60 = vpop.f32.mrb[4].mxu1 }
 0x229   :  { %v10564_v61 = vadd.f32 %v9047_v60, %v8475_v59  ;;  %v325_v62 = vpop.f32.mrb[5].mxu1 }
 0x22a   :  { %v10566_v63 = vadd.f32 %v8475_v59, %v325_v62 }
 0x22b   :  { %417 = vrot.lane.b32.xlu1 %v10564_v61, %s11742_s2 }
 0x22c   :  { %339 = vrot.lane.b32.xlu0 %v10566_v63, %s11742_s2  ;;  %s11772_s2 = sld [smem:[#allocation9_spill]] }
 0x22f   :  { %751 = vrot.lane.b32.xlu1 %v10564_v61, %s11738_s6 }
 0x233   :  { %749 = vrot.lane.b32.xlu1 %v10564_v61, %s11740_s30 }
 0x29d   :  { %v418_v2 = vpop.permute.xlu1 %417 }
 0x29e   :  { %v340_v3 = vpop.permute.xlu0 %339 }
 0x29f   :  { %9049 = vmatpush3.xpose.msk.msra.mxu1 %vm341_vm3, %v340_v3 }
 0x2a0   :  { %9053 = vmatprep.subr.mxu1 %v10319_v58 }
 0x2a1   :  { %v752_v4 = vpop.permute.xlu1 %751 }
 0x2a2   :  { %9051 = vmatmul.mubr.msk.f32.vlgmr.msra.gmra.mrb[6].mxu1 %vm341_vm3, %v10566_v63 }
 0x2a3   :  { %9054 = vmatpush3.xpose.msk.msra.mxu1 %vm341_vm3, %v418_v2  ;;  %9055 = vmatprep.mubr.msk.f32.mxu1 %vm10320_vm2, %v10319_v58 }
 0x2a4   :  { %9073 = vmatprep.subr.mxu1 %v10319_v58 }
 0x2a5   :  { %v750_v5 = vpop.permute.xlu1 %749 }
 0x2a6   :  { %9056 = vmatmul.mubr.msk.f32.vlgmr.msra.gmra.mrb[8].mxu1 %vm341_vm3, %v10564_v61 }
 0x2a7   :  { %9074 = vmatpush3.xpose.msk.msra.mxu1 %vm341_vm3, %v752_v4  ;;  %9075 = vmatprep.mubr.msk.f32.mxu1 %vm10320_vm2, %v10319_v58 }
 0x2a8   :  { %9083 = vmatprep.subr.mxu1 %v10319_v58 }
 0x2aa   :  { %9076 = vmatmul.mubr.msk.f32.vlgmr.msra.gmra.mrb[10].mxu1 %vm341_vm3, %v750_v5 }
 0x2ab   :  { %9085 = vmatprep.mubr.msk.f32.mxu1 %vm10320_vm2, %v10319_v58 }
 0x375   :  { %v412_v6 = vpop.f32.mrb[6].mxu1 }
 0x376   :  { %v493_v8 = vmul.f32 0.35355338, %v412_v6  ;;  %v9052_v9 = vpop.f32.mrb[7].mxu1 }
 0x378   :  { %v495_v10 = vadd.f32 %v493_v8, %v10596_v7 }
 0x379   :  { %v489_v11 = vpop.f32.mrb[8].mxu1 }
 0x37a   :  { %v494_v13 = vmul.f32 0.35355338, %v489_v11  ;;  %v9057_v14 = vpop.f32.mrb[9].mxu1  ;;  %v497_v15 = vsel %vm341_vm3, %v495_v10, -inf }
 0x37b   :  { %498 = vmax.xlane.f32.xlu0 %v497_v15 }
 0x37c   :  { %v496_v16 = vadd.f32 %v494_v13, %v10602_v12 }
 0x37d   :  { %v823_v17 = vpop.f32.mrb[10].mxu1 }
 0x37e   :  { %v9077_v18 = vpop.f32.mrb[11].mxu1  ;;  %v500_v19 = vsel %vm341_vm3, %v496_v16, -inf  ;;  %v828_v30 = vmul.f32 0.35355338, %v823_v17 }
 0x37f   :  { %501 = vmax.xlane.f32.xlu1 %v500_v19 }
 0x380   :  { %v830_v31 = vadd.f32 %v828_v30, %v10602_v12 }
 0x382   :  { %v834_v32 = vsel %vm341_vm3, %v830_v31, -inf }
 0x390   :  { %595 = vrot.lane.b32.xlu1 %v10564_v61, %s11724_s9 }
 0x394   :  { %673 = vrot.lane.b32.xlu1 %v10566_v63, %s11738_s6  ;;  %s11785_s6 = smov 40  }
 0x398   :  { %671 = vrot.lane.b32.xlu1 %v10566_v63, %s11740_s30  ;;  %s11789_s30 = sld [smem:[#allocation17_spill]] }
 0x39c   :  { %1169 = vrot.lane.b32.xlu1 %v10566_v63, %s11728_s1 }
 0x408   :  { %v499_v20 = vpop.xlane.xlu0 %498 }
 0x409   :  { %v503_v21 = vsub.f32 %v495_v10, %v499_v20 }
 0x40b   :  { %v505_v22 = vmul.f32 1.442695, %v503_v21 }
 0x40c   :  { %v502_v23 = vpop.xlane.xlu1 %501 }
 0x40d   :  { %10121 = vpow2.f32 %v505_v22  ;;  %v504_v24 = vsub.f32 %v496_v16, %v502_v23 }
 0x40f   :  { %v507_v25 = vmul.f32 1.442695, %v504_v24 }
 0x410   :  { %v596_v37 = vpop.permute.xlu1 %595 }
 0x411   :  { %10123 = vpow2.f32 %v507_v25 }
 0x414   :  { %v674_v45 = vpop.permute.xlu1 %673 }
 0x417   :  { %v10122_v26 = vpop.eup %10121 }
 0x418   :  { %v509_v27 = vsel %vm341_vm3, %v10122_v26, 0.0  ;;  %v672_v46 = vpop.permute.xlu1 %671 }
 0x419   :  { %510 = vadd.xlane.f32.xlu0 %v509_v27 }
 0x41b   :  { %v10124_v28 = vpop.eup %10123 }
 0x41c   :  { %v512_v29 = vsel %vm341_vm3, %v10124_v28, 0.0  ;;  %v1170_v53 = vpop.permute.xlu1 %1169 }
 0x41d   :  { %513 = vadd.xlane.f32.xlu0 %v512_v29 }
 0x433   :  { %519 = vrot.lane.b32.xlu0 %v10566_v63, %s11724_s9  ;;  %s11776_s9 = smov 120  }
 0x452   :  { %835 = vmax.xlane.f32.xlu0 %v834_v32 }
 0x468   :  { %929 = vrot.lane.b32.xlu0 %v10564_v61, %s11722_s0 }
 0x46c   :  { %1167 = vrot.lane.b32.xlu0 %v10566_v63, %s11730_s7 }
 0x470   :  { %1245 = vrot.lane.b32.xlu0 %v10564_v61, %s11730_s7  ;;  %s11775_s7 = smov 96  }
 0x4a6   :  { %v511_v33 = vpop.xlane.xlu0 %510 }
 0x4a7   :  { %10125 = vrcp.f32 %v511_v33 }
 0x4aa   :  { %v514_v34 = vpop.xlane.xlu0 %513 }
 0x4ab   :  { %10127 = vrcp.f32 %v514_v34 }
 0x4ae   :  { %v520_v35 = vpop.permute.xlu0 %519 }
 0x4af   :  { %9059 = vmatpush3.msra.mxu0 %v520_v35 }
 0x4b0   :  { %9063 = vmatprep.subr.mxu0 %v10319_v58 }
 0x4b1   :  { %v10126_v36 = vpop.eup %10125 }
 0x4b2   :  { %v517_v38 = vmul.f32 %v10126_v36, %v10122_v26 }
 0x4b4   :  { %9061 = vmatmul.mubr.msk.f32.vlgmr.msra.gmra.mrb[0].mxu0 %vm341_vm3, %v517_v38 }
 0x4b5   :  { %v10128_v40 = vpop.eup %10127  ;;  %9064 = vmatpush3.msra.mxu0 %v596_v37  ;;  %9065 = vmatprep.mubr.msk.f32.mxu0 %vm10320_vm2, %v10319_v58 }
 0x4b6   :  { %v518_v44 = vmul.f32 %v10128_v40, %v10124_v28  ;;  %9068 = vmatprep.subr.mxu0 %v10319_v58 }
 0x4b8   :  { %9066 = vmatmul.mubr.msk.f32.vlgmr.msra.gmra.mrb[2].mxu0 %vm341_vm3, %v518_v44 }
 0x4b9   :  { %9070 = vmatprep.mubr.msk.f32.mxu0 %vm10320_vm2, %v10319_v58 }
 0x4bc   :  { %9069 = vmatpush3.xpose.msk.msra.mxu0 %vm341_vm3, %v674_v45 }
 0x4bd   :  { %9078 = vmatprep.subr.mxu0 %v10319_v58 }
 0x4bf   :  { %9071 = vmatmul.mubr.msk.f32.vlgmr.msra.gmra.mrb[4].mxu0 %vm341_vm3, %v672_v46 }
 0x4c0   :  { %9080 = vmatprep.mubr.msk.f32.mxu0 %vm10320_vm2, %v10319_v58 }
 0x4df   :  { %v836_v47 = vpop.xlane.xlu0 %835 }
 0x4e0   :  { %v838_v48 = vsub.f32 %v830_v31, %v836_v47 }
 0x4e2   :  { %v841_v49 = vmul.f32 1.442695, %v838_v48 }
 0x4e3   :  { %v930_v50 = vpop.permute.xlu0 %929 }
 0x4e4   :  { %10129 = vpow2.f32 %v841_v49  ;;  %9084 = vmatpush3.msra.mxu1 %v930_v50 }
 0x4e5   :  { %9098 = vmatprep.subr.mxu1 %v10319_v58 }
 0x4e7   :  { %v1168_v5 = vpop.permute.xlu0 %1167 }
 0x4eb   :  { %v1246_v9 = vpop.permute.xlu0 %1245 }
 0x4ee   :  { %v10130_v51 = vpop.eup %10129 }
 0x4ef   :  { %v846_v52 = vsel %vm341_vm3, %v10130_v51, 0.0 }
 0x4f0   :  { %847 = vadd.xlane.f32.xlu1 %v846_v52 }
 0x501   :  { %1247 = vrot.lane.b32.xlu1 %v10564_v61, %s11728_s1  ;;  %s11778_s1 = smov 112  }
 0x57d   :  { %v848_v59 = vpop.xlane.xlu1 %847 }
 0x57e   :  { %10131 = vrcp.f32 %v848_v59 }
 0x581   :  { %v1248_v8 = vpop.permute.xlu1 %1247 }
 0x587   :  { %v10644_v60 = vpop.f32.mrb[0].mxu0 }
 0x588   :  { %v10132_v62 = vpop.eup %10131  ;;  %v9062_v2 = vpop.f32.mrb[1].mxu0 }
 0x589   :  { %v852_v3 = vmul.f32 %v10132_v62, %v10130_v51 }
 0x58b   :  { %v10646_v4 = vpop.f32.mrb[2].mxu0  ;;  %9086 = vmatmul.mubr.msk.f32.vlgmr.msra.gmra.mrb[12].mxu1 %vm341_vm3, %v852_v3 }
 0x58c   :  { %9099 = vmatpush3.xpose.msk.msra.mxu1 %vm341_vm3, %v1170_v53  ;;  %v9067_v6 = vpop.f32.mrb[3].mxu0  ;;  %9100 = vmatprep.mubr.msk.f32.mxu1 %vm10320_vm2, %v10319_v58 }
 0x58d   :  { %9103 = vmatprep.subr.mxu1 %v10319_v58 }
 0x58f   :  { %9101 = vmatmul.mubr.msk.f32.vlgmr.msra.gmra.mrb[14].mxu1 %vm341_vm3, %v1168_v5 }
 0x590   :  { %9104 = vmatpush3.xpose.msk.msra.mxu1 %vm341_vm3, %v1248_v8  ;;  %9105 = vmatprep.mubr.msk.f32.mxu1 %vm10320_vm2, %v10319_v58 }
 0x591   :  { %9113 = vmatprep.subr.mxu1 %v10319_v58 }
 0x592   :  { %v745_v10 = vpop.f32.mrb[4].mxu0 }
 0x593   :  { %v827_v11 = vmul.f32 0.35355338, %v745_v10  ;;  %v9072_v13 = vpop.f32.mrb[5].mxu0  ;;  %9106 = vmatmul.mubr.msk.f32.vlgmr.msra.gmra.mrb[16].mxu1 %vm341_vm3, %v1246_v9 }
 0x594   :  { %9115 = vmatprep.mubr.msk.f32.mxu1 %vm10320_vm2, %v10319_v58 }
 0x595   :  { %v829_v14 = vadd.f32 %v827_v11, %v10596_v7 }
 0x597   :  { %v831_v15 = vsel %vm341_vm3, %v829_v14, -inf }
 0x598   :  { %832 = vmax.xlane.f32.xlu1 %v831_v15 }
 0x625   :  { %v833_v16 = vpop.xlane.xlu1 %832 }
 0x626   :  { %v837_v17 = vsub.f32 %v829_v14, %v833_v16 }
 0x628   :  { %v839_v18 = vmul.f32 1.442695, %v837_v17 }
 0x62a   :  { %10133 = vpow2.f32 %v839_v18 }
 0x634   :  { %v10134_v19 = vpop.eup %10133 }
 0x635   :  { %v843_v20 = vsel %vm341_vm3, %v10134_v19, 0.0 }
 0x636   :  { %844 = vadd.xlane.f32.xlu0 %v843_v20 }
 0x64c   :  { %853 = vrot.lane.b32.xlu0 %v10566_v63, %s11722_s0  ;;  %s11732_s0 = smov 40  }
 0x650   :  { %1425 = vrot.lane.b32.xlu0 %v10564_v61, %s11734_s26 }
 0x654   :  { %1586 = vrot.lane.b32.xlu0 %v10566_v63, %s11726_s3 }
 0x658   :  { %1664 = vrot.lane.b32.xlu0 %v10564_v61, %s11726_s3  ;;  %s11771_s3 = sld [smem:[#allocation14_spill]] }
 0x65c   :  { %1584 = vrot.lane.b32.xlu0 %v10566_v63, %s11736_s28 }
 0x65e   :  { %v1001_v21 = vpop.f32.mrb[12].mxu1  ;;  %v335_v52 = vld [vmem:[%s11771_s3 + $0x8] sm:$0xff]  ;;  %v334_v53 = vld [vmem:[%s11771_s3] sm:$0xff]  ;;  %v336_v14 = vld [vmem:[%s11771_s3 + $0x10] sm:$0xff] }
 0x65f   :  { %v9087_v22 = vpop.f32.mrb[13].mxu1 }
 0x662   :  { %v1241_v23 = vpop.f32.mrb[14].mxu1 }
 0x663   :  { %v1323_v24 = vmul.f32 0.35355338, %v1241_v23  ;;  %v9102_v25 = vpop.f32.mrb[15].mxu1 }
 0x665   :  { %v1325_v26 = vadd.f32 %v1323_v24, %v10596_v7 }
 0x666   :  { %v1319_v27 = vpop.f32.mrb[16].mxu1 }
 0x667   :  { %v1324_v28 = vmul.f32 0.35355338, %v1319_v27  ;;  %v9107_v29 = vpop.f32.mrb[17].mxu1  ;;  %v1327_v30 = vsel %vm341_vm3, %v1325_v26, -inf }
 0x668   :  { %1328 = vmax.xlane.f32.xlu1 %v1327_v30 }
 0x669   :  { %v1326_v31 = vadd.f32 %v1324_v28, %v10602_v12 }
 0x66b   :  { %v1330_v32 = vsel %vm341_vm3, %v1326_v31, -inf }
 0x66c   :  { %1331 = vmax.xlane.f32.xlu1 %v1330_v32 }
 0x6c3   :  { %v845_v33 = vpop.xlane.xlu0 %844 }
 0x6c4   :  { %10135 = vrcp.f32 %v845_v33 }
 0x6c7   :  { %v854_v34 = vpop.permute.xlu0 %853 }
 0x6c8   :  { %9079 = vmatpush3.msra.mxu0 %v854_v34 }
 0x6c9   :  { %9088 = vmatprep.subr.mxu0 %v335_v52 }
 0x6cb   :  { %v1426_v35 = vpop.permute.xlu0 %1425 }
 0x6cc   :  { %9114 = vmatpush3.msra.mxu1 %v1426_v35 }
 0x6cd   :  { %9123 = vmatprep.subr.mxu1 %v10319_v58 }
 0x6ce   :  { %v10136_v36 = vpop.eup %10135 }
 0x6cf   :  { %v851_v37 = vmul.f32 %v10136_v36, %v10134_v19  ;;  %v1587_v2 = vpop.permute.xlu0 %1586 }
 0x6d1   :  { %9081 = vmatmul.mubr.msk.f32.vlgmr.msra.gmra.mrb[6].mxu0 %vm341_vm3, %v851_v37 }
 0x6d2   :  { %9089 = vmatpush3.msra.mxu0 %v335_v52 }
 0x6d3   :  { %9093 = vmatprep.subr.mxu0 %v334_v53  ;;  %v1665_v5 = vpop.permute.xlu0 %1664 }
 0x6d7   :  { %v1585_v10 = vpop.permute.xlu0 %1584 }
 0x6f5   :  { %v1329_v38 = vpop.xlane.xlu1 %1328 }
 0x6f6   :  { %v1333_v40 = vsub.f32 %v1325_v26, %v1329_v38 }
 0x6f8   :  { %v1335_v44 = vmul.f32 1.442695, %v1333_v40 }
 0x6f9   :  { %v1332_v45 = vpop.xlane.xlu1 %1331 }
 0x6fa   :  { %10137 = vpow2.f32 %v1335_v44  ;;  %v1334_v46 = vsub.f32 %v1326_v31, %v1332_v45 }
 0x6fc   :  { %v1337_v47 = vmul.f32 1.442695, %v1334_v46 }
 0x6fe   :  { %10139 = vpow2.f32 %v1337_v47 }
 0x704   :  { %v10138_v48 = vpop.eup %10137 }
 0x705   :  { %v1339_v49 = vsel %vm341_vm3, %v10138_v48, 0.0 }
 0x706   :  { %1340 = vadd.xlane.f32.xlu1 %v1339_v49  ;;  %v2143_v49 = vld [vmem:[%s11700_s13 + $0x8] sm:$0xff] }
 0x708   :  { %v10140_v50 = vpop.eup %10139 }
 0x709   :  { %v1342_v51 = vsel %vm341_vm3, %v10140_v50, 0.0 }
 0x70a   :  { %1343 = vadd.xlane.f32.xlu1 %v1342_v51 }
 0x71b   :  { %1349 = vrot.lane.b32.xlu1 %v10566_v63, %s11734_s26  ;;  %s11781_s26 = smov 72  }
 0x71f   :  { %1662 = vrot.lane.b32.xlu1 %v10564_v61, %s11736_s28  ;;  %s11779_s28 = smov 80  }
 0x793   :  { %v1341_v59 = vpop.xlane.xlu1 %1340 }
 0x797   :  { %v1344_v62 = vpop.xlane.xlu1 %1343 }
 0x798   :  { %10141 = vrcp.f32 %v1344_v62  ;;  %v8470_v62 = vld [vmem:[%s11772_s2] ss:$0 sm:$0xff]  ;;  %s11780_s2 = smov 104  }
 0x799   :  { %10143 = vrcp.f32 %v1341_v59  ;;  %v2145_v59 = vld [vmem:[%s11700_s13 + $0x18] sm:$0xff] }
 0x79b   :  { %v1350_v13 = vpop.permute.xlu1 %1349 }
 0x79f   :  { %v1663_v23 = vpop.permute.xlu1 %1662 }
 0x7a2   :  { %v10142_v3 = vpop.eup %10141 }
 0x7a3   :  { %v1348_v6 = vmul.f32 %v10142_v3, %v10140_v50  ;;  %v10144_v11 = vpop.eup %10143  ;;  %v10755_v3 = vadd.f32 %v8470_v62, %v10549_v55  ;;  %v10771_v55 = vadd.f32 %v10551_v56, %v8470_v62 }
 0x7a4   :  { %v925_v8 = vpop.f32.mrb[6].mxu0 }
 0x7a5   :  { %v9082_v9 = vpop.f32.mrb[7].mxu0  ;;  %9090 = vmatprep.mubr.msk.f32.mxu0 %vm341_vm3, %v925_v8  ;;  %9116 = vmatmul.mubr.msk.f32.vlgmr.msra.gmra.mrb[18].mxu1 %vm341_vm3, %v1348_v6  ;;  %v10761_v8 = vadd.f32 %v10547_v54, %v8470_v62  ;;  %v10332_v54 = vmov 0.0|0.0  }
 0x7a6   :  { %9091 = vmatmul.mubr.msk.f32.vlgmr.msra.gmra.mrb[8].mxu0 %vm341_vm3, %v1001_v21  ;;  %9124 = vmatpush3.xpose.msk.msra.mxu1 %vm341_vm3, %v1587_v2  ;;  %v10764_v9 = vadd.f32 %v8470_v62, %v10553_v57 }
 0x7a7   :  { %9094 = vmatpush3.msra.mxu0 %v334_v53  ;;  %9095 = vmatprep.mubr.msk.f32.mxu0 %vm341_vm3, %v10644_v60  ;;  %v1347_v60 = vmul.f32 %v10144_v11, %v10138_v48  ;;  %v337_v48 = vld [vmem:[%s11771_s3 + $0x18] sm:$0xff]  ;;  %v2144_v53 = vld [vmem:[%s11700_s13 + $0x10] sm:$0xff] }
 0x7a8   :  { %9125 = vmatprep.mubr.msk.f32.mxu1 %vm10320_vm2, %v10319_v58  ;;  %9108 = vmatprep.subr.mxu0 %v10319_v58  ;;  %v9708_v2 = vpack.c.bf16 %v2145_v59, %v2144_v53 }
 0x7a9   :  { %9126 = vmatmul.mubr.msk.f32.vlgmr.msra.gmra.mrb[20].mxu1 %vm341_vm3, %v1585_v10  ;;  %9133 = vmatprep.subr.mxu1 %v10319_v58  ;;  %v8510_v10 = vld [vmem:[%s11697_s10] ss:$0 sm:$0xff] }
 0x7aa   :  { %9135 = vmatprep.mubr.msk.f32.mxu1 %vm10320_vm2, %v10319_v58 }
 0x7ae   :  { %9096 = vmatmul.mubr.msk.f32.vlgmr.msra.gmra.mrb[8].mxu0 %vm341_vm3, %v10646_v4 }
 0x7af   :  { %9109 = vmatpush3.msra.mxu0 %v1350_v13  ;;  %9110 = vmatprep.mubr.msk.f32.mxu0 %vm10320_vm2, %v10319_v58 }
 0x7b0   :  { %9118 = vmatprep.subr.mxu0 %v336_v14 }
 0x7b2   :  { %9111 = vmatmul.mubr.msk.f32.vlgmr.msra.gmra.mrb[10].mxu0 %vm341_vm3, %v1347_v60 }
 0x7b3   :  { %9119 = vmatpush3.msra.mxu0 %v336_v14 }
 0x7b4   :  { %9128 = vmatprep.subr.mxu0 %v10319_v58 }
 0x878   :  { %v1497_v15 = vpop.f32.mrb[18].mxu1 }
 0x879   :  { %v9117_v16 = vpop.f32.mrb[19].mxu1 }
 0x87c   :  { %v1658_v17 = vpop.f32.mrb[20].mxu1 }
 0x87d   :  { %v1740_v18 = vmul.f32 0.35355338, %v1658_v17  ;;  %v9127_v4 = vpop.f32.mrb[21].mxu1  ;;  %v8514_v17 = vld [vmem:[%s11701_s14] ss:$0 sm:$0xff] }
 0x87f   :  { %v1742_v19 = vadd.f32 %v1740_v18, %v10596_v7 }
 0x881   :  { %v1744_v20 = vsel %vm341_vm3, %v1742_v19, -inf }
 0x882   :  { %1745 = vmax.xlane.f32.xlu0 %v1744_v20 }
 0x885   :  { %v1421_v21 = vpop.f32.mrb[10].mxu0 }
 0x886   :  { %v9112_v22 = vpop.f32.mrb[11].mxu0  ;;  %9120 = vmatprep.mubr.msk.f32.mxu0 %vm341_vm3, %v1421_v21 }
 0x887   :  { %9121 = vmatmul.mubr.msk.f32.vlgmr.msra.gmra.mrb[8].mxu0 %vm341_vm3, %v1497_v15 }
 0x888   :  { %9129 = vmatpush3.xpose.msk.msra.mxu0 %vm341_vm3, %v1665_v5  ;;  %9130 = vmatprep.mubr.msk.f32.mxu0 %vm10320_vm2, %v10319_v58 }
 0x889   :  { %9138 = vmatprep.subr.mxu0 %v10319_v58 }
 0x88b   :  { %9131 = vmatmul.mubr.msk.f32.vlgmr.msra.gmra.mrb[12].mxu0 %vm341_vm3, %v1663_v23 }
 0x88c   :  { %9140 = vmatprep.mubr.msk.f32.mxu0 %vm10320_vm2, %v10319_v58 }
 0x90f   :  { %v1746_v7 = vpop.xlane.xlu0 %1745 }
 0x910   :  { %v1750_v24 = vsub.f32 %v1742_v19, %v1746_v7 }
 0x912   :  { %v1752_v25 = vmul.f32 1.442695, %v1750_v24 }
 0x914   :  { %10145 = vpow2.f32 %v1752_v25 }
 0x91e   :  { %v10146_v26 = vpop.eup %10145 }
 0x91f   :  { %v1756_v27 = vsel %vm341_vm3, %v10146_v26, 0.0 }
 0x920   :  { %1757 = vadd.xlane.f32.xlu0 %v1756_v27 }
 0x95e   :  { %v1736_v28 = vpop.f32.mrb[12].mxu0 }
 0x95f   :  { %v1741_v29 = vmul.f32 0.35355338, %v1736_v28  ;;  %v9132_v30 = vpop.f32.mrb[13].mxu0 }
 0x961   :  { %v1743_v31 = vadd.f32 %v1741_v29, %v10602_v12 }
 0x963   :  { %v1747_v32 = vsel %vm341_vm3, %v1743_v31, -inf }
 0x964   :  { %1748 = vmax.xlane.f32.xlu1 %v1747_v32 }
 0x975   :  { %1842 = vrot.lane.b32.xlu1 %v10564_v61, %s11732_s0 }
 0x9ad   :  { %v1758_v12 = vpop.xlane.xlu0 %1757 }
 0x9f1   :  { %v1749_v33 = vpop.xlane.xlu1 %1748 }
 0x9f2   :  { %v1751_v34 = vsub.f32 %v1743_v31, %v1749_v33 }
 0x9f4   :  { %v1754_v35 = vmul.f32 1.442695, %v1751_v34 }
 0x9f5   :  { %v1843_v36 = vpop.permute.xlu1 %1842 }
 0x9f6   :  { %10147 = vpow2.f32 %v1754_v35  ;;  %9139 = vmatpush3.msra.mxu0 %v1843_v36 }
 0x9f7   :  { %10149 = vrcp.f32 %v1758_v12  ;;  %9143 = vmatprep.subr.mxu0 %v337_v48 }
 0xa00   :  { %v10148_v37 = vpop.eup %10147 }
 0xa01   :  { %v1759_v38 = vsel %vm341_vm3, %v10148_v37, 0.0  ;;  %v10150_v44 = vpop.eup %10149 }
 0xa02   :  { %1760 = vadd.xlane.f32.xlu0 %v1759_v38  ;;  %v1764_v61 = vmul.f32 %v10150_v44, %v10146_v26  ;;  %v2051_v38 = vld [vmem:[%s11698_s11 + $0x8] sm:$0xff]  ;;  %v2053_v44 = vld [vmem:[%s11698_s11 + $0x18] sm:$0xff] }
 0xa18   :  { %1766 = vrot.lane.b32.xlu0 %v10566_v63, %s11732_s0  ;;  %v2142_v63 = vld [vmem:[%s11700_s13] sm:$0xff]  ;;  %s11777_s0 = smov 88  }
 0xa19   :  { %v9704_v50 = vpack.c.bf16 %v2143_v49, %v2142_v63 }
 0xa8f   :  { %v1761_v40 = vpop.xlane.xlu0 %1760 }
 0xa90   :  { %10151 = vrcp.f32 %v1761_v40  ;;  %v2052_v40 = vld [vmem:[%s11698_s11 + $0x10] sm:$0xff] }
 0xa93   :  { %v1767_v45 = vpop.permute.xlu0 %1766 }
 0xa94   :  { %9134 = vmatpush3.msra.mxu1 %v1767_v45  ;;  %v9700_v45 = vpack.c.bf16 %v2053_v44, %v2052_v40 }
 0xa95   :  { %9136 = vmatmul.mubr.msk.f32.vlgmr.msra.gmra.mrb[22].mxu1 %vm341_vm3, %v1764_v61 }
 0xa9a   :  { %v10152_v46 = vpop.eup %10151 }
 0xa9b   :  { %v1765_v47 = vmul.f32 %v10152_v46, %v10148_v37  ;;  %v2050_v37 = vld [vmem:[%s11698_s11] sm:$0xff] }
 0xa9c   :  { %v9696_v12 = vpack.c.bf16 %v2051_v38, %v2050_v37 }
 0xa9d   :  { %9141 = vmatmul.mubr.msk.f32.vlgmr.msra.gmra.mrb[14].mxu0 %vm341_vm3, %v1765_v47 }
 0xa9e   :  { %9144 = vmatpush3.msra.mxu0 %v337_v48  ;;  %9697 = vmatprep.subr.bf16.mxu1 %v9696_v12 }
 0xa9f   :  { %9705 = vmatprep.subr.bf16.mxu0 %v9704_v50  ;;  %9699 = vmatpush3.bf16.msra.mxu1 %v9696_v12 }
 0xaa0   :  { %9701 = vmatprep.subr.bf16.mxu1 %v9700_v45 }
 0xaa3   :  { %9703 = vmatpush3.bf16.msra.mxu1 %v9700_v45 }
 0xaa4   :  { %9712 = vmatprep.subr.bf16.mxu1 %v10332_v54 }
 0xb68   :  { %v1838_v51 = vpop.f32.mrb[22].mxu1 }
 0xb69   :  { %v9137_v52 = vpop.f32.mrb[23].mxu1  ;;  %9145 = vmatprep.mubr.msk.f32.mxu0 %vm341_vm3, %v1838_v51 }
 0xb70   :  { %v1914_v5 = vpop.f32.mrb[14].mxu0 }
 0xb71   :  { %v9142_v6 = vpop.f32.mrb[15].mxu0  ;;  %9146 = vmatmul.mubr.msk.f32.vlgmr.msra.gmra.mrb[8].mxu0 %vm341_vm3, %v1914_v5 }
 0xb72   :  { %9707 = vmatpush3.bf16.msra.mxu0 %v9704_v50  ;;  %9167 = vmatprep.mubr.msk.f32.mxu0 %vm202_vm0, %v10755_v3  ;;  %v10825_v50 = vsub.s32 1, %v10526_v39 }
 0xb73   :  { %9709 = vmatprep.subr.bf16.mxu0 %v9708_v2 }
 0xb74   :  { %v2041_v51 = vrot.slane %v10534_v42, %v10825_v50  ;;  %v8511_v42 = vld [vmem:[%s11699_s12] ss:$0 sm:$0xff] }
 0xb76   :  { %9711 = vmatpush3.bf16.msra.mxu0 %v9708_v2  ;;  %v2047_v2 = vrot.slane %v10539_v43, %v10825_v50 }
 0xb77   :  { %9716 = vmatprep.subr.bf16.mxu0 %v10332_v54 }
 0xb79   :  { %9168 = vmatmul.mubr.msk.f32.vlgmr.msra.gmra.mrb[16].mxu0 %vm202_vm0, %v10761_v8 }
 0xb7a   :  { %9170 = vmatprep.mubr.msk.f32.mxu0 %vm202_vm0, %v10764_v9 }
 0xb7d   :  { %9171 = vmatmul.mubr.msk.f32.gmra.mrb[18].mxu0 %vm202_vm0, %v10771_v55 }
 0xb7e   :  { %9184 = vmatprep.mubr.msk.f32.mxu0 %vm10320_vm2, %v10319_v58 }
 0xc44   :  { %v9147_v57 = vpop.f32.mrb[8].mxu0 }
 0xc45   :  { %v2002_v11 = vadd.f32 %v9147_v57, %v10474_v1  ;;  %v1990_v13 = vpop.f32.mrb[9].mxu0 }
 0xc46   :  { %v2001_v56 = vadd.f32 %v1990_v13, %v10469_v0 }
 0xc47   :  { %v10783_v60 = vadd.f32 %v8510_v10, %v2002_v11 }
 0xc48   :  { %v10785_v14 = vadd.f32 %v8510_v10, %v2001_v56 }
 0xc49   :  { %v2015_v15 = vsel %vm202_vm0, %v10783_v60, 0.0 }
 0xc4a   :  { %2016 = vadd.xlane.f32.xlu0 %v2015_v15  ;;  %v2012_v16 = vsel %vm202_vm0, %v10785_v14, 0.0 }
 0xc4b   :  { %2013 = vadd.xlane.f32.xlu1 %v2012_v16 }
 0xc4c   :  { %v9169_v1 = vpop.f32.mrb[16].mxu0 }
 0xc4d   :  { %v2237_v18 = vadd.f32 %v9169_v1, %v8514_v17  ;;  %v2231_v4 = vpop.f32.mrb[17].mxu0 }
 0xc4e   :  { %v2232_v0 = vadd.f32 %v8514_v17, %v2231_v4 }
 0xc50   :  { %v9172_v19 = vpop.f32.mrb[18].mxu0  ;;  %v9713_v20 = vpack.c.bf16 %v2237_v18, %v2232_v0  ;;  %v10794_v21 = vpack.i.bf16 %v2237_v18, %v2232_v0 }
 0xc51   :  { %v2247_v22 = vadd.f32 %v9172_v19, %v8514_v17  ;;  %v2241_v23 = vpop.f32.mrb[19].mxu0 }
 0xc52   :  { %v2242_v7 = vadd.f32 %v8514_v17, %v2241_v23 }
 0xc54   :  { %v9717_v25 = vpack.c.bf16 %v2247_v22, %v2242_v7  ;;  %v10802_v26 = vpack.i.bf16 %v2247_v22, %v2242_v7 }
 0xc56   :  { %9719 = vmatpush3.bf16.xpose.msk.msra.mxu0 %vm10798_vm4, %v9717_v25 }
 0xc57   :  { %9726 = vmatprep.subr.bf16.mxu0 %v10332_v54 }
 0xcd7   :  { %v2017_v27 = vpop.xlane.xlu0 %2016 }
 0xcd8   :  { %v2019_v28 = vmul.f32 0.03125, %v2017_v27  ;;  %v2014_v29 = vpop.xlane.xlu1 %2013 }
 0xcd9   :  { %v2018_v30 = vmul.f32 0.03125, %v2014_v29 }
 0xcda   :  { %v2021_v31 = vsub.f32 %v10783_v60, %v2019_v28 }
 0xcdb   :  { %v2020_v32 = vsub.f32 %v10785_v14, %v2018_v30 }
 0xcdc   :  { %v2023_v33 = vmul.f32 %v2021_v31, %v2021_v31 }
 0xcdd   :  { %v2022_v34 = vmul.f32 %v2020_v32, %v2020_v32 }
 0xcde   :  { %v2027_v35 = vsel %vm202_vm0, %v2023_v33, 0.0 }
 0xcdf   :  { %2028 = vadd.xlane.f32.xlu1 %v2027_v35  ;;  %v2024_v36 = vsel %vm202_vm0, %v2022_v34, 0.0 }
 0xce0   :  { %2025 = vadd.xlane.f32.xlu0 %v2024_v36 }
 0xd6c   :  { %v2029_v61 = vpop.xlane.xlu1 %2028 }
 0xd6d   :  { %v2031_v46 = vmul.f32 0.03125, %v2029_v61  ;;  %v2026_v47 = vpop.xlane.xlu0 %2025 }
 0xd6e   :  { %v2030_v48 = vmul.f32 0.03125, %v2026_v47 }
 0xd6f   :  { %v2033_v63 = vadd.f32 1e-05, %v2031_v46 }
 0xd70   :  { %v2032_v49 = vadd.f32 1e-05, %v2030_v48 }
 0xd71   :  { %10153 = vrsqrt.f32 %v2033_v63 }
 0xd72   :  { %10155 = vrsqrt.f32 %v2032_v49 }
 0xd7b   :  { %v10154_v52 = vpop.eup %10153 }
 0xd7c   :  { %v10156_v53 = vpop.eup %10155  ;;  %v2037_v59 = vmul.f32 %v10154_v52, %v2021_v31 }
 0xd7d   :  { %v2036_v62 = vmul.f32 %v10156_v53, %v2020_v32 }
 0xd7e   :  { %v2043_v5 = vmul.f32 %v2041_v51, %v2037_v59 }
 0xd7f   :  { %v2042_v6 = vmul.f32 %v2041_v51, %v2036_v62 }
 0xd80   :  { %v2049_v10 = vadd.f32 %v2047_v2, %v2043_v5 }
 0xd81   :  { %v2048_v57 = vadd.f32 %v2047_v2, %v2042_v6 }
 0xd83   :  { %9156 = vmatprep.mubr.msk.f32.mxu1 %vm202_vm0, %v2048_v57 }
 0xd84   :  { %9157 = vmatmul.mubr.msk.f32.vlgmr.msra.gmra.mrb[24].mxu1 %vm202_vm0, %v2049_v10 }
 0xd85   :  { %9715 = vmatpush3.bf16.xpose.msk.msra.mxu1 %vm10798_vm4, %v9713_v20  ;;  %9177 = vmatprep.mubr.msk.f32.mxu1 %vm10320_vm2, %v10319_v58 }
 0xd86   :  { %9720 = vmatprep.subr.bf16.mxu1 %v10332_v54 }
 0xe57   :  { %v9158_v43 = vpop.f32.mrb[24].mxu1 }
 0xe58   :  { %v10841_v11 = vadd.f32 %v9158_v43, %v8511_v42  ;;  %v2133_v13 = vpop.f32.mrb[25].mxu1 }
 0xe59   :  { %v10843_v56 = vadd.f32 %v8511_v42, %v2133_v13 }
 0xe5a   :  { %9185 = vmatmul.mubr.msk.f32.vlgmr.msra.gmra.mrb[20].mxu0 %vm341_vm3, %v10841_v11 }
 0xe5b   :  { %9178 = vmatmul.mubr.msk.f32.vlgmr.msra.gmra.mrb[26].mxu1 %vm341_vm3, %v10843_v56  ;;  %9205 = vmatprep.mubr.msk.f32.mxu0 %vm10320_vm2, %v10319_v58 }
 0xe5c   :  { %9191 = vmatprep.mubr.msk.f32.mxu1 %vm10320_vm2, %v10319_v58 }
 0xf2d   :  { %v2408_v15 = vpop.f32.mrb[20].mxu0 }
 0xf2e   :  { %v2413_v16 = vmul.f32 0.35355338, %v2408_v15  ;;  %v2329_v17 = vpop.f32.mrb[26].mxu1  ;;  %v9186_v1 = vpop.f32.mrb[21].mxu0 }
 0xf2f   :  { %v2412_v18 = vmul.f32 0.35355338, %v2329_v17  ;;  %v9179_v4 = vpop.f32.mrb[27].mxu1 }
 0xf30   :  { %v2418_v0 = vsel %vm2414_vm5, %v2413_v16, -inf }
 0xf31   :  { %2419 = vmax.xlane.f32.xlu1 %v2418_v0  ;;  %v2415_v19 = vsel %vm2414_vm5, %v2412_v18, -inf }
 0xf32   :  { %2416 = vmax.xlane.f32.xlu0 %v2415_v19 }
 0xfbe   :  { %v2420_v20 = vpop.xlane.xlu1 %2419 }
 0xfbf   :  { %v2422_v22 = vsub.f32 %v2413_v16, %v2420_v20  ;;  %v2417_v23 = vpop.xlane.xlu0 %2416 }
 0xfc0   :  { %v2421_v7 = vsub.f32 %v2412_v18, %v2417_v23 }
 0xfc1   :  { %v2425_v25 = vmul.f32 1.442695, %v2422_v22 }
 0xfc2   :  { %v2423_v27 = vmul.f32 1.442695, %v2421_v7 }
 0xfc3   :  { %10157 = vpow2.f32 %v2425_v25 }
 0xfc4   :  { %10159 = vpow2.f32 %v2423_v27 }
 0xfcd   :  { %v10158_v28 = vpop.eup %10157 }
 0xfce   :  { %v10160_v29 = vpop.eup %10159  ;;  %v2430_v30 = vsel %vm2414_vm5, %v10158_v28, 0.0 }
 0xfcf   :  { %2431 = vadd.xlane.f32.xlu1 %v2430_v30  ;;  %v2427_v31 = vsel %vm2414_vm5, %v10160_v29, 0.0 }
 0xfd0   :  { %2428 = vadd.xlane.f32.xlu0 %v2427_v31 }
 0xfe0   :  { %9983 = vrot.lane.b32.xlu1 %v10802_v26, %s11775_s7 }
 0xfe4   :  { %9988 = vrot.lane.b32.xlu1 %v10794_v21, %s11776_s9 }
 0xfe6   :  { %9978 = vrot.lane.b32.xlu0 %v10794_v21, %s11775_s7 }
 0xfe8   :  { %9993 = vrot.lane.b32.xlu1 %v10802_v26, %s11776_s9 }
 0xfea   :  { %2595 = vrot.lane.b32.xlu0 %v10843_v56, %s11776_s9 }
 0xfec   :  { %2677 = vrot.lane.b32.xlu1 %v10841_v11, %s11776_s9 }
0x105c   :  { %v2432_v32 = vpop.xlane.xlu1 %2431 }
0x105d   :  { %v2429_v33 = vpop.xlane.xlu0 %2428 }
0x105e   :  { %10161 = vrcp.f32 %v2429_v33 }
0x105f   :  { %10163 = vrcp.f32 %v2432_v32 }
0x1060   :  { %v9984_v34 = vpop.permute.xlu1 %9983 }
0x1061   :  { %v9979_v35 = vpop.permute.xlu0 %9978  ;;  %v9986_v45 = vunpack.i.h.bf16 %v9984_v34  ;;  %v9985_v61 = vunpack.i.l.bf16 %v9984_v34 }
0x1062   :  { %v9981_v36 = vunpack.i.h.bf16 %v9979_v35  ;;  %v9980_v37 = vunpack.i.l.bf16 %v9979_v35 }
0x1063   :  { %v9724_v49 = vpack.c.bf16 %v9986_v45, %v9985_v61  ;;  %v2251_v45 = vld [vmem:[%s11702_s15 + $0x8] sm:$0xff] }
0x1064   :  { %v9721_v38 = vpack.c.bf16 %v9981_v36, %v9980_v37  ;;  %v9989_v12 = vpop.permute.xlu1 %9988 }
0x1065   :  { %v9991_v40 = vunpack.i.h.bf16 %v9989_v12  ;;  %v9990_v44 = vunpack.i.l.bf16 %v9989_v12  ;;  %v2596_v53 = vpop.permute.xlu0 %2595 }
0x1066   :  { %9722 = vmatpush3.bf16.msra.mxu1 %v9721_v38 }
0x1067   :  { %v9727_v46 = vpack.c.bf16 %v9991_v40, %v9990_v44  ;;  %9723 = vmatprep.subr.bf16.mxu1 %v10332_v54 }
0x1068   :  { %v10162_v47 = vpop.eup %10161  ;;  %v9994_v51 = vpop.permute.xlu1 %9993 }
0x1069   :  { %9729 = vmatpush3.bf16.xpose.msk.msra.mxu0 %vm10798_vm4, %v9727_v46  ;;  %v2435_v48 = vmul.f32 %v10162_v47, %v10160_v29  ;;  %v10164_v63 = vpop.eup %10163  ;;  %v9996_v59 = vunpack.i.h.bf16 %v9994_v51  ;;  %v9995_v62 = vunpack.i.l.bf16 %v9994_v51 }
0x106a   :  { %9734 = vmatprep.subr.bf16.mxu0 %v10332_v54  ;;  %v2436_v52 = vmul.f32 %v10164_v63, %v10158_v28 }
0x106b   :  { %9192 = vmatmul.mubr.msk.f32.vlgmr.msra.gmra.mrb[28].mxu1 %vm2414_vm5, %v2435_v48  ;;  %v9731_v2 = vpack.c.bf16 %v9996_v59, %v9995_v62 }
0x106c   :  { %9725 = vmatpush3.bf16.msra.mxu1 %v9724_v49  ;;  %9198 = vmatprep.mubr.msk.f32.mxu1 %vm10320_vm2, %v10319_v58  ;;  %v2678_v5 = vpop.permute.xlu1 %2677 }
0x106d   :  { %9730 = vmatprep.subr.bf16.mxu1 %v10332_v54 }
0x106f   :  { %9199 = vmatmul.mubr.msk.f32.vlgmr.msra.gmra.mrb[30].mxu1 %vm2414_vm5, %v2436_v52  ;;  %v2250_v52 = vld [vmem:[%s11702_s15] sm:$0xff] }
0x1070   :  { %9206 = vmatmul.mubr.msk.f32.vlgmr.msra.gmra.mrb[22].mxu0 %vm341_vm3, %v2596_v53  ;;  %9212 = vmatprep.mubr.msk.f32.mxu1 %vm10320_vm2, %v10319_v58 }
0x1071   :  { %9219 = vmatprep.mubr.msk.f32.mxu0 %vm10320_vm2, %v10319_v58 }
0x1075   :  { %9733 = vmatpush3.bf16.xpose.msk.msra.mxu1 %vm10798_vm4, %v9731_v2 }
0x1076   :  { %9737 = vmatprep.subr.bf16.mxu1 %v10332_v54 }
0x107c   :  { %9213 = vmatmul.mubr.msk.f32.vlgmr.msra.gmra.mrb[32].mxu1 %vm341_vm3, %v2678_v5 }
0x107d   :  { %9226 = vmatprep.mubr.msk.f32.mxu1 %vm10320_vm2, %v10319_v58 }
0x113e   :  { %v10889_v6 = vpop.f32.mrb[28].mxu1 }
0x113f   :  { %v9193_v57 = vpop.f32.mrb[29].mxu1 }
0x1142   :  { %v10891_v10 = vpop.f32.mrb[30].mxu1 }
0x1143   :  { %v9200_v42 = vpop.f32.mrb[31].mxu1  ;;  %v2673_v43 = vpop.f32.mrb[22].mxu0 }
0x1144   :  { %v2759_v13 = vmul.f32 0.35355338, %v2673_v43  ;;  %v9207_v15 = vpop.f32.mrb[23].mxu0 }
0x1146   :  { %v2761_v16 = vsel %vm2414_vm5, %v2759_v13, -inf }
0x1147   :  { %2762 = vmax.xlane.f32.xlu0 %v2761_v16 }
0x114f   :  { %v2755_v17 = vpop.f32.mrb[32].mxu1 }
0x1150   :  { %v2760_v1 = vmul.f32 0.35355338, %v2755_v17  ;;  %v9214_v18 = vpop.f32.mrb[33].mxu1 }
0x1152   :  { %v2764_v4 = vsel %vm2414_vm5, %v2760_v1, -inf }
0x1153   :  { %2765 = vmax.xlane.f32.xlu1 %v2764_v4 }
0x1164   :  { %10003 = vrot.lane.b32.xlu1 %v10802_v26, %s11777_s0 }
0x1168   :  { %10008 = vrot.lane.b32.xlu1 %v10794_v21, %s11778_s1 }
0x116c   :  { %10013 = vrot.lane.b32.xlu1 %v10802_v26, %s11778_s1 }
0x1170   :  { %3185 = vrot.lane.b32.xlu1 %v10841_v11, %s11778_s1 }
0x11d4   :  { %v2763_v0 = vpop.xlane.xlu0 %2762 }
0x11d5   :  { %v2767_v19 = vsub.f32 %v2759_v13, %v2763_v0 }
0x11d7   :  { %v2769_v20 = vmul.f32 1.442695, %v2767_v19 }
0x11d9   :  { %10165 = vpow2.f32 %v2769_v20 }
0x11e0   :  { %v2766_v22 = vpop.xlane.xlu1 %2765 }
0x11e1   :  { %v2768_v23 = vsub.f32 %v2760_v1, %v2766_v22 }
0x11e3   :  { %v10166_v7 = vpop.eup %10165  ;;  %v2771_v25 = vmul.f32 1.442695, %v2768_v23 }
0x11e4   :  { %v10004_v27 = vpop.permute.xlu1 %10003  ;;  %v2773_v28 = vsel %vm2414_vm5, %v10166_v7, 0.0 }
0x11e5   :  { %10167 = vpow2.f32 %v2771_v25  ;;  %v10006_v29 = vunpack.i.h.bf16 %v10004_v27  ;;  %v10005_v30 = vunpack.i.l.bf16 %v10004_v27  ;;  %2774 = vadd.xlane.f32.xlu0 %v2773_v28 }
0x11e7   :  { %v9738_v31 = vpack.c.bf16 %v10006_v29, %v10005_v30  ;;  %v2252_v30 = vld [vmem:[%s11702_s15 + $0x10] sm:$0xff] }
0x11e8   :  { %v10009_v12 = vpop.permute.xlu1 %10008 }
0x11e9   :  { %9739 = vmatpush3.bf16.msra.mxu1 %v9738_v31  ;;  %v10011_v61 = vunpack.i.h.bf16 %v10009_v12  ;;  %v10010_v46 = vunpack.i.l.bf16 %v10009_v12 }
0x11ea   :  { %9740 = vmatprep.subr.bf16.mxu1 %v10332_v54 }
0x11eb   :  { %v9741_v49 = vpack.c.bf16 %v10011_v61, %v10010_v46 }
0x11ec   :  { %v10014_v2 = vpop.permute.xlu1 %10013 }
0x11ed   :  { %v10016_v57 = vunpack.i.h.bf16 %v10014_v2  ;;  %v10015_v42 = vunpack.i.l.bf16 %v10014_v2 }
0x11ef   :  { %v10168_v32 = vpop.eup %10167  ;;  %v9745_v43 = vpack.c.bf16 %v10016_v57, %v10015_v42 }
0x11f0   :  { %v2776_v33 = vsel %vm2414_vm5, %v10168_v32, 0.0 }
0x11f1   :  { %2777 = vadd.xlane.f32.xlu0 %v2776_v33 }
0x1207   :  { %9998 = vrot.lane.b32.xlu0 %v10794_v21, %s11777_s0 }
0x120b   :  { %3103 = vrot.lane.b32.xlu0 %v10843_v56, %s11778_s1 }
0x1272   :  { %v2775_v34 = vpop.xlane.xlu0 %2774 }
0x1273   :  { %10169 = vrcp.f32 %v2775_v34 }
0x127d   :  { %v10170_v40 = vpop.eup %10169 }
0x127e   :  { %v2778_v35 = vpop.xlane.xlu0 %2777  ;;  %v2781_v47 = vmul.f32 %v10170_v40, %v10166_v7 }
0x127f   :  { %10171 = vrcp.f32 %v2778_v35 }
0x1282   :  { %v9999_v36 = vpop.permute.xlu0 %9998 }
0x1283   :  { %v10001_v37 = vunpack.i.h.bf16 %v9999_v36  ;;  %v10000_v38 = vunpack.i.l.bf16 %v9999_v36 }
0x1285   :  { %v9735_v44 = vpack.c.bf16 %v10001_v37, %v10000_v38 }
0x1286   :  { %v3104_v51 = vpop.permute.xlu0 %3103 }
0x1287   :  { %9736 = vmatpush3.bf16.msra.mxu0 %v9735_v44 }
0x1288   :  { %9229 = vmatprep.subr.mxu0 %v2251_v45 }
0x1289   :  { %v10172_v48 = vpop.eup %10171 }
0x128a   :  { %9220 = vmatmul.mubr.msk.f32.vlgmr.msra.gmra.mrb[24].mxu0 %vm2414_vm5, %v2781_v47  ;;  %v2782_v63 = vmul.f32 %v10172_v48, %v10168_v32 }
0x128b   :  { %9230 = vmatpush3.msra.mxu0 %v2251_v45 }
0x128c   :  { %9227 = vmatmul.mubr.msk.f32.vlgmr.msra.gmra.mrb[34].mxu1 %vm2414_vm5, %v2782_v63  ;;  %9234 = vmatprep.subr.mxu0 %v2250_v52 }
0x128d   :  { %9743 = vmatpush3.bf16.xpose.msk.msra.mxu1 %vm10798_vm4, %v9741_v49  ;;  %9243 = vmatprep.mubr.msk.f32.mxu1 %vm10320_vm2, %v10319_v58 }
0x128e   :  { %9748 = vmatprep.subr.bf16.mxu1 %v10332_v54 }
0x1294   :  { %9244 = vmatmul.mubr.msk.f32.vlgmr.msra.gmra.mrb[36].mxu1 %vm341_vm3, %v3104_v51 }
0x1295   :  { %9257 = vmatprep.mubr.msk.f32.mxu1 %vm10320_vm2, %v10319_v58 }
0x135d   :  { %v2858_v53 = vpop.f32.mrb[24].mxu0 }
0x135e   :  { %v9221_v59 = vpop.f32.mrb[25].mxu0  ;;  %9231 = vmatprep.mubr.msk.f32.mxu0 %vm341_vm3, %v2858_v53 }
0x135f   :  { %v2937_v62 = vpop.f32.mrb[34].mxu1 }
0x1360   :  { %v9228_v5 = vpop.f32.mrb[35].mxu1  ;;  %9232 = vmatmul.mubr.msk.f32.vlgmr.msra.gmra.mrb[26].mxu0 %vm341_vm3, %v2937_v62 }
0x1361   :  { %9235 = vmatpush3.msra.mxu0 %v2250_v52  ;;  %9236 = vmatprep.mubr.msk.f32.mxu0 %vm341_vm3, %v10889_v6  ;;  %v3186_v6 = vpop.permute.xlu1 %3185 }
0x1362   :  { %9744 = vmatprep.subr.bf16.mxu0 %v10332_v54 }
0x1367   :  { %v3181_v13 = vpop.f32.mrb[36].mxu1 }
0x1368   :  { %v3267_v15 = vmul.f32 0.35355338, %v3181_v13  ;;  %v9245_v16 = vpop.f32.mrb[37].mxu1  ;;  %9237 = vmatmul.mubr.msk.f32.vlgmr.msra.gmra.mrb[26].mxu0 %vm341_vm3, %v10891_v10 }
0x1369   :  { %9747 = vmatpush3.bf16.xpose.msk.msra.mxu0 %vm10798_vm4, %v9745_v43  ;;  %9250 = vmatprep.mubr.msk.f32.mxu0 %vm10320_vm2, %v10319_v58 }
0x136a   :  { %v3269_v17 = vsel %vm2414_vm5, %v3267_v15, -inf  ;;  %9267 = vmatprep.subr.mxu0 %v2252_v30 }
0x136b   :  { %3270 = vmax.xlane.f32.xlu0 %v3269_v17 }
0x1370   :  { %9251 = vmatmul.mubr.msk.f32.vlgmr.msra.gmra.mrb[28].mxu0 %vm341_vm3, %v3186_v6 }
0x1371   :  { %9268 = vmatpush3.msra.mxu0 %v2252_v30 }
0x1372   :  { %9758 = vmatprep.subr.bf16.mxu0 %v10332_v54 }
0x13f8   :  { %v3271_v1 = vpop.xlane.xlu0 %3270 }
0x13f9   :  { %v3275_v18 = vsub.f32 %v3267_v15, %v3271_v1 }
0x13fb   :  { %v3277_v4 = vmul.f32 1.442695, %v3275_v18 }
0x13fd   :  { %10173 = vpow2.f32 %v3277_v4 }
0x1407   :  { %v10174_v0 = vpop.eup %10173 }
0x1408   :  { %v3281_v19 = vsel %vm2414_vm5, %v10174_v0, 0.0 }
0x1409   :  { %3282 = vadd.xlane.f32.xlu0 %v3281_v19 }
0x1443   :  { %v3263_v10 = vpop.f32.mrb[28].mxu0 }
0x1444   :  { %v3268_v20 = vmul.f32 0.35355338, %v3263_v10  ;;  %v9252_v22 = vpop.f32.mrb[29].mxu0 }
0x1446   :  { %v3272_v23 = vsel %vm2414_vm5, %v3268_v20, -inf }
0x1447   :  { %3273 = vmax.xlane.f32.xlu1 %v3272_v23 }
0x1458   :  { %10023 = vrot.lane.b32.xlu1 %v10802_v26, %s11779_s28 }
0x145c   :  { %10028 = vrot.lane.b32.xlu1 %v10794_v21, %s11780_s2 }
0x1460   :  { %10033 = vrot.lane.b32.xlu1 %v10802_v26, %s11780_s2 }
0x1464   :  { %3614 = vrot.lane.b32.xlu1 %v10841_v11, %s11780_s2 }
0x1496   :  { %v3283_v11 = vpop.xlane.xlu0 %3282 }
0x14d4   :  { %v3274_v7 = vpop.xlane.xlu1 %3273 }
0x14d5   :  { %v3276_v25 = vsub.f32 %v3268_v20, %v3274_v7 }
0x14d7   :  { %v3279_v27 = vmul.f32 1.442695, %v3276_v25 }
0x14d8   :  { %v10024_v32 = vpop.permute.xlu1 %10023 }
0x14d9   :  { %10175 = vpow2.f32 %v3279_v27  ;;  %v10026_v37 = vunpack.i.h.bf16 %v10024_v32  ;;  %v10025_v38 = vunpack.i.l.bf16 %v10024_v32 }
0x14da   :  { %10177 = vrcp.f32 %v3283_v11 }
0x14db   :  { %v9752_v44 = vpack.c.bf16 %v10026_v37, %v10025_v38 }
0x14dc   :  { %v10029_v45 = vpop.permute.xlu1 %10028 }
0x14dd   :  { %v10031_v46 = vunpack.i.h.bf16 %v10029_v45  ;;  %v10030_v47 = vunpack.i.l.bf16 %v10029_v45 }
0x14df   :  { %v9755_v48 = vpack.c.bf16 %v10031_v46, %v10030_v47 }
0x14e0   :  { %v10034_v49 = vpop.permute.xlu1 %10033 }
0x14e1   :  { %v10036_v51 = vunpack.i.h.bf16 %v10034_v49  ;;  %v10035_v52 = vunpack.i.l.bf16 %v10034_v49 }
0x14e3   :  { %v10176_v28 = vpop.eup %10175  ;;  %v9759_v62 = vpack.c.bf16 %v10036_v51, %v10035_v52 }
0x14e4   :  { %v3284_v29 = vsel %vm2414_vm5, %v10176_v28, 0.0  ;;  %v10178_v36 = vpop.eup %10177  ;;  %v3615_v57 = vpop.permute.xlu1 %3614 }
0x14e5   :  { %3285 = vadd.xlane.f32.xlu0 %v3284_v29  ;;  %v3289_v12 = vmul.f32 %v10178_v36, %v10174_v0 }
0x14fb   :  { %10018 = vrot.lane.b32.xlu0 %v10794_v21, %s11779_s28 }
0x14ff   :  { %3532 = vrot.lane.b32.xlu0 %v10843_v56, %s11780_s2 }
0x1572   :  { %v3286_v31 = vpop.xlane.xlu0 %3285 }
0x1573   :  { %10179 = vrcp.f32 %v3286_v31 }
0x1576   :  { %v10019_v33 = vpop.permute.xlu0 %10018 }
0x1577   :  { %v10021_v34 = vunpack.i.h.bf16 %v10019_v33  ;;  %v10020_v35 = vunpack.i.l.bf16 %v10019_v33 }
0x1579   :  { %v9749_v56 = vpack.c.bf16 %v10021_v34, %v10020_v35 }
0x157a   :  { %v3533_v63 = vpop.permute.xlu0 %3532 }
0x157b   :  { %9750 = vmatpush3.bf16.msra.mxu1 %v9749_v56 }
0x157c   :  { %9751 = vmatprep.subr.bf16.mxu1 %v10332_v54 }
0x157d   :  { %v10180_v40 = vpop.eup %10179 }
0x157e   :  { %9258 = vmatmul.mubr.msk.f32.vlgmr.msra.gmra.mrb[38].mxu1 %vm2414_vm5, %v3289_v12  ;;  %v3290_v61 = vmul.f32 %v10180_v40, %v10176_v28 }
0x157f   :  { %9753 = vmatpush3.bf16.msra.mxu1 %v9752_v44  ;;  %9264 = vmatprep.mubr.msk.f32.mxu1 %vm10320_vm2, %v10319_v58 }
0x1580   :  { %9754 = vmatprep.subr.bf16.mxu1 %v10332_v54 }
0x1582   :  { %9265 = vmatmul.mubr.msk.f32.vlgmr.msra.gmra.mrb[40].mxu1 %vm2414_vm5, %v3290_v61  ;;  %v8559_v61 = vld [vmem:[%s11703_s16] ss:$0 sm:$0xff] }
0x1583   :  { %9276 = vmatprep.mubr.msk.f32.mxu1 %vm10320_vm2, %v10319_v58 }
0x1588   :  { %9757 = vmatpush3.bf16.xpose.msk.msra.mxu1 %vm10798_vm4, %v9755_v48 }
0x1589   :  { %9762 = vmatprep.subr.bf16.mxu1 %v10332_v54 }
0x158f   :  { %9277 = vmatmul.mubr.msk.f32.vlgmr.msra.gmra.mrb[42].mxu1 %vm341_vm3, %v3533_v63 }
0x1590   :  { %9290 = vmatprep.mubr.msk.f32.mxu1 %vm10320_vm2, %v10319_v58 }
0x1651   :  { %v3366_v53 = vpop.f32.mrb[38].mxu1 }
0x1652   :  { %v9259_v59 = vpop.f32.mrb[39].mxu1  ;;  %9269 = vmatprep.mubr.msk.f32.mxu0 %vm341_vm3, %v3366_v53 }
0x1655   :  { %v3445_v2 = vpop.f32.mrb[40].mxu1 }
0x1656   :  { %v9266_v5 = vpop.f32.mrb[41].mxu1  ;;  %9270 = vmatmul.mubr.msk.f32.vlgmr.msra.gmra.mrb[26].mxu0 %vm341_vm3, %v3445_v2 }
0x1657   :  { %9761 = vmatpush3.bf16.xpose.msk.msra.mxu0 %vm10798_vm4, %v9759_v62  ;;  %9283 = vmatprep.mubr.msk.f32.mxu0 %vm10320_vm2, %v10319_v58 }
0x1658   :  { %9765 = vmatprep.subr.bf16.mxu0 %v10332_v54 }
0x165e   :  { %9284 = vmatmul.mubr.msk.f32.vlgmr.msra.gmra.mrb[30].mxu0 %vm341_vm3, %v3615_v57 }
0x165f   :  { %9297 = vmatprep.mubr.msk.f32.mxu0 %vm10320_vm2, %v10319_v58 }
0x1662   :  { %v3610_v42 = vpop.f32.mrb[42].mxu1 }
0x1663   :  { %v3696_v43 = vmul.f32 0.35355338, %v3610_v42  ;;  %v9278_v13 = vpop.f32.mrb[43].mxu1 }
0x1664   :  { %v4010_v13 = vld [vmem:[%s11704_s17] sm:$0xff] }
0x1665   :  { %v3698_v15 = vsel %vm2414_vm5, %v3696_v43, -inf }
0x1666   :  { %3699 = vmax.xlane.f32.xlu0 %v3698_v15  ;;  %v4011_v15 = vld [vmem:[%s11704_s17 + $0x8] sm:$0xff] }
0x16f3   :  { %v3700_v16 = vpop.xlane.xlu0 %3699 }
0x16f4   :  { %v3704_v17 = vsub.f32 %v3696_v43, %v3700_v16  ;;  %v9768_v16 = vpack.c.bf16 %v4011_v15, %v4010_v13 }
0x16f6   :  { %v3706_v6 = vmul.f32 1.442695, %v3704_v17  ;;  %v4012_v17 = vld [vmem:[%s11704_s17 + $0x10] sm:$0xff] }
0x16f8   :  { %10181 = vpow2.f32 %v3706_v6  ;;  %v4013_v6 = vld [vmem:[%s11704_s17 + $0x18] sm:$0xff] }
0x1702   :  { %v10182_v1 = vpop.eup %10181 }
0x1703   :  { %v3710_v18 = vsel %vm2414_vm5, %v10182_v1, 0.0 }
0x1704   :  { %3711 = vadd.xlane.f32.xlu0 %v3710_v18 }
0x1731   :  { %v3692_v4 = vpop.f32.mrb[30].mxu0 }
0x1732   :  { %v3697_v0 = vmul.f32 0.35355338, %v3692_v4  ;;  %v9285_v19 = vpop.f32.mrb[31].mxu0 }
0x1734   :  { %v3701_v10 = vsel %vm2414_vm5, %v3697_v0, -inf }
0x1735   :  { %3702 = vmax.xlane.f32.xlu1 %v3701_v10 }
0x1746   :  { %10043 = vrot.lane.b32.xlu1 %v10802_v26, %s11781_s26  ;;  %v2253_v26 = vld [vmem:[%s11702_s15 + $0x18] sm:$0xff] }
0x1791   :  { %v3712_v11 = vpop.xlane.xlu0 %3711 }
0x17c2   :  { %v3703_v20 = vpop.xlane.xlu1 %3702 }
0x17c3   :  { %v3705_v22 = vsub.f32 %v3697_v0, %v3703_v20 }
0x17c5   :  { %v3708_v23 = vmul.f32 1.442695, %v3705_v22  ;;  %v11027_v22 = vsub.s32 2, %v10526_v39 }
0x17c6   :  { %v10044_v7 = vpop.permute.xlu1 %10043 }
0x17c7   :  { %10183 = vpow2.f32 %v3708_v23  ;;  %v10046_v25 = vunpack.i.h.bf16 %v10044_v7  ;;  %v10045_v27 = vunpack.i.l.bf16 %v10044_v7  ;;  %v10289_v23 = vld [vmem:[%s11767_s4] sm:$0x7] }
0x17c8   :  { %10185 = vrcp.f32 %v3712_v11  ;;  %v4001_v7 = vrot.slane %v10289_v23, %v11027_v22 }
0x17c9   :  { %v9766_v28 = vpack.c.bf16 %v10046_v25, %v10045_v27 }
0x17cb   :  { %9767 = vmatpush3.bf16.msra.mxu0 %v9766_v28 }
0x17cc   :  { %9300 = vmatprep.subr.mxu0 %v2253_v26 }
0x17d1   :  { %v10184_v29 = vpop.eup %10183 }
0x17d2   :  { %v3713_v30 = vsel %vm2414_vm5, %v10184_v29, 0.0  ;;  %v10186_v35 = vpop.eup %10185 }
0x17d3   :  { %3714 = vadd.xlane.f32.xlu0 %v3713_v30  ;;  %v3718_v37 = vmul.f32 %v10186_v35, %v10182_v1  ;;  %v9772_v1 = vpack.c.bf16 %v4013_v6, %v4012_v17  ;;  %v10290_v30 = vld [vmem:[%s11768_s5] sm:$0x7] }
0x17e9   :  { %10038 = vrot.lane.b32.xlu0 %v10794_v21, %s11781_s26 }
0x1860   :  { %v3715_v31 = vpop.xlane.xlu0 %3714 }
0x1861   :  { %10187 = vrcp.f32 %v3715_v31 }
0x1864   :  { %v10039_v32 = vpop.permute.xlu0 %10038 }
0x1865   :  { %v10041_v33 = vunpack.i.h.bf16 %v10039_v32  ;;  %v10040_v34 = vunpack.i.l.bf16 %v10039_v32 }
0x1867   :  { %v9763_v36 = vpack.c.bf16 %v10041_v33, %v10040_v34  ;;  %v4156_v33 = vld [vmem:[%s11706_s19] sm:$0xff]  ;;  %v4157_v34 = vld [vmem:[%s11706_s19 + $0x8] sm:$0xff] }
0x1868   :  { %v9776_v35 = vpack.c.bf16 %v4157_v34, %v4156_v33 }
0x1869   :  { %9764 = vmatpush3.bf16.msra.mxu1 %v9763_v36  ;;  %v4158_v36 = vld [vmem:[%s11706_s19 + $0x10] sm:$0xff] }
0x186a   :  { %9769 = vmatprep.subr.bf16.mxu1 %v9768_v16 }
0x186b   :  { %v10188_v38 = vpop.eup %10187 }
0x186c   :  { %v3719_v56 = vmul.f32 %v10188_v38, %v10184_v29  ;;  %9291 = vmatmul.mubr.msk.f32.vlgmr.msra.gmra.mrb[44].mxu1 %vm2414_vm5, %v3718_v37  ;;  %v4159_v37 = vld [vmem:[%s11706_s19 + $0x18] sm:$0xff] }
0x186d   :  { %9771 = vmatpush3.bf16.msra.mxu1 %v9768_v16  ;;  %v9780_v38 = vpack.c.bf16 %v4159_v37, %v4158_v36 }
0x186e   :  { %9298 = vmatmul.mubr.msk.f32.vlgmr.msra.gmra.mrb[32].mxu0 %vm2414_vm5, %v3719_v56  ;;  %9773 = vmatprep.subr.bf16.mxu1 %v9772_v1  ;;  %v4160_v56 = vld [vmem:[%s11706_s19 + $0x20] sm:$0xff] }
0x186f   :  { %9301 = vmatpush3.msra.mxu0 %v2253_v26  ;;  %v4007_v26 = vrot.slane %v10290_v30, %v11027_v22 }
0x1870   :  { %9777 = vmatprep.subr.bf16.mxu0 %v9776_v35 }
0x1871   :  { %9775 = vmatpush3.bf16.msra.mxu1 %v9772_v1 }
0x193f   :  { %v3795_v21 = vpop.f32.mrb[44].mxu1 }
0x1940   :  { %v9292_v12 = vpop.f32.mrb[45].mxu1  ;;  %9302 = vmatprep.mubr.msk.f32.mxu0 %vm341_vm3, %v3795_v21  ;;  %v4161_v21 = vld [vmem:[%s11706_s19 + $0x28] sm:$0xff] }
0x1941   :  { %v3874_v40 = vpop.f32.mrb[32].mxu0  ;;  %v9784_v12 = vpack.c.bf16 %v4161_v21, %v4160_v56 }
0x1942   :  { %v9299_v44 = vpop.f32.mrb[33].mxu0  ;;  %9303 = vmatmul.mubr.msk.f32.vlgmr.msra.gmra.mrb[26].mxu0 %vm341_vm3, %v3874_v40  ;;  %v4162_v40 = vld [vmem:[%s11706_s19 + $0x30] sm:$0xff] }
0x1943   :  { %9779 = vmatpush3.bf16.msra.mxu0 %v9776_v35  ;;  %v4163_v44 = vld [vmem:[%s11706_s19 + $0x38] sm:$0xff] }
0x1944   :  { %9781 = vmatprep.subr.bf16.mxu0 %v9780_v38 }
0x1947   :  { %9783 = vmatpush3.bf16.msra.mxu0 %v9780_v38 }
0x1948   :  { %9785 = vmatprep.subr.bf16.mxu0 %v9784_v12 }
0x194b   :  { %9787 = vmatpush3.bf16.msra.mxu0 %v9784_v12 }
0x1a15   :  { %v9304_v45 = vpop.f32.mrb[26].mxu0 }
0x1a16   :  { %v3962_v46 = vadd.f32 %v9304_v45, %v10783_v60  ;;  %v3950_v47 = vpop.f32.mrb[27].mxu0  ;;  %v9788_v45 = vpack.c.bf16 %v4163_v44, %v4162_v40 }
0x1a17   :  { %v3961_v48 = vadd.f32 %v3950_v47, %v10785_v14 }
0x1a18   :  { %v11002_v63 = vadd.f32 %v8559_v61, %v3962_v46  ;;  %9789 = vmatprep.subr.bf16.mxu0 %v9788_v45  ;;  %v4165_v46 = vld [vmem:[%s11706_s19 + $0x48] sm:$0xff] }
0x1a19   :  { %v11004_v49 = vadd.f32 %v8559_v61, %v3961_v48  ;;  %9791 = vmatpush3.bf16.msra.mxu0 %v9788_v45  ;;  %v4164_v61 = vld [vmem:[%s11706_s19 + $0x40] sm:$0xff]  ;;  %v4166_v48 = vld [vmem:[%s11706_s19 + $0x50] sm:$0xff] }
0x1a1a   :  { %v3975_v51 = vsel %vm202_vm0, %v11002_v63, 0.0  ;;  %v9792_v47 = vpack.c.bf16 %v4165_v46, %v4164_v61 }
0x1a1b   :  { %3976 = vadd.xlane.f32.xlu0 %v3975_v51  ;;  %v3972_v52 = vsel %vm202_vm0, %v11004_v49, 0.0  ;;  %v4167_v51 = vld [vmem:[%s11706_s19 + $0x58] sm:$0xff] }
0x1a1c   :  { %3973 = vadd.xlane.f32.xlu1 %v3972_v52  ;;  %9793 = vmatprep.subr.bf16.mxu0 %v9792_v47  ;;  %v9796_v52 = vpack.c.bf16 %v4167_v51, %v4166_v48 }
0x1a1d   :  { %9795 = vmatpush3.bf16.msra.mxu0 %v9792_v47 }
0x1a1e   :  { %9797 = vmatprep.subr.bf16.mxu0 %v9796_v52 }
0x1a21   :  { %9799 = vmatpush3.bf16.msra.mxu0 %v9796_v52 }
0x1aa8   :  { %v3977_v53 = vpop.xlane.xlu0 %3976 }
0x1aa9   :  { %v3979_v59 = vmul.f32 0.03125, %v3977_v53  ;;  %v3974_v62 = vpop.xlane.xlu1 %3973  ;;  %v4168_v53 = vld [vmem:[%s11706_s19 + $0x60] sm:$0xff] }
0x1aaa   :  { %v3978_v2 = vmul.f32 0.03125, %v3974_v62 }
0x1aab   :  { %v3981_v60 = vsub.f32 %v11002_v63, %v3979_v59  ;;  %v4169_v59 = vld [vmem:[%s11706_s19 + $0x68] sm:$0xff] }
0x1aac   :  { %v3980_v14 = vsub.f32 %v11004_v49, %v3978_v2  ;;  %v9800_v62 = vpack.c.bf16 %v4169_v59, %v4168_v53  ;;  %v4170_v2 = vld [vmem:[%s11706_s19 + $0x70] sm:$0xff] }
0x1aad   :  { %v3983_v5 = vmul.f32 %v3981_v60, %v3981_v60 }
0x1aae   :  { %v3982_v57 = vmul.f32 %v3980_v14, %v3980_v14  ;;  %9801 = vmatprep.subr.bf16.mxu0 %v9800_v62 }
0x1aaf   :  { %v3987_v42 = vsel %vm202_vm0, %v3983_v5, 0.0  ;;  %9803 = vmatpush3.bf16.msra.mxu0 %v9800_v62  ;;  %v8560_v5 = vld [vmem:[%s11705_s18] ss:$0 sm:$0xff] }
0x1ab0   :  { %3988 = vadd.xlane.f32.xlu1 %v3987_v42  ;;  %v3984_v43 = vsel %vm202_vm0, %v3982_v57, 0.0 }
0x1ab1   :  { %3985 = vadd.xlane.f32.xlu0 %v3984_v43 }
0x1b3d   :  { %v3989_v18 = vpop.xlane.xlu1 %3988 }
0x1b3e   :  { %v3991_v4 = vmul.f32 0.03125, %v3989_v18  ;;  %v3986_v0 = vpop.xlane.xlu0 %3985 }
0x1b3f   :  { %v3990_v19 = vmul.f32 0.03125, %v3986_v0 }
0x1b40   :  { %v3993_v10 = vadd.f32 1e-05, %v3991_v4 }
0x1b41   :  { %v3992_v20 = vadd.f32 1e-05, %v3990_v19 }
0x1b42   :  { %10189 = vrsqrt.f32 %v3993_v10 }
0x1b43   :  { %10191 = vrsqrt.f32 %v3992_v20 }
0x1b4c   :  { %v10190_v25 = vpop.eup %10189 }
0x1b4d   :  { %v10192_v27 = vpop.eup %10191  ;;  %v3997_v28 = vmul.f32 %v10190_v25, %v3981_v60  ;;  %v4171_v60 = vld [vmem:[%s11706_s19 + $0x78] sm:$0xff] }
0x1b4e   :  { %v3996_v29 = vmul.f32 %v10192_v27, %v3980_v14  ;;  %v9804_v14 = vpack.c.bf16 %v4171_v60, %v4170_v2 }
0x1b4f   :  { %v4003_v11 = vmul.f32 %v4001_v7, %v3997_v28 }
0x1b50   :  { %v4002_v31 = vmul.f32 %v4001_v7, %v3996_v29  ;;  %9805 = vmatprep.subr.bf16.mxu0 %v9804_v14 }
0x1b51   :  { %v4009_v32 = vadd.f32 %v4007_v26, %v4003_v11  ;;  %9807 = vmatpush3.bf16.msra.mxu0 %v9804_v14 }
0x1b52   :  { %v4008_v39 = vadd.f32 %v4007_v26, %v4002_v31  ;;  %9392 = vmatprep.subr.mxu0 %v10319_v58 }
0x1b54   :  { %9313 = vmatprep.mubr.msk.f32.mxu1 %vm202_vm0, %v4008_v39 }
0x1b55   :  { %9314 = vmatmul.mubr.msk.f32.vlgmr.msra.gmra.mrb[46].mxu1 %vm202_vm0, %v4009_v32 }
0x1c28   :  { %v9315_v57 = vpop.f32.mrb[46].mxu1 }
0x1c29   :  { %v4099_v42 = vadd.f32 %v9315_v57, %v8560_v5  ;;  %v4093_v43 = vpop.f32.mrb[47].mxu1 }
0x1c2a   :  { %v4094_v13 = vadd.f32 %v8560_v5, %v4093_v43 }
0x1c2b   :  { %v4103_v15 = vmul.f32 0.70710677, %v4099_v42  ;;  %v4151_v5 = vmul.f32 0.5, %v4099_v42 }
0x1c2c   :  { %v4102_v16 = vmul.f32 0.70710677, %v4094_v13  ;;  %v4150_v60 = vmul.f32 0.5, %v4094_v13 }
0x1c2d   :  { %v4105_v17 = vand.u32 2147483647, %v4103_v15  ;;  %vm4145_vm6 = vcmp.ge.f32.partialorder %v4103_v15, 0.0  ;;  %v8563_v15 = vld [vmem:[%s11707_s20] ss:$0 sm:$0xff] }
0x1c2e   :  { %v4104_v6 = vand.u32 2147483647, %v4102_v16  ;;  %vm4144_vm7 = vcmp.ge.f32.partialorder %v4102_v16, 0.0 }
0x1c2f   :  { %v4107_v1 = vmul.f32 0.3275911, %v4105_v17  ;;  %v4133_v19 = vsub.f32 0.0, %v4105_v17 }
0x1c30   :  { %v4106_v18 = vmul.f32 0.3275911, %v4104_v6  ;;  %v4132_v10 = vsub.f32 0.0, %v4104_v6 }
0x1c31   :  { %v4109_v4 = vadd.f32 1.0, %v4107_v1  ;;  %v4135_v23 = vmul.f32 %v4133_v19, %v4105_v17 }
0x1c32   :  { %v4108_v0 = vadd.f32 1.0, %v4106_v18  ;;  %v4134_v27 = vmul.f32 %v4132_v10, %v4104_v6 }
0x1c33   :  { %10193 = vrcp.f32 %v4109_v4  ;;  %v4138_v30 = vmul.f32 1.442695, %v4135_v23 }
0x1c34   :  { %10195 = vrcp.f32 %v4108_v0  ;;  %v4136_v31 = vmul.f32 1.442695, %v4134_v27 }
0x1c35   :  { %10197 = vpow2.f32 %v4138_v30 }
0x1c36   :  { %10199 = vpow2.f32 %v4136_v31 }
0x1c3d   :  { %v10194_v20 = vpop.eup %10193 }
0x1c3e   :  { %v10196_v7 = vpop.eup %10195  ;;  %v4115_v25 = vmul.f32 1.0614054, %v10194_v20 }
0x1c3f   :  { %v4114_v28 = vmul.f32 1.0614054, %v10196_v7  ;;  %v10198_v44 = vpop.eup %10197 }
0x1c40   :  { %v4117_v29 = vadd.f32 -1.4531521, %v4115_v25  ;;  %v10200_v61 = vpop.eup %10199 }
0x1c41   :  { %v4116_v26 = vadd.f32 -1.4531521, %v4114_v28  ;;  %v8566_v28 = vld [vmem:[%s11766_s27 + $0x20] sm:$0xff] }
0x1c42   :  { %v4119_v11 = vmul.f32 %v10194_v20, %v4117_v29  ;;  %v8567_v29 = vld [vmem:[%s11766_s27 + $0x28] sm:$0xff] }
0x1c43   :  { %v4118_v39 = vmul.f32 %v10196_v7, %v4116_v26  ;;  %v9808_v30 = vpack.c.bf16 %v8567_v29, %v8566_v28  ;;  %v8568_v26 = vld [vmem:[%s11766_s27 + $0x30] sm:$0xff] }
0x1c44   :  { %v4121_v32 = vadd.f32 1.4214138, %v4119_v11  ;;  %v8569_v11 = vld [vmem:[%s11766_s27 + $0x38] sm:$0xff] }
0x1c45   :  { %v4120_v33 = vadd.f32 1.4214138, %v4118_v39  ;;  %9809 = vmatprep.subr.bf16.mxu1 %v9808_v30  ;;  %v9812_v31 = vpack.c.bf16 %v8569_v11, %v8568_v26 }
0x1c46   :  { %v4123_v34 = vmul.f32 %v10194_v20, %v4121_v32  ;;  %9811 = vmatpush3.bf16.msra.mxu1 %v9808_v30 }
0x1c47   :  { %v4122_v35 = vmul.f32 %v10196_v7, %v4120_v33  ;;  %9813 = vmatprep.subr.bf16.mxu1 %v9812_v31 }
0x1c48   :  { %v4125_v36 = vadd.f32 -0.28449672, %v4123_v34 }
0x1c49   :  { %v4124_v37 = vadd.f32 -0.28449672, %v4122_v35 }
0x1c4a   :  { %v4127_v38 = vmul.f32 %v10194_v20, %v4125_v36  ;;  %9815 = vmatpush3.bf16.msra.mxu1 %v9812_v31 }
0x1c4b   :  { %v4126_v56 = vmul.f32 %v10196_v7, %v4124_v37  ;;  %9362 = vmatprep.subr.mxu1 %v10319_v58  ;;  %v11126_v37 = vld [vmem:[%s11767_s4 + $0x4] sm:$0x7] }
0x1c4c   :  { %v4129_v21 = vadd.f32 0.2548296, %v4127_v38  ;;  %v11131_v38 = vld [vmem:[%s11768_s5 + $0x4] sm:$0x7] }
0x1c4d   :  { %v4128_v12 = vadd.f32 0.2548296, %v4126_v56  ;;  %v4291_v56 = vrot.slane %v11126_v37, %v10529_v41 }
0x1c4e   :  { %v4131_v40 = vmul.f32 %v10194_v20, %v4129_v21 }
0x1c4f   :  { %v4130_v45 = vmul.f32 %v10196_v7, %v4128_v12 }
0x1c50   :  { %v4141_v46 = vmul.f32 %v10198_v44, %v4131_v40 }
0x1c51   :  { %v4140_v47 = vmul.f32 %v10200_v61, %v4130_v45  ;;  %v4297_v45 = vrot.slane %v11131_v38, %v10529_v41 }
0x1c52   :  { %v4143_v48 = vsub.f32 1.0, %v4141_v46 }
0x1c53   :  { %v4142_v51 = vsub.f32 1.0, %v4140_v47 }
0x1c54   :  { %v4147_v52 = vsub.f32 0.0, %v4143_v48 }
0x1c55   :  { %v4146_v53 = vsub.f32 0.0, %v4142_v51 }
0x1c56   :  { %v4149_v59 = vsel %vm4145_vm6, %v4143_v48, %v4147_v52 }
0x1c57   :  { %v4153_v62 = vadd.f32 1.0, %v4149_v59  ;;  %v4148_v2 = vsel %vm4144_vm7, %v4142_v51, %v4146_v53  ;;  %v8571_v51 = vld [vmem:[%s11769_s29 + $0x1] ss:$0 sm:$0xff]  ;;  %s11786_s29 = sld [smem:[#allocation15_spill]] }
0x1c58   :  { %v4152_v14 = vadd.f32 1.0, %v4148_v2 }
0x1c59   :  { %v4155_v43 = vmul.f32 %v4153_v62, %v4151_v5 }
0x1c5a   :  { %v4154_v57 = vmul.f32 %v4152_v14, %v4150_v60 }
0x1c5c   :  { %9348 = vmatprep.mubr.f32.mxu0 %v4154_v57  ;;  %v11167_v57 = vld [vmem:[%s11770_s8] sm:$0xff] }
0x1c5d   :  { %9349 = vmatmul.mubr.f32.vlgmr.msra.gmra.mrb[34].mxu0 %v4155_v43 }
0x1c5e   :  { %9394 = vmatprep.mubr.msk.f32.mxu0 %vm10320_vm2, %v10319_v58 }
0x1d30   :  { %v9350_v17 = vpop.f32.mrb[34].mxu0 }
0x1d31   :  { %v4248_v6 = vadd.f32 %v9350_v17, %v11002_v63  ;;  %v4238_v16 = vpop.f32.mrb[35].mxu0 }
0x1d32   :  { %v4247_v1 = vadd.f32 %v4238_v16, %v11004_v49 }
0x1d33   :  { %v11098_v13 = vadd.f32 %v8563_v15, %v4248_v6 }
0x1d34   :  { %v11100_v42 = vadd.f32 %v8563_v15, %v4247_v1  ;;  %v11174_v1 = vld [vmem:[%s11770_s8 + $0x8] sm:$0xff]  ;;  %s11783_s8 = smov 56  }
0x1d35   :  { %v4265_v18 = vsel %vm202_vm0, %v11098_v13, 0.0 }
0x1d36   :  { %4266 = vadd.xlane.f32.xlu1 %v4265_v18  ;;  %v4262_v4 = vsel %vm202_vm0, %v11100_v42, 0.0 }
0x1d37   :  { %4263 = vadd.xlane.f32.xlu0 %v4262_v4 }
0x1dc3   :  { %v4267_v0 = vpop.xlane.xlu1 %4266 }
0x1dc4   :  { %v4269_v19 = vmul.f32 0.03125, %v4267_v0  ;;  %v4264_v10 = vpop.xlane.xlu0 %4263 }
0x1dc5   :  { %v4268_v20 = vmul.f32 0.03125, %v4264_v10 }
0x1dc6   :  { %v4271_v63 = vsub.f32 %v11098_v13, %v4269_v19 }
0x1dc7   :  { %v4270_v49 = vsub.f32 %v11100_v42, %v4268_v20 }
0x1dc8   :  { %v4273_v23 = vmul.f32 %v4271_v63, %v4271_v63 }
0x1dc9   :  { %v4272_v7 = vmul.f32 %v4270_v49, %v4270_v49 }
0x1dca   :  { %v4277_v25 = vsel %vm202_vm0, %v4273_v23, 0.0 }
0x1dcb   :  { %4278 = vadd.xlane.f32.xlu1 %v4277_v25  ;;  %v4274_v27 = vsel %vm202_vm0, %v4272_v7, 0.0 }
0x1dcc   :  { %4275 = vadd.xlane.f32.xlu0 %v4274_v27 }
0x1e58   :  { %v4279_v39 = vpop.xlane.xlu1 %4278 }
0x1e59   :  { %v4281_v32 = vmul.f32 0.03125, %v4279_v39  ;;  %v4276_v33 = vpop.xlane.xlu0 %4275 }
0x1e5a   :  { %v4280_v34 = vmul.f32 0.03125, %v4276_v33 }
0x1e5b   :  { %v4283_v35 = vadd.f32 1e-05, %v4281_v32 }
0x1e5c   :  { %v4282_v36 = vadd.f32 1e-05, %v4280_v34 }
0x1e5d   :  { %10201 = vrsqrt.f32 %v4283_v35 }
0x1e5e   :  { %10203 = vrsqrt.f32 %v4282_v36 }
0x1e67   :  { %v10202_v21 = vpop.eup %10201 }
0x1e68   :  { %v10204_v12 = vpop.eup %10203  ;;  %v4287_v40 = vmul.f32 %v10202_v21, %v4271_v63 }
0x1e69   :  { %v4286_v44 = vmul.f32 %v10204_v12, %v4270_v49 }
0x1e6a   :  { %v4293_v61 = vmul.f32 %v4291_v56, %v4287_v40 }
0x1e6b   :  { %v4292_v46 = vmul.f32 %v4291_v56, %v4286_v44 }
0x1e6c   :  { %v4299_v48 = vadd.f32 %v4297_v45, %v4293_v61 }
0x1e6d   :  { %v4298_v47 = vadd.f32 %v4297_v45, %v4292_v46 }
0x1e6f   :  { %9359 = vmatprep.mubr.msk.f32.mxu1 %vm202_vm0, %v4298_v47 }
0x1e70   :  { %9360 = vmatmul.mubr.msk.f32.vlgmr.msra.gmra.mrb[48].mxu1 %vm202_vm0, %v4299_v48 }
0x1e71   :  { %9364 = vmatprep.mubr.msk.f32.mxu1 %vm10320_vm2, %v10319_v58 }
0x1f43   :  { %v9361_v52 = vpop.f32.mrb[48].mxu1 }
0x1f44   :  { %v11144_v53 = vadd.f32 %v9361_v52, %v8571_v51  ;;  %v4385_v59 = vpop.f32.mrb[49].mxu1 }
0x1f45   :  { %v11146_v41 = vadd.f32 %v8571_v51, %v4385_v59 }
0x1f46   :  { %4477 = vrot.lane.b32.xlu1 %v11144_v53, %s11775_s7 }
0x1f47   :  { %4400 = vrot.lane.b32.xlu0 %v11146_v41, %s11775_s7 }
0x1fb8   :  { %v4478_v2 = vpop.permute.xlu1 %4477 }
0x1fb9   :  { %v4401_v62 = vpop.permute.xlu0 %4400 }
0x1fba   :  { %9363 = vmatpush3.xpose.msk.msra.mxu1 %vm341_vm3, %v4401_v62 }
0x1fbb   :  { %9367 = vmatprep.subr.mxu1 %v10319_v58 }
0x1fbd   :  { %9365 = vmatmul.mubr.msk.f32.vlgmr.msra.gmra.mrb[50].mxu1 %vm341_vm3, %v11146_v41 }
0x1fbe   :  { %9368 = vmatpush3.xpose.msk.msra.mxu1 %vm341_vm3, %v4478_v2  ;;  %9369 = vmatprep.mubr.msk.f32.mxu1 %vm10320_vm2, %v10319_v58 }
0x1fbf   :  { %9372 = vmatprep.subr.mxu1 %v10319_v58 }
0x1fc1   :  { %9370 = vmatmul.mubr.msk.f32.vlgmr.msra.gmra.mrb[52].mxu1 %vm341_vm3, %v11144_v53 }
0x1fc2   :  { %9374 = vmatprep.mubr.msk.f32.mxu1 %vm10320_vm2, %v10319_v58 }
0x2090   :  { %v4472_v60 = vpop.f32.mrb[50].mxu1 }
0x2091   :  { %v4553_v14 = vmul.f32 0.35355338, %v4472_v60  ;;  %v9366_v5 = vpop.f32.mrb[51].mxu1 }
0x2093   :  { %v4555_v43 = vadd.f32 %v11167_v57, %v4553_v14 }
0x2094   :  { %v4549_v17 = vpop.f32.mrb[52].mxu1 }
0x2095   :  { %v4554_v15 = vmul.f32 0.35355338, %v4549_v17  ;;  %v9371_v6 = vpop.f32.mrb[53].mxu1  ;;  %v4557_v16 = vsel %vm341_vm3, %v4555_v43, -inf }
0x2096   :  { %4558 = vmax.xlane.f32.xlu1 %v4557_v16 }
0x2097   :  { %v4556_v18 = vadd.f32 %v11174_v1, %v4554_v15 }
0x2099   :  { %v4560_v4 = vsel %vm341_vm3, %v4556_v18, -inf }
0x209a   :  { %4561 = vmax.xlane.f32.xlu0 %v4560_v4 }
0x20a7   :  { %4655 = vrot.lane.b32.xlu1 %v11144_v53, %s11782_s21 }
0x20ab   :  { %4733 = vrot.lane.b32.xlu1 %v11146_v41, %s11777_s0 }
0x20af   :  { %4731 = vrot.lane.b32.xlu1 %v11146_v41, %s11776_s9 }
0x2123   :  { %v4559_v0 = vpop.xlane.xlu1 %4558 }
0x2124   :  { %v4563_v19 = vsub.f32 %v4555_v43, %v4559_v0 }
0x2126   :  { %v4565_v10 = vmul.f32 1.442695, %v4563_v19 }
0x2127   :  { %v4562_v20 = vpop.xlane.xlu0 %4561  ;;  %v4656_v28 = vpop.permute.xlu1 %4655 }
0x2128   :  { %10205 = vpow2.f32 %v4565_v10  ;;  %v4564_v63 = vsub.f32 %v4556_v18, %v4562_v20 }
0x212a   :  { %v4567_v49 = vmul.f32 1.442695, %v4564_v63 }
0x212b   :  { %v4734_v29 = vpop.permute.xlu1 %4733 }
0x212c   :  { %10207 = vpow2.f32 %v4567_v49 }
0x212f   :  { %v4732_v30 = vpop.permute.xlu1 %4731 }
0x2132   :  { %v10206_v23 = vpop.eup %10205 }
0x2133   :  { %v4569_v7 = vsel %vm341_vm3, %v10206_v23, 0.0 }
0x2134   :  { %4570 = vadd.xlane.f32.xlu0 %v4569_v7 }
0x2136   :  { %v10208_v25 = vpop.eup %10207 }
0x2137   :  { %v4572_v27 = vsel %vm341_vm3, %v10208_v25, 0.0 }
0x2138   :  { %4573 = vadd.xlane.f32.xlu1 %v4572_v27 }
0x2149   :  { %4809 = vrot.lane.b32.xlu1 %v11144_v53, %s11776_s9 }
0x214a   :  { %4579 = vrot.lane.b32.xlu0 %v11146_v41, %s11782_s21  ;;  %s11790_s21 = sld [smem:[#allocation19_spill]] }
0x214d   :  { %5229 = vrot.lane.b32.xlu1 %v11146_v41, %s11779_s28 }
0x214e   :  { %4811 = vrot.lane.b32.xlu0 %v11144_v53, %s11777_s0 }
0x21c1   :  { %v4571_v26 = vpop.xlane.xlu0 %4570 }
0x21c2   :  { %10209 = vrcp.f32 %v4571_v26 }
0x21c5   :  { %v4574_v11 = vpop.xlane.xlu1 %4573  ;;  %v4580_v31 = vpop.permute.xlu0 %4579 }
0x21c6   :  { %10211 = vrcp.f32 %v4574_v11  ;;  %9373 = vmatpush3.msra.mxu1 %v4580_v31 }
0x21c7   :  { %9377 = vmatprep.subr.mxu1 %v10319_v58 }
0x21c9   :  { %v4812_v35 = vpop.permute.xlu0 %4811  ;;  %v4810_v36 = vpop.permute.xlu1 %4809 }
0x21cc   :  { %v10210_v39 = vpop.eup %10209 }
0x21cd   :  { %v4577_v32 = vmul.f32 %v10210_v39, %v10206_v23  ;;  %v5230_v15 = vpop.permute.xlu1 %5229 }
0x21cf   :  { %9375 = vmatmul.mubr.msk.f32.vlgmr.msra.gmra.mrb[54].mxu1 %vm341_vm3, %v4577_v32 }
0x21d0   :  { %v10212_v33 = vpop.eup %10211  ;;  %9378 = vmatpush3.msra.mxu1 %v4656_v28  ;;  %9379 = vmatprep.mubr.msk.f32.mxu1 %vm10320_vm2, %v10319_v58 }
0x21d1   :  { %v4578_v34 = vmul.f32 %v10212_v33, %v10208_v25  ;;  %9382 = vmatprep.subr.mxu1 %v10319_v58 }
0x21d3   :  { %9380 = vmatmul.mubr.msk.f32.vlgmr.msra.gmra.mrb[56].mxu1 %vm341_vm3, %v4578_v34 }
0x21d4   :  { %9384 = vmatprep.mubr.msk.f32.mxu1 %vm10320_vm2, %v10319_v58 }
0x21d7   :  { %9383 = vmatpush3.xpose.msk.msra.mxu1 %vm341_vm3, %v4734_v29 }
0x21d8   :  { %9387 = vmatprep.subr.mxu1 %v10319_v58 }
0x21da   :  { %9385 = vmatmul.mubr.msk.f32.vlgmr.msra.gmra.mrb[58].mxu1 %vm341_vm3, %v4732_v30 }
0x21db   :  { %9388 = vmatpush3.xpose.msk.msra.mxu1 %vm341_vm3, %v4812_v35  ;;  %9389 = vmatprep.mubr.msk.f32.mxu1 %vm10320_vm2, %v10319_v58 }
0x21dc   :  { %9397 = vmatprep.subr.mxu1 %v10319_v58 }
0x21de   :  { %9390 = vmatmul.mubr.msk.f32.vlgmr.msra.gmra.mrb[60].mxu1 %vm341_vm3, %v4810_v36 }
0x21df   :  { %9399 = vmatprep.mubr.msk.f32.mxu1 %vm10320_vm2, %v10319_v58 }
0x22a2   :  { %v11212_v56 = vpop.f32.mrb[54].mxu1 }
0x22a3   :  { %v9376_v21 = vpop.f32.mrb[55].mxu1 }
0x22a6   :  { %v11214_v12 = vpop.f32.mrb[56].mxu1 }
0x22a7   :  { %v9381_v40 = vpop.f32.mrb[57].mxu1 }
0x22ad   :  { %v4805_v44 = vpop.f32.mrb[58].mxu1 }
0x22ae   :  { %v9386_v45 = vpop.f32.mrb[59].mxu1  ;;  %v4887_v5 = vmul.f32 0.35355338, %v4805_v44  ;;  %v8575_v44 = vld [vmem:[%s11771_s3 + $0x28] sm:$0xff] }
0x22af   :  { %v8574_v45 = vld [vmem:[%s11771_s3 + $0x20] sm:$0xff] }
0x22b0   :  { %v4889_v43 = vadd.f32 %v11167_v57, %v4887_v5 }
0x22b1   :  { %v4883_v61 = vpop.f32.mrb[60].mxu1 }
0x22b2   :  { %v4888_v46 = vmul.f32 0.35355338, %v4883_v61  ;;  %v9391_v47 = vpop.f32.mrb[61].mxu1  ;;  %v4891_v17 = vsel %vm341_vm3, %v4889_v43, -inf }
0x22b4   :  { %v4890_v48 = vadd.f32 %v11174_v1, %v4888_v46 }
0x22b6   :  { %v4894_v51 = vsel %vm341_vm3, %v4890_v48, -inf }
0x22b7   :  { %4895 = vmax.xlane.f32.xlu0 %v4894_v51 }
0x22cd   :  { %4989 = vrot.lane.b32.xlu0 %v11144_v53, %s11783_s8 }
0x22d1   :  { %5227 = vrot.lane.b32.xlu0 %v11146_v41, %s11778_s1 }
0x22d5   :  { %5305 = vrot.lane.b32.xlu0 %v11144_v53, %s11778_s1 }
0x2344   :  { %v4896_v52 = vpop.xlane.xlu0 %4895 }
0x2345   :  { %v4898_v59 = vsub.f32 %v4890_v48, %v4896_v52 }
0x2347   :  { %v4901_v62 = vmul.f32 1.442695, %v4898_v59 }
0x2348   :  { %v4990_v2 = vpop.permute.xlu0 %4989 }
0x2349   :  { %10213 = vpow2.f32 %v4901_v62  ;;  %9398 = vmatpush3.msra.mxu1 %v4990_v2 }
0x234a   :  { %9412 = vmatprep.subr.mxu1 %v10319_v58 }
0x234c   :  { %v5228_v4 = vpop.permute.xlu0 %5227 }
0x2350   :  { %v5306_v19 = vpop.permute.xlu0 %5305 }
0x2353   :  { %v10214_v60 = vpop.eup %10213 }
0x2354   :  { %v4906_v14 = vsel %vm341_vm3, %v10214_v60, 0.0 }
0x2355   :  { %4907 = vadd.xlane.f32.xlu1 %v4906_v14 }
0x2366   :  { %5307 = vrot.lane.b32.xlu1 %v11144_v53, %s11779_s28 }
0x238a   :  { %4892 = vmax.xlane.f32.xlu1 %v4891_v17 }
0x23e2   :  { %v4908_v6 = vpop.xlane.xlu1 %4907 }
0x23e3   :  { %10215 = vrcp.f32 %v4908_v6 }
0x23e6   :  { %v5308_v0 = vpop.permute.xlu1 %5307 }
0x23ed   :  { %v10216_v16 = vpop.eup %10215 }
0x23ee   :  { %v4912_v18 = vmul.f32 %v10216_v16, %v10214_v60 }
0x23f0   :  { %9400 = vmatmul.mubr.msk.f32.vlgmr.msra.gmra.mrb[62].mxu1 %vm341_vm3, %v4912_v18 }
0x23f1   :  { %9413 = vmatpush3.xpose.msk.msra.mxu1 %vm341_vm3, %v5230_v15  ;;  %9414 = vmatprep.mubr.msk.f32.mxu1 %vm10320_vm2, %v10319_v58  ;;  %v8576_v15 = vld [vmem:[%s11771_s3 + $0x30] sm:$0xff] }
0x23f2   :  { %9417 = vmatprep.subr.mxu1 %v10319_v58 }
0x23f4   :  { %9415 = vmatmul.mubr.msk.f32.vlgmr.msra.gmra.mrb[64].mxu1 %vm341_vm3, %v5228_v4 }
0x23f5   :  { %9418 = vmatpush3.xpose.msk.msra.mxu1 %vm341_vm3, %v5308_v0  ;;  %9419 = vmatprep.mubr.msk.f32.mxu1 %vm10320_vm2, %v10319_v58 }
0x23f6   :  { %9427 = vmatprep.subr.mxu1 %v10319_v58 }
0x23f8   :  { %9420 = vmatmul.mubr.msk.f32.vlgmr.msra.gmra.mrb[66].mxu1 %vm341_vm3, %v5306_v19 }
0x23f9   :  { %9429 = vmatprep.mubr.msk.f32.mxu1 %vm10320_vm2, %v10319_v58 }
0x2417   :  { %v4893_v10 = vpop.xlane.xlu1 %4892 }
0x2418   :  { %v4897_v20 = vsub.f32 %v4889_v43, %v4893_v10 }
0x241a   :  { %v4899_v63 = vmul.f32 1.442695, %v4897_v20 }
0x241c   :  { %10217 = vpow2.f32 %v4899_v63 }
0x2426   :  { %v10218_v49 = vpop.eup %10217 }
0x2427   :  { %v4903_v23 = vsel %vm341_vm3, %v10218_v49, 0.0 }
0x2428   :  { %4904 = vadd.xlane.f32.xlu0 %v4903_v23 }
0x243e   :  { %4913 = vrot.lane.b32.xlu0 %v11146_v41, %s11783_s8  ;;  %s10333_s8 = smov [#allocation2]  }
0x2442   :  { %5485 = vrot.lane.b32.xlu0 %v11144_v53, %s11784_s22 }
0x2446   :  { %5646 = vrot.lane.b32.xlu0 %v11146_v41, %s11781_s26 }
0x244a   :  { %5724 = vrot.lane.b32.xlu0 %v11144_v53, %s11781_s26 }
0x244e   :  { %5644 = vrot.lane.b32.xlu0 %v11146_v41, %s11780_s2 }
0x24b5   :  { %v4905_v7 = vpop.xlane.xlu0 %4904 }
0x24b6   :  { %10219 = vrcp.f32 %v4905_v7 }
0x24b9   :  { %v4914_v25 = vpop.permute.xlu0 %4913 }
0x24ba   :  { %9393 = vmatpush3.msra.mxu0 %v4914_v25 }
0x24bb   :  { %9402 = vmatprep.subr.mxu0 %v8575_v44 }
0x24bd   :  { %v5486_v27 = vpop.permute.xlu0 %5485 }
0x24be   :  { %9428 = vmatpush3.msra.mxu1 %v5486_v27 }
0x24bf   :  { %9437 = vmatprep.subr.mxu1 %v10319_v58 }
0x24c0   :  { %v10220_v28 = vpop.eup %10219 }
0x24c1   :  { %v4911_v29 = vmul.f32 %v10220_v28, %v10218_v49  ;;  %v5647_v16 = vpop.permute.xlu0 %5646 }
0x24c3   :  { %9395 = vmatmul.mubr.msk.f32.vlgmr.msra.gmra.mrb[36].mxu0 %vm341_vm3, %v4911_v29  ;;  %v5061_v30 = vpop.f32.mrb[62].mxu1 }
0x24c4   :  { %v9401_v26 = vpop.f32.mrb[63].mxu1  ;;  %9403 = vmatpush3.msra.mxu0 %v8575_v44 }
0x24c5   :  { %9407 = vmatprep.subr.mxu0 %v8574_v45  ;;  %v5725_v4 = vpop.permute.xlu0 %5724 }
0x24c7   :  { %v5301_v11 = vpop.f32.mrb[64].mxu1 }
0x24c8   :  { %v5383_v31 = vmul.f32 0.35355338, %v5301_v11  ;;  %v9416_v39 = vpop.f32.mrb[65].mxu1 }
0x24c9   :  { %v5645_v19 = vpop.permute.xlu0 %5644 }
0x24ca   :  { %v5385_v32 = vadd.f32 %v11167_v57, %v5383_v31 }
0x24cb   :  { %v5379_v33 = vpop.f32.mrb[66].mxu1 }
0x24cc   :  { %v5384_v34 = vmul.f32 0.35355338, %v5379_v33  ;;  %v9421_v35 = vpop.f32.mrb[67].mxu1  ;;  %v5387_v36 = vsel %vm341_vm3, %v5385_v32, -inf }
0x24cd   :  { %5388 = vmax.xlane.f32.xlu1 %v5387_v36 }
0x24ce   :  { %v5386_v21 = vadd.f32 %v11174_v1, %v5384_v34 }
0x24d0   :  { %v5390_v40 = vsel %vm341_vm3, %v5386_v21, -inf }
0x24d1   :  { %5391 = vmax.xlane.f32.xlu1 %v5390_v40 }
0x255a   :  { %v5389_v61 = vpop.xlane.xlu1 %5388 }
0x255b   :  { %v5393_v46 = vsub.f32 %v5385_v32, %v5389_v61 }
0x255d   :  { %v5395_v47 = vmul.f32 1.442695, %v5393_v46 }
0x255e   :  { %v5392_v48 = vpop.xlane.xlu1 %5391 }
0x255f   :  { %10221 = vpow2.f32 %v5395_v47  ;;  %v5394_v51 = vsub.f32 %v5386_v21, %v5392_v48 }
0x2561   :  { %v5397_v52 = vmul.f32 1.442695, %v5394_v51 }
0x2563   :  { %10223 = vpow2.f32 %v5397_v52 }
0x2569   :  { %v10222_v59 = vpop.eup %10221 }
0x256a   :  { %v5399_v62 = vsel %vm341_vm3, %v10222_v59, 0.0 }
0x256b   :  { %5400 = vadd.xlane.f32.xlu1 %v5399_v62  ;;  %v8621_v62 = vld [vmem:[%s11700_s13 + $0x28] sm:$0xff] }
0x256d   :  { %v10224_v2 = vpop.eup %10223 }
0x256e   :  { %v5402_v60 = vsel %vm341_vm3, %v10224_v2, 0.0 }
0x256f   :  { %5403 = vadd.xlane.f32.xlu1 %v5402_v60 }
0x2580   :  { %5409 = vrot.lane.b32.xlu1 %v11146_v41, %s11784_s22  ;;  %s8459_s22 = sshll.u32 %s10333_s8, 4  ;;  %s8460_s22 = int_to_ptr.vmem [resolvable:$true] %s8459_s22 }
0x2581   :  { %s10295_s27 = scalar_lea.vmem %s8460_s22, 256  ;;  %p10300_p1 = scmp.lt.s32.totalorder %s8460_s22, %s8460_s22 }
0x2582   :  { %p10296_p0 = scmp.ne.s32.totalorder %s8460_s22, %s10295_s27  ;;  %p10301_p2 = scmp.lt.s32.totalorder %s10295_s27, %s10295_s27 }
0x2584   :  { %5722 = vrot.lane.b32.xlu1 %v11144_v53, %s11780_s2  ;;  %p10302_p3 = por %p10301_p2, %p10300_p1 }
0x2586   :  { %p10303_p4 = pnand %p10302_p3, %p10296_p0 }
0x2596   :  { %v4985_v14 = vpop.f32.mrb[36].mxu0 }
0x2597   :  { %v9396_v5 = vpop.f32.mrb[37].mxu0  ;;  %9404 = vmatprep.mubr.msk.f32.mxu0 %vm341_vm3, %v4985_v14 }
0x2598   :  { %9405 = vmatmul.mubr.msk.f32.vlgmr.msra.gmra.mrb[38].mxu0 %vm341_vm3, %v5061_v30  ;;  %v8622_v5 = vld [vmem:[%s11700_s13 + $0x30] sm:$0xff] }
0x2599   :  { %9409 = vmatprep.mubr.msk.f32.mxu0 %vm341_vm3, %v11212_v56  ;;  %9408 = vmatpush3.msra.mxu0 %v8574_v45 }
0x259a   :  { %9422 = vmatprep.subr.mxu0 %v10319_v58 }
0x25a0   :  { %9410 = vmatmul.mubr.msk.f32.vlgmr.msra.gmra.mrb[38].mxu0 %vm341_vm3, %v11214_v12 }
0x25a1   :  { %9424 = vmatprep.mubr.msk.f32.mxu0 %vm10320_vm2, %v10319_v58 }
0x25f8   :  { %v5401_v43 = vpop.xlane.xlu1 %5400 }
0x25f9   :  { %10225 = vrcp.f32 %v5401_v43  ;;  %v8623_v43 = vld [vmem:[%s11700_s13 + $0x38] sm:$0xff] }
0x25fc   :  { %v5404_v17 = vpop.xlane.xlu1 %5403 }
0x25fd   :  { %10227 = vrcp.f32 %v5404_v17  ;;  %v9828_v17 = vpack.c.bf16 %v8623_v43, %v8622_v5 }
0x2600   :  { %v5410_v6 = vpop.permute.xlu1 %5409 }
0x2601   :  { %9423 = vmatpush3.msra.mxu0 %v5410_v6 }
0x2602   :  { %9432 = vmatprep.subr.mxu0 %v8576_v15 }
0x2603   :  { %v10226_v56 = vpop.eup %10225 }
0x2604   :  { %v5407_v18 = vmul.f32 %v10226_v56, %v10222_v59  ;;  %v5723_v23 = vpop.permute.xlu1 %5722  ;;  %v8577_v59 = vld [vmem:[%s11771_s3 + $0x38] sm:$0xff] }
0x2606   :  { %9425 = vmatmul.mubr.msk.f32.vlgmr.msra.gmra.mrb[40].mxu0 %vm341_vm3, %v5407_v18 }
0x2607   :  { %v10228_v12 = vpop.eup %10227  ;;  %9433 = vmatpush3.msra.mxu0 %v8576_v15 }
0x2608   :  { %v5408_v0 = vmul.f32 %v10228_v12, %v10224_v2  ;;  %9442 = vmatprep.subr.mxu0 %v10319_v58 }
0x260a   :  { %9430 = vmatmul.mubr.msk.f32.vlgmr.msra.gmra.mrb[68].mxu1 %vm341_vm3, %v5408_v0 }
0x260b   :  { %9438 = vmatpush3.xpose.msk.msra.mxu1 %vm341_vm3, %v5647_v16  ;;  %9439 = vmatprep.mubr.msk.f32.mxu1 %vm10320_vm2, %v10319_v58 }
0x260c   :  { %9447 = vmatprep.subr.mxu1 %v10319_v58 }
0x260e   :  { %9440 = vmatmul.mubr.msk.f32.vlgmr.msra.gmra.mrb[70].mxu1 %vm341_vm3, %v5645_v19 }
0x260f   :  { %9449 = vmatprep.mubr.msk.f32.mxu1 %vm10320_vm2, %v10319_v58 }
0x26d9   :  { %v5481_v10 = vpop.f32.mrb[40].mxu0 }
0x26da   :  { %v9426_v20 = vpop.f32.mrb[41].mxu0  ;;  %9434 = vmatprep.mubr.msk.f32.mxu0 %vm341_vm3, %v5481_v10 }
0x26dd   :  { %v5557_v63 = vpop.f32.mrb[68].mxu1 }
0x26de   :  { %v9431_v49 = vpop.f32.mrb[69].mxu1  ;;  %9435 = vmatmul.mubr.msk.f32.vlgmr.msra.gmra.mrb[38].mxu0 %vm341_vm3, %v5557_v63 }
0x26df   :  { %9443 = vmatpush3.xpose.msk.msra.mxu0 %vm341_vm3, %v5725_v4  ;;  %9444 = vmatprep.mubr.msk.f32.mxu0 %vm10320_vm2, %v10319_v58 }
0x26e0   :  { %9452 = vmatprep.subr.mxu0 %v10319_v58 }
0x26e1   :  { %v5718_v7 = vpop.f32.mrb[70].mxu1 }
0x26e2   :  { %v5800_v25 = vmul.f32 0.35355338, %v5718_v7  ;;  %v9441_v27 = vpop.f32.mrb[71].mxu1  ;;  %9445 = vmatmul.mubr.msk.f32.vlgmr.msra.gmra.mrb[42].mxu0 %vm341_vm3, %v5723_v23 }
0x26e3   :  { %9454 = vmatprep.mubr.msk.f32.mxu0 %vm10320_vm2, %v10319_v58 }
0x26e4   :  { %v5802_v28 = vadd.f32 %v11167_v57, %v5800_v25 }
0x26e6   :  { %v5804_v29 = vsel %vm341_vm3, %v5802_v28, -inf }
0x26e7   :  { %5805 = vmax.xlane.f32.xlu0 %v5804_v29 }
0x2774   :  { %v5806_v30 = vpop.xlane.xlu0 %5805 }
0x2775   :  { %v5810_v26 = vsub.f32 %v5802_v28, %v5806_v30 }
0x2777   :  { %v5812_v11 = vmul.f32 1.442695, %v5810_v26 }
0x2779   :  { %10229 = vpow2.f32 %v5812_v11 }
0x2783   :  { %v10230_v31 = vpop.eup %10229 }
0x2784   :  { %v5816_v39 = vsel %vm341_vm3, %v10230_v31, 0.0 }
0x2785   :  { %5817 = vadd.xlane.f32.xlu0 %v5816_v39 }
0x27b5   :  { %v5796_v32 = vpop.f32.mrb[42].mxu0 }
0x27b6   :  { %v5801_v33 = vmul.f32 0.35355338, %v5796_v32  ;;  %v9446_v34 = vpop.f32.mrb[43].mxu0 }
0x27b8   :  { %v5803_v35 = vadd.f32 %v11174_v1, %v5801_v33 }
0x27ba   :  { %v5807_v36 = vsel %vm341_vm3, %v5803_v35, -inf }
0x27bb   :  { %5808 = vmax.xlane.f32.xlu1 %v5807_v36  ;;  %v8612_v36 = vld [vmem:[%s11698_s11 + $0x20] sm:$0xff] }
0x27cc   :  { %5902 = vrot.lane.b32.xlu1 %v11144_v53, %s11785_s6 }
0x2812   :  { %v5818_v1 = vpop.xlane.xlu0 %5817 }
0x2848   :  { %v5809_v57 = vpop.xlane.xlu1 %5808 }
0x2849   :  { %v5811_v21 = vsub.f32 %v5803_v35, %v5809_v57  ;;  %v8613_v57 = vld [vmem:[%s11698_s11 + $0x28] sm:$0xff] }
0x284b   :  { %v5814_v40 = vmul.f32 1.442695, %v5811_v21  ;;  %v9816_v21 = vpack.c.bf16 %v8613_v57, %v8612_v36 }
0x284c   :  { %v5903_v44 = vpop.permute.xlu1 %5902 }
0x284d   :  { %10231 = vpow2.f32 %v5814_v40  ;;  %9453 = vmatpush3.msra.mxu0 %v5903_v44  ;;  %v8614_v40 = vld [vmem:[%s11698_s11 + $0x30] sm:$0xff]  ;;  %v8615_v44 = vld [vmem:[%s11698_s11 + $0x38] sm:$0xff] }
0x284e   :  { %10233 = vrcp.f32 %v5818_v1  ;;  %9457 = vmatprep.subr.mxu0 %v8577_v59 }
0x2857   :  { %v10232_v45 = vpop.eup %10231 }
0x2858   :  { %v5819_v61 = vsel %vm341_vm3, %v10232_v45, 0.0  ;;  %v10234_v47 = vpop.eup %10233 }
0x2859   :  { %5820 = vadd.xlane.f32.xlu0 %v5819_v61  ;;  %v5824_v48 = vmul.f32 %v10234_v47, %v10230_v31 }
0x286f   :  { %5826 = vrot.lane.b32.xlu0 %v11146_v41, %s11785_s6  ;;  %v8620_v41 = vld [vmem:[%s11700_s13 + $0x20] sm:$0xff]  ;;  %s11788_s13 = sld [smem:[#allocation16_spill]] }
0x2870   :  { %v9824_v2 = vpack.c.bf16 %v8621_v62, %v8620_v41 }
0x28e6   :  { %v5821_v46 = vpop.xlane.xlu0 %5820 }
0x28e7   :  { %10235 = vrcp.f32 %v5821_v46 }
0x28ea   :  { %v5827_v53 = vpop.permute.xlu0 %5826 }
0x28eb   :  { %9448 = vmatpush3.msra.mxu1 %v5827_v53 }
0x28ec   :  { %9450 = vmatmul.mubr.msk.f32.vlgmr.msra.gmra.mrb[72].mxu1 %vm341_vm3, %v5824_v48  ;;  %9817 = vmatprep.subr.bf16.mxu1 %v9816_v21 }
0x28ed   :  { %9819 = vmatpush3.bf16.msra.mxu1 %v9816_v21 }
0x28f1   :  { %v10236_v51 = vpop.eup %10235 }
0x28f2   :  { %v5825_v52 = vmul.f32 %v10236_v51, %v10232_v45  ;;  %v9820_v45 = vpack.c.bf16 %v8615_v44, %v8614_v40  ;;  %v6102_v51 = vrot.slane %v11126_v37, %v10825_v50 }
0x28f4   :  { %9455 = vmatmul.mubr.msk.f32.vlgmr.msra.gmra.mrb[44].mxu0 %vm341_vm3, %v5825_v52  ;;  %9821 = vmatprep.subr.bf16.mxu1 %v9820_v45 }
0x28f5   :  { %9458 = vmatpush3.msra.mxu0 %v8577_v59  ;;  %9823 = vmatpush3.bf16.msra.mxu1 %v9820_v45 }
0x28f6   :  { %9825 = vmatprep.subr.bf16.mxu0 %v9824_v2  ;;  %9832 = vmatprep.subr.bf16.mxu1 %v10332_v54 }
0x29bf   :  { %v5898_v60 = vpop.f32.mrb[72].mxu1 }
0x29c0   :  { %v9451_v14 = vpop.f32.mrb[73].mxu1  ;;  %9459 = vmatprep.mubr.msk.f32.mxu0 %vm341_vm3, %v5898_v60 }
0x29c7   :  { %v5974_v15 = vpop.f32.mrb[44].mxu0 }
0x29c8   :  { %v9456_v6 = vpop.f32.mrb[45].mxu0  ;;  %9460 = vmatmul.mubr.msk.f32.vlgmr.msra.gmra.mrb[38].mxu0 %vm341_vm3, %v5974_v15 }
0x29c9   :  { %9827 = vmatpush3.bf16.msra.mxu0 %v9824_v2  ;;  %9481 = vmatprep.mubr.msk.f32.mxu0 %vm202_vm0, %v10755_v3  ;;  %v8611_v3 = vld [vmem:[%s11697_s10 + $0x1] ss:$0 sm:$0xff]  ;;  %v6108_v2 = vrot.slane %v11131_v38, %v10825_v50 }
0x29ca   :  { %9829 = vmatprep.subr.bf16.mxu0 %v9828_v17  ;;  %v8617_v50 = vld [vmem:[%s11699_s12 + $0x1] ss:$0 sm:$0xff] }
0x29cd   :  { %9831 = vmatpush3.bf16.msra.mxu0 %v9828_v17 }
0x29ce   :  { %9836 = vmatprep.subr.bf16.mxu0 %v10332_v54 }
0x29d0   :  { %9482 = vmatmul.mubr.msk.f32.vlgmr.msra.gmra.mrb[46].mxu0 %vm202_vm0, %v10761_v8 }
0x29d1   :  { %9484 = vmatprep.mubr.msk.f32.mxu0 %vm202_vm0, %v10764_v9 }
0x29d4   :  { %9485 = vmatmul.mubr.msk.f32.gmra.mrb[48].mxu0 %vm202_vm0, %v10771_v55  ;;  %v8625_v55 = vld [vmem:[%s11701_s14 + $0x1] ss:$0 sm:$0xff] }
0x29d5   :  { %9498 = vmatprep.mubr.msk.f32.mxu0 %vm10320_vm2, %v10319_v58 }
0x2a9b   :  { %v9461_v16 = vpop.f32.mrb[38].mxu0 }
0x2a9c   :  { %v6062_v56 = vadd.f32 %v9461_v16, %v11098_v13  ;;  %v6050_v18 = vpop.f32.mrb[39].mxu0 }
0x2a9d   :  { %v6061_v12 = vadd.f32 %v6050_v18, %v11100_v42 }
0x2a9e   :  { %v11348_v8 = vadd.f32 %v8611_v3, %v6062_v56 }
0x2a9f   :  { %v11350_v4 = vadd.f32 %v8611_v3, %v6061_v12 }
0x2aa0   :  { %v6076_v9 = vsel %vm202_vm0, %v11348_v8, 0.0 }
0x2aa1   :  { %6077 = vadd.xlane.f32.xlu0 %v6076_v9  ;;  %v6073_v0 = vsel %vm202_vm0, %v11350_v4, 0.0 }
0x2aa2   :  { %6074 = vadd.xlane.f32.xlu1 %v6073_v0 }
0x2aa3   :  { %v9483_v13 = vpop.f32.mrb[46].mxu0 }
0x2aa4   :  { %v6290_v19 = vadd.f32 %v9483_v13, %v8625_v55  ;;  %v6284_v10 = vpop.f32.mrb[47].mxu0 }
0x2aa5   :  { %v6285_v42 = vadd.f32 %v8625_v55, %v6284_v10 }
0x2aa7   :  { %v9486_v20 = vpop.f32.mrb[48].mxu0  ;;  %v9833_v63 = vpack.c.bf16 %v6290_v19, %v6285_v42  ;;  %v11359_v49 = vpack.i.bf16 %v6290_v19, %v6285_v42 }
0x2aa8   :  { %v6300_v23 = vadd.f32 %v9486_v20, %v8625_v55  ;;  %v6294_v7 = vpop.f32.mrb[49].mxu0 }
0x2aa9   :  { %v6295_v25 = vadd.f32 %v8625_v55, %v6294_v7 }
0x2aab   :  { %v9837_v27 = vpack.c.bf16 %v6300_v23, %v6295_v25  ;;  %v11361_v28 = vpack.i.bf16 %v6300_v23, %v6295_v25 }
0x2aad   :  { %9839 = vmatpush3.bf16.xpose.msk.msra.mxu0 %vm10798_vm4, %v9837_v27 }
0x2aae   :  { %9846 = vmatprep.subr.bf16.mxu0 %v10332_v54 }
0x2b2e   :  { %v6078_v29 = vpop.xlane.xlu0 %6077 }
0x2b2f   :  { %v6080_v30 = vmul.f32 0.03125, %v6078_v29  ;;  %v6075_v26 = vpop.xlane.xlu1 %6074 }
0x2b30   :  { %v6079_v11 = vmul.f32 0.03125, %v6075_v26 }
0x2b31   :  { %v6082_v31 = vsub.f32 %v11348_v8, %v6080_v30 }
0x2b32   :  { %v6081_v39 = vsub.f32 %v11350_v4, %v6079_v11 }
0x2b33   :  { %v6084_v32 = vmul.f32 %v6082_v31, %v6082_v31 }
0x2b34   :  { %v6083_v33 = vmul.f32 %v6081_v39, %v6081_v39 }
0x2b35   :  { %v6088_v34 = vsel %vm202_vm0, %v6084_v32, 0.0 }
0x2b36   :  { %6089 = vadd.xlane.f32.xlu1 %v6088_v34  ;;  %v6085_v35 = vsel %vm202_vm0, %v6083_v33, 0.0 }
0x2b37   :  { %6086 = vadd.xlane.f32.xlu0 %v6085_v35 }
0x2bc3   :  { %v6090_v61 = vpop.xlane.xlu1 %6089 }
0x2bc4   :  { %v6092_v1 = vmul.f32 0.03125, %v6090_v61  ;;  %v6087_v46 = vpop.xlane.xlu0 %6086 }
0x2bc5   :  { %v6091_v47 = vmul.f32 0.03125, %v6087_v46 }
0x2bc6   :  { %v6094_v48 = vadd.f32 1e-05, %v6092_v1 }
0x2bc7   :  { %v6093_v53 = vadd.f32 1e-05, %v6091_v47 }
0x2bc8   :  { %10237 = vrsqrt.f32 %v6094_v48 }
0x2bc9   :  { %10239 = vrsqrt.f32 %v6093_v53 }
0x2bd2   :  { %v10238_v52 = vpop.eup %10237 }
0x2bd3   :  { %v10240_v59 = vpop.eup %10239  ;;  %v6098_v41 = vmul.f32 %v10238_v52, %v6082_v31 }
0x2bd4   :  { %v6097_v62 = vmul.f32 %v10240_v59, %v6081_v39 }
0x2bd5   :  { %v6104_v60 = vmul.f32 %v6102_v51, %v6098_v41 }
0x2bd6   :  { %v6103_v14 = vmul.f32 %v6102_v51, %v6097_v62 }
0x2bd7   :  { %v6110_v43 = vadd.f32 %v6108_v2, %v6104_v60 }
0x2bd8   :  { %v6109_v5 = vadd.f32 %v6108_v2, %v6103_v14 }
0x2bda   :  { %9470 = vmatprep.mubr.msk.f32.mxu1 %vm202_vm0, %v6109_v5 }
0x2bdb   :  { %9471 = vmatmul.mubr.msk.f32.vlgmr.msra.gmra.mrb[74].mxu1 %vm202_vm0, %v6110_v43 }
0x2bdc   :  { %9835 = vmatpush3.bf16.xpose.msk.msra.mxu1 %vm10798_vm4, %v9833_v63  ;;  %9491 = vmatprep.mubr.msk.f32.mxu1 %vm10320_vm2, %v10319_v58 }
0x2bdd   :  { %9840 = vmatprep.subr.bf16.mxu1 %v10332_v54 }
0x2cae   :  { %v9472_v37 = vpop.f32.mrb[74].mxu1 }
0x2caf   :  { %v11397_v38 = vadd.f32 %v9472_v37, %v8617_v50  ;;  %v6196_v17 = vpop.f32.mrb[75].mxu1 }
0x2cb0   :  { %v11399_v15 = vadd.f32 %v8617_v50, %v6196_v17 }
0x2cb1   :  { %9499 = vmatmul.mubr.msk.f32.vlgmr.msra.gmra.mrb[50].mxu0 %vm341_vm3, %v11397_v38 }
0x2cb2   :  { %9492 = vmatmul.mubr.msk.f32.vlgmr.msra.gmra.mrb[76].mxu1 %vm341_vm3, %v11399_v15  ;;  %9519 = vmatprep.mubr.msk.f32.mxu0 %vm10320_vm2, %v10319_v58 }
0x2cb3   :  { %9505 = vmatprep.mubr.msk.f32.mxu1 %vm10320_vm2, %v10319_v58 }
0x2d84   :  { %v6462_v6 = vpop.f32.mrb[50].mxu0 }
0x2d85   :  { %v6467_v16 = vmul.f32 0.35355338, %v6462_v6  ;;  %v6383_v3 = vpop.f32.mrb[76].mxu1  ;;  %v9500_v56 = vpop.f32.mrb[51].mxu0 }
0x2d86   :  { %v6466_v18 = vmul.f32 0.35355338, %v6383_v3  ;;  %v9493_v12 = vpop.f32.mrb[77].mxu1 }
0x2d87   :  { %v6471_v9 = vsel %vm2414_vm5, %v6467_v16, -inf }
0x2d88   :  { %6472 = vmax.xlane.f32.xlu1 %v6471_v9  ;;  %v6468_v55 = vsel %vm2414_vm5, %v6466_v18, -inf }
0x2d89   :  { %6469 = vmax.xlane.f32.xlu0 %v6468_v55 }
0x2e15   :  { %v6473_v0 = vpop.xlane.xlu1 %6472 }
0x2e16   :  { %v6475_v13 = vsub.f32 %v6467_v16, %v6473_v0  ;;  %v6470_v19 = vpop.xlane.xlu0 %6469 }
0x2e17   :  { %v6474_v10 = vsub.f32 %v6466_v18, %v6470_v19 }
0x2e18   :  { %v6478_v42 = vmul.f32 1.442695, %v6475_v13 }
0x2e19   :  { %v6476_v20 = vmul.f32 1.442695, %v6474_v10 }
0x2e1a   :  { %10241 = vpow2.f32 %v6478_v42 }
0x2e1b   :  { %10243 = vpow2.f32 %v6476_v20 }
0x2e24   :  { %v10242_v63 = vpop.eup %10241 }
0x2e25   :  { %v10244_v23 = vpop.eup %10243  ;;  %v6483_v7 = vsel %vm2414_vm5, %v10242_v63, 0.0 }
0x2e26   :  { %6484 = vadd.xlane.f32.xlu1 %v6483_v7  ;;  %v6480_v25 = vsel %vm2414_vm5, %v10244_v23, 0.0 }
0x2e27   :  { %6481 = vadd.xlane.f32.xlu0 %v6480_v25 }
0x2e37   :  { %10053 = vrot.lane.b32.xlu1 %v11361_v28, %s11775_s7 }
0x2e3b   :  { %10058 = vrot.lane.b32.xlu1 %v11359_v49, %s11776_s9 }
0x2e3d   :  { %10048 = vrot.lane.b32.xlu0 %v11359_v49, %s11775_s7 }
0x2e3f   :  { %10063 = vrot.lane.b32.xlu1 %v11361_v28, %s11776_s9 }
0x2e41   :  { %6648 = vrot.lane.b32.xlu0 %v11399_v15, %s11776_s9 }
0x2e43   :  { %6730 = vrot.lane.b32.xlu1 %v11397_v38, %s11776_s9  ;;  %s11787_s9 = sld [smem:[#allocation18_spill]] }
0x2eb3   :  { %v6485_v27 = vpop.xlane.xlu1 %6484 }
0x2eb4   :  { %v6482_v29 = vpop.xlane.xlu0 %6481 }
0x2eb5   :  { %10245 = vrcp.f32 %v6482_v29 }
0x2eb6   :  { %10247 = vrcp.f32 %v6485_v27 }
0x2eb7   :  { %v10054_v30 = vpop.permute.xlu1 %10053 }
0x2eb8   :  { %v10049_v26 = vpop.permute.xlu0 %10048  ;;  %v10056_v35 = vunpack.i.h.bf16 %v10054_v30  ;;  %v10055_v36 = vunpack.i.l.bf16 %v10054_v30 }
0x2eb9   :  { %v10051_v11 = vunpack.i.h.bf16 %v10049_v26  ;;  %v10050_v31 = vunpack.i.l.bf16 %v10049_v26 }
0x2eba   :  { %v9844_v45 = vpack.c.bf16 %v10056_v35, %v10055_v36 }
0x2ebb   :  { %v9841_v39 = vpack.c.bf16 %v10051_v11, %v10050_v31  ;;  %v10059_v32 = vpop.permute.xlu1 %10058  ;;  %v8631_v11 = vld [vmem:[%s11702_s15 + $0x28] sm:$0xff] }
0x2ebc   :  { %v10061_v33 = vunpack.i.h.bf16 %v10059_v32  ;;  %v10060_v34 = vunpack.i.l.bf16 %v10059_v32  ;;  %v6649_v46 = vpop.permute.xlu0 %6648 }
0x2ebd   :  { %9842 = vmatpush3.bf16.msra.mxu1 %v9841_v39 }
0x2ebe   :  { %v9847_v57 = vpack.c.bf16 %v10061_v33, %v10060_v34  ;;  %9843 = vmatprep.subr.bf16.mxu1 %v10332_v54 }
0x2ebf   :  { %v10246_v21 = vpop.eup %10245  ;;  %v10064_v61 = vpop.permute.xlu1 %10063 }
0x2ec0   :  { %v6488_v40 = vmul.f32 %v10246_v21, %v10244_v23  ;;  %9849 = vmatpush3.bf16.xpose.msk.msra.mxu0 %vm10798_vm4, %v9847_v57  ;;  %v10248_v44 = vpop.eup %10247  ;;  %v10066_v47 = vunpack.i.h.bf16 %v10064_v61  ;;  %v10065_v48 = vunpack.i.l.bf16 %v10064_v61  ;;  %v8630_v57 = vld [vmem:[%s11702_s15 + $0x20] sm:$0xff] }
0x2ec1   :  { %9854 = vmatprep.subr.bf16.mxu0 %v10332_v54  ;;  %v6489_v1 = vmul.f32 %v10248_v44, %v10242_v63 }
0x2ec2   :  { %9506 = vmatmul.mubr.msk.f32.vlgmr.msra.gmra.mrb[78].mxu1 %vm2414_vm5, %v6488_v40  ;;  %v9851_v53 = vpack.c.bf16 %v10066_v47, %v10065_v48 }
0x2ec3   :  { %9845 = vmatpush3.bf16.msra.mxu1 %v9844_v45  ;;  %9512 = vmatprep.mubr.msk.f32.mxu1 %vm10320_vm2, %v10319_v58  ;;  %v6731_v51 = vpop.permute.xlu1 %6730 }
0x2ec4   :  { %9850 = vmatprep.subr.bf16.mxu1 %v10332_v54 }
0x2ec6   :  { %9513 = vmatmul.mubr.msk.f32.vlgmr.msra.gmra.mrb[80].mxu1 %vm2414_vm5, %v6489_v1 }
0x2ec7   :  { %9520 = vmatmul.mubr.msk.f32.vlgmr.msra.gmra.mrb[52].mxu0 %vm341_vm3, %v6649_v46  ;;  %9526 = vmatprep.mubr.msk.f32.mxu1 %vm10320_vm2, %v10319_v58 }
0x2ec8   :  { %9533 = vmatprep.mubr.msk.f32.mxu0 %vm10320_vm2, %v10319_v58 }
0x2ecc   :  { %9853 = vmatpush3.bf16.xpose.msk.msra.mxu1 %vm10798_vm4, %v9851_v53 }
0x2ecd   :  { %9857 = vmatprep.subr.bf16.mxu1 %v10332_v54 }
0x2ed3   :  { %9527 = vmatmul.mubr.msk.f32.vlgmr.msra.gmra.mrb[82].mxu1 %vm341_vm3, %v6731_v51 }
0x2ed4   :  { %9540 = vmatprep.mubr.msk.f32.mxu1 %vm10320_vm2, %v10319_v58 }
0x2f95   :  { %v11445_v52 = vpop.f32.mrb[78].mxu1 }
0x2f96   :  { %v9507_v59 = vpop.f32.mrb[79].mxu1 }
0x2f99   :  { %v11447_v41 = vpop.f32.mrb[80].mxu1 }
0x2f9a   :  { %v9514_v62 = vpop.f32.mrb[81].mxu1  ;;  %v6726_v2 = vpop.f32.mrb[52].mxu0 }
0x2f9b   :  { %v6812_v60 = vmul.f32 0.35355338, %v6726_v2  ;;  %v9521_v14 = vpop.f32.mrb[53].mxu0 }
0x2f9d   :  { %v6814_v5 = vsel %vm2414_vm5, %v6812_v60, -inf }
0x2f9e   :  { %6815 = vmax.xlane.f32.xlu0 %v6814_v5 }
0x2fa6   :  { %v6808_v43 = vpop.f32.mrb[82].mxu1 }
0x2fa7   :  { %v6813_v50 = vmul.f32 0.35355338, %v6808_v43  ;;  %v9528_v37 = vpop.f32.mrb[83].mxu1 }
0x2fa9   :  { %v6817_v17 = vsel %vm2414_vm5, %v6813_v50, -inf }
0x2faa   :  { %6818 = vmax.xlane.f32.xlu1 %v6817_v17 }
0x2fbb   :  { %10073 = vrot.lane.b32.xlu1 %v11361_v28, %s11777_s0 }
0x2fbf   :  { %10078 = vrot.lane.b32.xlu1 %v11359_v49, %s11778_s1 }
0x2fc3   :  { %10083 = vrot.lane.b32.xlu1 %v11361_v28, %s11778_s1 }
0x2fc7   :  { %7238 = vrot.lane.b32.xlu1 %v11397_v38, %s11778_s1 }
0x302b   :  { %v6816_v6 = vpop.xlane.xlu0 %6815 }
0x302c   :  { %v6820_v16 = vsub.f32 %v6812_v60, %v6816_v6 }
0x302e   :  { %v6822_v3 = vmul.f32 1.442695, %v6820_v16 }
0x3030   :  { %10249 = vpow2.f32 %v6822_v3 }
0x3037   :  { %v6819_v56 = vpop.xlane.xlu1 %6818 }
0x3038   :  { %v6821_v18 = vsub.f32 %v6813_v50, %v6819_v56 }
0x303a   :  { %v10250_v12 = vpop.eup %10249  ;;  %v6824_v9 = vmul.f32 1.442695, %v6821_v18  ;;  %v8632_v18 = vld [vmem:[%s11702_s15 + $0x30] sm:$0xff] }
0x303b   :  { %v10074_v55 = vpop.permute.xlu1 %10073  ;;  %v6826_v0 = vsel %vm2414_vm5, %v10250_v12, 0.0 }
0x303c   :  { %10251 = vpow2.f32 %v6824_v9  ;;  %v10076_v13 = vunpack.i.h.bf16 %v10074_v55  ;;  %v10075_v19 = vunpack.i.l.bf16 %v10074_v55  ;;  %6827 = vadd.xlane.f32.xlu0 %v6826_v0 }
0x303e   :  { %v9858_v10 = vpack.c.bf16 %v10076_v13, %v10075_v19 }
0x303f   :  { %v10079_v29 = vpop.permute.xlu1 %10078 }
0x3040   :  { %9859 = vmatpush3.bf16.msra.mxu1 %v9858_v10  ;;  %v10081_v31 = vunpack.i.h.bf16 %v10079_v29  ;;  %v10080_v39 = vunpack.i.l.bf16 %v10079_v29 }
0x3041   :  { %9860 = vmatprep.subr.bf16.mxu1 %v10332_v54 }
0x3042   :  { %v9861_v35 = vpack.c.bf16 %v10081_v31, %v10080_v39 }
0x3043   :  { %v10084_v45 = vpop.permute.xlu1 %10083 }
0x3044   :  { %v10086_v1 = vunpack.i.h.bf16 %v10084_v45  ;;  %v10085_v46 = vunpack.i.l.bf16 %v10084_v45 }
0x3046   :  { %v10252_v42 = vpop.eup %10251  ;;  %v9865_v47 = vpack.c.bf16 %v10086_v1, %v10085_v46 }
0x3047   :  { %v6829_v20 = vsel %vm2414_vm5, %v10252_v42, 0.0 }
0x3048   :  { %6830 = vadd.xlane.f32.xlu0 %v6829_v20 }
0x305e   :  { %10068 = vrot.lane.b32.xlu0 %v11359_v49, %s11777_s0 }
0x3062   :  { %7156 = vrot.lane.b32.xlu0 %v11399_v15, %s11778_s1 }
0x30c9   :  { %v6828_v63 = vpop.xlane.xlu0 %6827 }
0x30ca   :  { %10253 = vrcp.f32 %v6828_v63 }
0x30d4   :  { %v10254_v30 = vpop.eup %10253 }
0x30d5   :  { %v6831_v23 = vpop.xlane.xlu0 %6830  ;;  %v6834_v32 = vmul.f32 %v10254_v30, %v10250_v12 }
0x30d6   :  { %10255 = vrcp.f32 %v6831_v23 }
0x30d9   :  { %v10069_v7 = vpop.permute.xlu0 %10068 }
0x30da   :  { %v10071_v25 = vunpack.i.h.bf16 %v10069_v7  ;;  %v10070_v27 = vunpack.i.l.bf16 %v10069_v7 }
0x30dc   :  { %v9855_v26 = vpack.c.bf16 %v10071_v25, %v10070_v27 }
0x30dd   :  { %v7157_v36 = vpop.permute.xlu0 %7156 }
0x30de   :  { %9856 = vmatpush3.bf16.msra.mxu0 %v9855_v26 }
0x30df   :  { %9543 = vmatprep.subr.mxu0 %v8631_v11 }
0x30e0   :  { %v10256_v33 = vpop.eup %10255 }
0x30e1   :  { %v6835_v34 = vmul.f32 %v10256_v33, %v10252_v42  ;;  %9534 = vmatmul.mubr.msk.f32.vlgmr.msra.gmra.mrb[54].mxu0 %vm2414_vm5, %v6834_v32 }
0x30e2   :  { %9544 = vmatpush3.msra.mxu0 %v8631_v11 }
0x30e3   :  { %9541 = vmatmul.mubr.msk.f32.vlgmr.msra.gmra.mrb[84].mxu1 %vm2414_vm5, %v6835_v34  ;;  %9548 = vmatprep.subr.mxu0 %v8630_v57 }
0x30e4   :  { %9863 = vmatpush3.bf16.xpose.msk.msra.mxu1 %vm10798_vm4, %v9861_v35  ;;  %9557 = vmatprep.mubr.msk.f32.mxu1 %vm10320_vm2, %v10319_v58 }
0x30e5   :  { %9868 = vmatprep.subr.bf16.mxu1 %v10332_v54 }
0x30eb   :  { %9558 = vmatmul.mubr.msk.f32.vlgmr.msra.gmra.mrb[86].mxu1 %vm341_vm3, %v7157_v36 }
0x30ec   :  { %9571 = vmatprep.mubr.msk.f32.mxu1 %vm10320_vm2, %v10319_v58 }
0x31b4   :  { %v6911_v21 = vpop.f32.mrb[54].mxu0 }
0x31b5   :  { %v9535_v40 = vpop.f32.mrb[55].mxu0  ;;  %9545 = vmatprep.mubr.msk.f32.mxu0 %vm341_vm3, %v6911_v21 }
0x31b6   :  { %v6990_v44 = vpop.f32.mrb[84].mxu1 }
0x31b7   :  { %v9542_v61 = vpop.f32.mrb[85].mxu1  ;;  %9546 = vmatmul.mubr.msk.f32.vlgmr.msra.gmra.mrb[56].mxu0 %vm341_vm3, %v6990_v44 }
0x31b8   :  { %9549 = vmatpush3.msra.mxu0 %v8630_v57  ;;  %9550 = vmatprep.mubr.msk.f32.mxu0 %vm341_vm3, %v11445_v52  ;;  %v7239_v52 = vpop.permute.xlu1 %7238 }
0x31b9   :  { %9864 = vmatprep.subr.bf16.mxu0 %v10332_v54 }
0x31be   :  { %v7234_v48 = vpop.f32.mrb[86].mxu1 }
0x31bf   :  { %v7320_v53 = vmul.f32 0.35355338, %v7234_v48  ;;  %v9559_v51 = vpop.f32.mrb[87].mxu1  ;;  %9551 = vmatmul.mubr.msk.f32.vlgmr.msra.gmra.mrb[56].mxu0 %vm341_vm3, %v11447_v41 }
0x31c0   :  { %9867 = vmatpush3.bf16.xpose.msk.msra.mxu0 %vm10798_vm4, %v9865_v47  ;;  %9564 = vmatprep.mubr.msk.f32.mxu0 %vm10320_vm2, %v10319_v58 }
0x31c1   :  { %v7322_v59 = vsel %vm2414_vm5, %v7320_v53, -inf  ;;  %9581 = vmatprep.subr.mxu0 %v8632_v18 }
0x31c2   :  { %7323 = vmax.xlane.f32.xlu0 %v7322_v59 }
0x31c7   :  { %9565 = vmatmul.mubr.msk.f32.vlgmr.msra.gmra.mrb[58].mxu0 %vm341_vm3, %v7239_v52 }
0x31c8   :  { %9582 = vmatpush3.msra.mxu0 %v8632_v18 }
0x31c9   :  { %9878 = vmatprep.subr.bf16.mxu0 %v10332_v54 }
0x324f   :  { %v7324_v62 = vpop.xlane.xlu0 %7323 }
0x3250   :  { %v7328_v2 = vsub.f32 %v7320_v53, %v7324_v62 }
0x3252   :  { %v7330_v60 = vmul.f32 1.442695, %v7328_v2 }
0x3254   :  { %10257 = vpow2.f32 %v7330_v60 }
0x325e   :  { %v10258_v14 = vpop.eup %10257 }
0x325f   :  { %v7334_v5 = vsel %vm2414_vm5, %v10258_v14, 0.0 }
0x3260   :  { %7335 = vadd.xlane.f32.xlu0 %v7334_v5 }
0x329a   :  { %v7316_v41 = vpop.f32.mrb[58].mxu0 }
0x329b   :  { %v7321_v43 = vmul.f32 0.35355338, %v7316_v41  ;;  %v9566_v50 = vpop.f32.mrb[59].mxu0 }
0x329d   :  { %v7325_v37 = vsel %vm2414_vm5, %v7321_v43, -inf }
0x329e   :  { %7326 = vmax.xlane.f32.xlu1 %v7325_v37 }
0x32af   :  { %10093 = vrot.lane.b32.xlu1 %v11361_v28, %s11779_s28 }
0x32b3   :  { %10098 = vrot.lane.b32.xlu1 %v11359_v49, %s11780_s2 }
0x32b7   :  { %10103 = vrot.lane.b32.xlu1 %v11361_v28, %s11780_s2 }
0x32bb   :  { %7667 = vrot.lane.b32.xlu1 %v11397_v38, %s11780_s2 }
0x32ed   :  { %v7336_v38 = vpop.xlane.xlu0 %7335 }
0x332b   :  { %v7327_v17 = vpop.xlane.xlu1 %7326 }
0x332c   :  { %v7329_v6 = vsub.f32 %v7321_v43, %v7327_v17 }
0x332e   :  { %v7332_v16 = vmul.f32 1.442695, %v7329_v6 }
0x332f   :  { %v10094_v9 = vpop.permute.xlu1 %10093 }
0x3330   :  { %10259 = vpow2.f32 %v7332_v16  ;;  %v10096_v10 = vunpack.i.h.bf16 %v10094_v9  ;;  %v10095_v42 = vunpack.i.l.bf16 %v10094_v9 }
0x3331   :  { %10261 = vrcp.f32 %v7336_v38 }
0x3332   :  { %v9872_v23 = vpack.c.bf16 %v10096_v10, %v10095_v42 }
0x3333   :  { %v10099_v7 = vpop.permute.xlu1 %10098 }
0x3334   :  { %v10101_v27 = vunpack.i.h.bf16 %v10099_v7  ;;  %v10100_v29 = vunpack.i.l.bf16 %v10099_v7 }
0x3336   :  { %v9875_v30 = vpack.c.bf16 %v10101_v27, %v10100_v29 }
0x3337   :  { %v10104_v11 = vpop.permute.xlu1 %10103 }
0x3338   :  { %v10106_v31 = vunpack.i.h.bf16 %v10104_v11  ;;  %v10105_v39 = vunpack.i.l.bf16 %v10104_v11 }
0x333a   :  { %v10260_v3 = vpop.eup %10259  ;;  %v9879_v34 = vpack.c.bf16 %v10106_v31, %v10105_v39  ;;  %v8676_v39 = vld [vmem:[%s11704_s17 + $0x20] sm:$0xff] }
0x333b   :  { %v7337_v56 = vsel %vm2414_vm5, %v10260_v3, 0.0  ;;  %v10262_v19 = vpop.eup %10261  ;;  %v7668_v57 = vpop.permute.xlu1 %7667 }
0x333c   :  { %7338 = vadd.xlane.f32.xlu0 %v7337_v56  ;;  %v7342_v20 = vmul.f32 %v10262_v19, %v10258_v14 }
0x3352   :  { %10088 = vrot.lane.b32.xlu0 %v11359_v49, %s11779_s28 }
0x3356   :  { %7585 = vrot.lane.b32.xlu0 %v11399_v15, %s11780_s2 }
0x33c9   :  { %v7339_v12 = vpop.xlane.xlu0 %7338 }
0x33ca   :  { %10263 = vrcp.f32 %v7339_v12 }
0x33cd   :  { %v10089_v55 = vpop.permute.xlu0 %10088 }
0x33ce   :  { %v10091_v0 = vunpack.i.h.bf16 %v10089_v55  ;;  %v10090_v13 = vunpack.i.l.bf16 %v10089_v55 }
0x33d0   :  { %v9869_v15 = vpack.c.bf16 %v10091_v0, %v10090_v13  ;;  %v8675_v13 = vld [vmem:[%s11786_s29 + $0x1] ss:$0 sm:$0xff] }
0x33d1   :  { %v7586_v26 = vpop.permute.xlu0 %7585 }
0x33d2   :  { %9870 = vmatpush3.bf16.msra.mxu1 %v9869_v15 }
0x33d3   :  { %9871 = vmatprep.subr.bf16.mxu1 %v10332_v54 }
0x33d4   :  { %v10264_v63 = vpop.eup %10263 }
0x33d5   :  { %9572 = vmatmul.mubr.msk.f32.vlgmr.msra.gmra.mrb[88].mxu1 %vm2414_vm5, %v7342_v20  ;;  %v7343_v25 = vmul.f32 %v10264_v63, %v10260_v3 }
0x33d6   :  { %9873 = vmatpush3.bf16.msra.mxu1 %v9872_v23  ;;  %9578 = vmatprep.mubr.msk.f32.mxu1 %vm10320_vm2, %v10319_v58 }
0x33d7   :  { %9874 = vmatprep.subr.bf16.mxu1 %v10332_v54 }
0x33d9   :  { %9579 = vmatmul.mubr.msk.f32.vlgmr.msra.gmra.mrb[90].mxu1 %vm2414_vm5, %v7343_v25 }
0x33da   :  { %9590 = vmatprep.mubr.msk.f32.mxu1 %vm10320_vm2, %v10319_v58 }
0x33df   :  { %9877 = vmatpush3.bf16.xpose.msk.msra.mxu1 %vm10798_vm4, %v9875_v30 }
0x33e0   :  { %9882 = vmatprep.subr.bf16.mxu1 %v10332_v54 }
0x33e6   :  { %9591 = vmatmul.mubr.msk.f32.vlgmr.msra.gmra.mrb[92].mxu1 %vm341_vm3, %v7586_v26 }
0x33e7   :  { %9604 = vmatprep.mubr.msk.f32.mxu1 %vm10320_vm2, %v10319_v58 }
0x34a8   :  { %v7419_v32 = vpop.f32.mrb[88].mxu1 }
0x34a9   :  { %v9573_v33 = vpop.f32.mrb[89].mxu1  ;;  %9583 = vmatprep.mubr.msk.f32.mxu0 %vm341_vm3, %v7419_v32  ;;  %v8677_v32 = vld [vmem:[%s11704_s17 + $0x28] sm:$0xff] }
0x34aa   :  { %v9888_v33 = vpack.c.bf16 %v8677_v32, %v8676_v39 }
0x34ac   :  { %v7498_v35 = vpop.f32.mrb[90].mxu1 }
0x34ad   :  { %v9580_v36 = vpop.f32.mrb[91].mxu1  ;;  %9584 = vmatmul.mubr.msk.f32.vlgmr.msra.gmra.mrb[56].mxu0 %vm341_vm3, %v7498_v35  ;;  %v8679_v35 = vld [vmem:[%s11704_s17 + $0x38] sm:$0xff] }
0x34ae   :  { %9881 = vmatpush3.bf16.xpose.msk.msra.mxu0 %vm10798_vm4, %v9879_v34  ;;  %9597 = vmatprep.mubr.msk.f32.mxu0 %vm10320_vm2, %v10319_v58  ;;  %v8678_v34 = vld [vmem:[%s11704_s17 + $0x30] sm:$0xff] }
0x34af   :  { %9885 = vmatprep.subr.bf16.mxu0 %v10332_v54  ;;  %v9892_v36 = vpack.c.bf16 %v8679_v35, %v8678_v34 }
0x34b5   :  { %9598 = vmatmul.mubr.msk.f32.vlgmr.msra.gmra.mrb[60].mxu0 %vm341_vm3, %v7668_v57 }
0x34b6   :  { %9611 = vmatprep.mubr.msk.f32.mxu0 %vm10320_vm2, %v10319_v58 }
0x34b9   :  { %v7663_v21 = vpop.f32.mrb[92].mxu1 }
0x34ba   :  { %v7749_v40 = vmul.f32 0.35355338, %v7663_v21  ;;  %v9592_v44 = vpop.f32.mrb[93].mxu1 }
0x34bc   :  { %v7751_v45 = vsel %vm2414_vm5, %v7749_v40, -inf }
0x34bd   :  { %7752 = vmax.xlane.f32.xlu0 %v7751_v45 }
0x354a   :  { %v7753_v61 = vpop.xlane.xlu0 %7752 }
0x354b   :  { %v7757_v24 = vsub.f32 %v7749_v40, %v7753_v61 }
0x354d   :  { %v7759_v1 = vmul.f32 1.442695, %v7757_v24  ;;  %v10293_v24 = vld [vmem:[%s11767_s4 + $0x4] sm:$0x7] }
0x354f   :  { %10265 = vpow2.f32 %v7759_v1  ;;  %v8055_v1 = vrot.slane %v10293_v24, %v11027_v22 }
0x3559   :  { %v10266_v46 = vpop.eup %10265 }
0x355a   :  { %v7763_v47 = vsel %vm2414_vm5, %v10266_v46, 0.0 }
0x355b   :  { %7764 = vadd.xlane.f32.xlu0 %v7763_v47 }
0x3588   :  { %v7745_v54 = vpop.f32.mrb[60].mxu0 }
0x3589   :  { %v7750_v48 = vmul.f32 0.35355338, %v7745_v54  ;;  %v9599_v53 = vpop.f32.mrb[61].mxu0 }
0x358a   :  { %v10294_v53 = vld [vmem:[%s11768_s5 + $0x4] sm:$0x7] }
0x358b   :  { %v7754_v51 = vsel %vm2414_vm5, %v7750_v48, -inf }
0x358c   :  { %7755 = vmax.xlane.f32.xlu1 %v7754_v51  ;;  %v8061_v51 = vrot.slane %v10294_v53, %v11027_v22  ;;  %v8686_v22 = vld [vmem:[%s11706_s19 + $0x90] sm:$0xff] }
0x359d   :  { %10113 = vrot.lane.b32.xlu1 %v11361_v28, %s11781_s26  ;;  %v8633_v28 = vld [vmem:[%s11702_s15 + $0x38] sm:$0xff] }
0x35e8   :  { %v7765_v43 = vpop.xlane.xlu0 %7764 }
0x3619   :  { %v7756_v58 = vpop.xlane.xlu1 %7755 }
0x361a   :  { %v7758_v59 = vsub.f32 %v7750_v48, %v7756_v58 }
0x361c   :  { %v7761_v52 = vmul.f32 1.442695, %v7758_v59 }
0x361d   :  { %v10114_v62 = vpop.permute.xlu1 %10113 }
0x361e   :  { %10267 = vpow2.f32 %v7761_v52  ;;  %v10116_v2 = vunpack.i.h.bf16 %v10114_v62  ;;  %v10115_v60 = vunpack.i.l.bf16 %v10114_v62 }
0x361f   :  { %10269 = vrcp.f32 %v7765_v43  ;;  %v8689_v43 = vld [vmem:[%s11706_s19 + $0xa8] sm:$0xff] }
0x3620   :  { %v9886_v14 = vpack.c.bf16 %v10116_v2, %v10115_v60  ;;  %v8684_v2 = vld [vmem:[%s11706_s19 + $0x80] sm:$0xff]  ;;  %v8685_v60 = vld [vmem:[%s11706_s19 + $0x88] sm:$0xff] }
0x3622   :  { %9887 = vmatpush3.bf16.msra.mxu0 %v9886_v14  ;;  %v9896_v14 = vpack.c.bf16 %v8685_v60, %v8684_v2 }
0x3623   :  { %9614 = vmatprep.subr.mxu0 %v8633_v28 }
0x3628   :  { %v10268_v5 = vpop.eup %10267 }
0x3629   :  { %v7766_v41 = vsel %vm2414_vm5, %v10268_v5, 0.0  ;;  %v10270_v16 = vpop.eup %10269 }
0x362a   :  { %7767 = vadd.xlane.f32.xlu0 %v7766_v41  ;;  %v7771_v56 = vmul.f32 %v10270_v16, %v10266_v46  ;;  %v8692_v16 = vld [vmem:[%s11706_s19 + $0xc0] sm:$0xff] }
0x3640   :  { %10108 = vrot.lane.b32.xlu0 %v11359_v49, %s11781_s26 }
0x36b7   :  { %v7768_v50 = vpop.xlane.xlu0 %7767 }
0x36b8   :  { %10271 = vrcp.f32 %v7768_v50 }
0x36bb   :  { %v10109_v37 = vpop.permute.xlu0 %10108 }
0x36bc   :  { %v10111_v17 = vunpack.i.h.bf16 %v10109_v37  ;;  %v10110_v6 = vunpack.i.l.bf16 %v10109_v37  ;;  %v8690_v37 = vld [vmem:[%s11706_s19 + $0xb0] sm:$0xff] }
0x36be   :  { %v9883_v3 = vpack.c.bf16 %v10111_v17, %v10110_v6  ;;  %v8691_v17 = vld [vmem:[%s11706_s19 + $0xb8] sm:$0xff] }
0x36bf   :  { %v9908_v6 = vpack.c.bf16 %v8691_v17, %v8690_v37 }
0x36c0   :  { %9884 = vmatpush3.bf16.msra.mxu1 %v9883_v3  ;;  %v8693_v3 = vld [vmem:[%s11706_s19 + $0xc8] sm:$0xff] }
0x36c1   :  { %9889 = vmatprep.subr.bf16.mxu1 %v9888_v33 }
0x36c2   :  { %v10272_v18 = vpop.eup %10271 }
0x36c3   :  { %v7772_v38 = vmul.f32 %v10272_v18, %v10268_v5  ;;  %9605 = vmatmul.mubr.msk.f32.vlgmr.msra.gmra.mrb[94].mxu1 %vm2414_vm5, %v7771_v56  ;;  %v8687_v5 = vld [vmem:[%s11706_s19 + $0x98] sm:$0xff]  ;;  %v9912_v56 = vpack.c.bf16 %v8693_v3, %v8692_v16  ;;  %v8694_v18 = vld [vmem:[%s11706_s19 + $0xd0] sm:$0xff] }
0x36c4   :  { %9891 = vmatpush3.bf16.msra.mxu1 %v9888_v33  ;;  %v9900_v41 = vpack.c.bf16 %v8687_v5, %v8686_v22 }
0x36c5   :  { %9612 = vmatmul.mubr.msk.f32.vlgmr.msra.gmra.mrb[62].mxu0 %vm2414_vm5, %v7772_v38  ;;  %9893 = vmatprep.subr.bf16.mxu1 %v9892_v36  ;;  %v8695_v38 = vld [vmem:[%s11706_s19 + $0xd8] sm:$0xff] }
0x36c6   :  { %9615 = vmatpush3.msra.mxu0 %v8633_v28  ;;  %v8688_v28 = vld [vmem:[%s11706_s19 + $0xa0] sm:$0xff] }
0x36c7   :  { %9897 = vmatprep.subr.bf16.mxu0 %v9896_v14  ;;  %v9904_v50 = vpack.c.bf16 %v8689_v43, %v8688_v28 }
0x36c8   :  { %9895 = vmatpush3.bf16.msra.mxu1 %v9892_v36 }
0x3796   :  { %v7848_v49 = vpop.f32.mrb[94].mxu1 }
0x3797   :  { %v9606_v12 = vpop.f32.mrb[95].mxu1  ;;  %9616 = vmatprep.mubr.msk.f32.mxu0 %vm341_vm3, %v7848_v49  ;;  %v9916_v49 = vpack.c.bf16 %v8695_v38, %v8694_v18 }
0x3798   :  { %v7927_v9 = vpop.f32.mrb[62].mxu0  ;;  %v8696_v12 = vld [vmem:[%s11706_s19 + $0xe0] sm:$0xff] }
0x3799   :  { %v9613_v55 = vpop.f32.mrb[63].mxu0  ;;  %9617 = vmatmul.mubr.msk.f32.vlgmr.msra.gmra.mrb[56].mxu0 %vm341_vm3, %v7927_v9  ;;  %v8697_v9 = vld [vmem:[%s11706_s19 + $0xe8] sm:$0xff] }
0x379a   :  { %9899 = vmatpush3.bf16.msra.mxu0 %v9896_v14  ;;  %v9920_v55 = vpack.c.bf16 %v8697_v9, %v8696_v12  ;;  %v8701_v12 = vld [vmem:[%s11707_s20 + $0x1] ss:$0 sm:$0xff] }
0x379b   :  { %9901 = vmatprep.subr.bf16.mxu0 %v9900_v41 }
0x379e   :  { %9903 = vmatpush3.bf16.msra.mxu0 %v9900_v41 }
0x379f   :  { %9905 = vmatprep.subr.bf16.mxu0 %v9904_v50 }
0x37a2   :  { %9907 = vmatpush3.bf16.msra.mxu0 %v9904_v50 }
0x37a3   :  { %9909 = vmatprep.subr.bf16.mxu0 %v9908_v6 }
0x37a6   :  { %9911 = vmatpush3.bf16.msra.mxu0 %v9908_v6 }
0x37a7   :  { %9913 = vmatprep.subr.bf16.mxu0 %v9912_v56 }
0x37aa   :  { %9915 = vmatpush3.bf16.msra.mxu0 %v9912_v56 }
0x37ab   :  { %9917 = vmatprep.subr.bf16.mxu0 %v9916_v49 }
0x37ae   :  { %9919 = vmatpush3.bf16.msra.mxu0 %v9916_v49 }
0x37af   :  { %9921 = vmatprep.subr.bf16.mxu0 %v9920_v55 }
0x37b2   :  { %9923 = vmatpush3.bf16.msra.mxu0 %v9920_v55 }
0x386c   :  { %v9618_v0 = vpop.f32.mrb[56].mxu0 }
0x386d   :  { %v8015_v19 = vadd.f32 %v9618_v0, %v11348_v8  ;;  %v8003_v10 = vpop.f32.mrb[57].mxu0  ;;  %v8698_v0 = vld [vmem:[%s11706_s19 + $0xf0] sm:$0xff] }
0x386e   :  { %v8014_v42 = vadd.f32 %v8003_v10, %v11350_v4  ;;  %v8681_v10 = vld [vmem:[%s11705_s18 + $0x1] ss:$0 sm:$0xff] }
0x386f   :  { %v11558_v15 = vadd.f32 %v8675_v13, %v8015_v19 }
0x3870   :  { %v11560_v20 = vadd.f32 %v8675_v13, %v8014_v42  ;;  %v8699_v13 = vld [vmem:[%s11706_s19 + $0xf8] sm:$0xff] }
0x3871   :  { %v8029_v63 = vsel %vm202_vm0, %v11558_v15, 0.0  ;;  %v9924_v19 = vpack.c.bf16 %v8699_v13, %v8698_v0 }
0x3872   :  { %8030 = vadd.xlane.f32.xlu0 %v8029_v63  ;;  %v8026_v23 = vsel %vm202_vm0, %v11560_v20, 0.0 }
0x3873   :  { %8027 = vadd.xlane.f32.xlu1 %v8026_v23  ;;  %9925 = vmatprep.subr.bf16.mxu0 %v9924_v19 }
0x3874   :  { %9927 = vmatpush3.bf16.msra.mxu0 %v9924_v19 }
0x38ff   :  { %v8031_v7 = vpop.xlane.xlu0 %8030 }
0x3900   :  { %v8033_v25 = vmul.f32 0.03125, %v8031_v7  ;;  %v8028_v27 = vpop.xlane.xlu1 %8027 }
0x3901   :  { %v8032_v29 = vmul.f32 0.03125, %v8028_v27 }
0x3902   :  { %v8035_v8 = vsub.f32 %v11558_v15, %v8033_v25 }
0x3903   :  { %v8034_v4 = vsub.f32 %v11560_v20, %v8032_v29 }
0x3904   :  { %v8037_v30 = vmul.f32 %v8035_v8, %v8035_v8 }
0x3905   :  { %v8036_v26 = vmul.f32 %v8034_v4, %v8034_v4 }
0x3906   :  { %v8041_v11 = vsel %vm202_vm0, %v8037_v30, 0.0 }
0x3907   :  { %8042 = vadd.xlane.f32.xlu1 %v8041_v11  ;;  %v8038_v31 = vsel %vm202_vm0, %v8036_v26, 0.0 }
0x3908   :  { %8039 = vadd.xlane.f32.xlu0 %v8038_v31 }
0x3994   :  { %v8043_v57 = vpop.xlane.xlu1 %8042 }
0x3995   :  { %v8045_v21 = vmul.f32 0.03125, %v8043_v57  ;;  %v8040_v40 = vpop.xlane.xlu0 %8039 }
0x3996   :  { %v8044_v44 = vmul.f32 0.03125, %v8040_v40 }
0x3997   :  { %v8047_v45 = vadd.f32 1e-05, %v8045_v21 }
0x3998   :  { %v8046_v61 = vadd.f32 1e-05, %v8044_v44 }
0x3999   :  { %10273 = vrsqrt.f32 %v8047_v45 }
0x399a   :  { %10275 = vrsqrt.f32 %v8046_v61 }
0x39a3   :  { %v10274_v46 = vpop.eup %10273 }
0x39a4   :  { %v10276_v47 = vpop.eup %10275  ;;  %v8051_v54 = vmul.f32 %v10274_v46, %v8035_v8 }
0x39a5   :  { %v8050_v48 = vmul.f32 %v10276_v47, %v8034_v4 }
0x39a6   :  { %v8057_v58 = vmul.f32 %v8055_v1, %v8051_v54 }
0x39a7   :  { %v8056_v59 = vmul.f32 %v8055_v1, %v8050_v48 }
0x39a8   :  { %v8063_v62 = vadd.f32 %v8061_v51, %v8057_v58 }
0x39a9   :  { %v8062_v52 = vadd.f32 %v8061_v51, %v8056_v59 }
0x39ab   :  { %9627 = vmatprep.mubr.msk.f32.mxu1 %vm202_vm0, %v8062_v52 }
0x39ac   :  { %9628 = vmatmul.mubr.msk.f32.vlgmr.msra.gmra.mrb[96].mxu1 %vm202_vm0, %v8063_v62 }
0x3a7f   :  { %v9629_v42 = vpop.f32.mrb[96].mxu1 }
0x3a80   :  { %v8155_v63 = vadd.f32 %v9629_v42, %v8681_v10  ;;  %v8149_v23 = vpop.f32.mrb[97].mxu1 }
0x3a81   :  { %v8150_v7 = vadd.f32 %v8681_v10, %v8149_v23 }
0x3a82   :  { %v8159_v25 = vmul.f32 0.70710677, %v8155_v63  ;;  %v8207_v56 = vmul.f32 0.5, %v8155_v63 }
0x3a83   :  { %v8158_v27 = vmul.f32 0.70710677, %v8150_v7  ;;  %v8206_v16 = vmul.f32 0.5, %v8150_v7 }
0x3a84   :  { %v8161_v29 = vand.u32 2147483647, %v8159_v25  ;;  %vm8201_vm8 = vcmp.ge.f32.partialorder %v8159_v25, 0.0 }
0x3a85   :  { %v8160_v8 = vand.u32 2147483647, %v8158_v27  ;;  %vm8200_vm9 = vcmp.ge.f32.partialorder %v8158_v27, 0.0 }
0x3a86   :  { %v8163_v4 = vmul.f32 0.3275911, %v8161_v29  ;;  %v8189_v31 = vsub.f32 0.0, %v8161_v29 }
0x3a87   :  { %v8162_v30 = vmul.f32 0.3275911, %v8160_v8  ;;  %v8188_v39 = vsub.f32 0.0, %v8160_v8 }
0x3a88   :  { %v8165_v26 = vadd.f32 1.0, %v8163_v4  ;;  %v8191_v33 = vmul.f32 %v8189_v31, %v8161_v29  ;;  %v8362_v31 = vld [vmem:[%s11787_s9 + $0x10] sm:$0xff] }
0x3a89   :  { %v8164_v11 = vadd.f32 1.0, %v8162_v30  ;;  %v8190_v36 = vmul.f32 %v8188_v39, %v8160_v8  ;;  %v8360_v30 = vld [vmem:[%s11787_s9] sm:$0xff]  ;;  %v8363_v39 = vld [vmem:[%s11787_s9 + $0x18] sm:$0xff] }
0x3a8a   :  { %10277 = vrcp.f32 %v8165_v26  ;;  %v8194_v40 = vmul.f32 1.442695, %v8191_v33  ;;  %v8361_v26 = vld [vmem:[%s11787_s9 + $0x8] sm:$0xff] }
0x3a8b   :  { %10279 = vrcp.f32 %v8164_v11  ;;  %v8192_v61 = vmul.f32 1.442695, %v8190_v36  ;;  %v9928_v11 = vpack.c.bf16 %v8361_v26, %v8360_v30 }
0x3a8c   :  { %10281 = vpow2.f32 %v8194_v40 }
0x3a8d   :  { %10283 = vpow2.f32 %v8192_v61  ;;  %9929 = vmatprep.subr.bf16.mxu1 %v9928_v11 }
0x3a8e   :  { %9931 = vmatpush3.bf16.msra.mxu1 %v9928_v11 }
0x3a94   :  { %v10278_v32 = vpop.eup %10277 }
0x3a95   :  { %v10280_v34 = vpop.eup %10279  ;;  %v8171_v35 = vmul.f32 1.0614054, %v10278_v32 }
0x3a96   :  { %v8170_v57 = vmul.f32 1.0614054, %v10280_v34  ;;  %v10282_v2 = vpop.eup %10281 }
0x3a97   :  { %v8173_v21 = vadd.f32 -1.4531521, %v8171_v35  ;;  %v10284_v14 = vpop.eup %10283 }
0x3a98   :  { %v8172_v44 = vadd.f32 -1.4531521, %v8170_v57 }
0x3a99   :  { %v8175_v45 = vmul.f32 %v10278_v32, %v8173_v21 }
0x3a9a   :  { %v8174_v24 = vmul.f32 %v10280_v34, %v8172_v44  ;;  %v8702_v44 = vld [vmem:[%s11788_s13] ss:$0 sm:$0xff] }
0x3a9b   :  { %v8177_v1 = vadd.f32 1.4214138, %v8175_v45 }
0x3a9c   :  { %v8176_v46 = vadd.f32 1.4214138, %v8174_v24 }
0x3a9d   :  { %v8179_v47 = vmul.f32 %v10278_v32, %v8177_v1  ;;  %v8703_v1 = vld [vmem:[%s11789_s30] ss:$0 sm:$0xff] }
0x3a9e   :  { %v8178_v54 = vmul.f32 %v10280_v34, %v8176_v46 }
0x3a9f   :  { %v8181_v48 = vadd.f32 -0.28449672, %v8179_v47 }
0x3aa0   :  { %v8180_v53 = vadd.f32 -0.28449672, %v8178_v54 }
0x3aa1   :  { %v8183_v51 = vmul.f32 %v10278_v32, %v8181_v48 }
0x3aa2   :  { %v8182_v58 = vmul.f32 %v10280_v34, %v8180_v53  ;;  %v8704_v53 = vld [vmem:[%s11790_s21] ss:$0 sm:$0xff] }
0x3aa3   :  { %v8185_v59 = vadd.f32 0.2548296, %v8183_v51 }
0x3aa4   :  { %v8184_v52 = vadd.f32 0.2548296, %v8182_v58 }
0x3aa5   :  { %v8187_v62 = vmul.f32 %v10278_v32, %v8185_v59  ;;  %v9932_v32 = vpack.c.bf16 %v8363_v39, %v8362_v31 }
0x3aa6   :  { %v8186_v60 = vmul.f32 %v10280_v34, %v8184_v52 }
0x3aa7   :  { %v8197_v22 = vmul.f32 %v10282_v2, %v8187_v62  ;;  %9933 = vmatprep.subr.bf16.mxu1 %v9932_v32 }
0x3aa8   :  { %v8196_v5 = vmul.f32 %v10284_v14, %v8186_v60  ;;  %9935 = vmatpush3.bf16.msra.mxu1 %v9932_v32 }
0x3aa9   :  { %v8199_v41 = vsub.f32 1.0, %v8197_v22 }
0x3aaa   :  { %v8198_v28 = vsub.f32 1.0, %v8196_v5 }
0x3aab   :  { %v8203_v43 = vsub.f32 0.0, %v8199_v41 }
0x3aac   :  { %v8202_v50 = vsub.f32 0.0, %v8198_v28 }
0x3aad   :  { %v8205_v37 = vsel %vm8201_vm8, %v8199_v41, %v8203_v43 }
0x3aae   :  { %v8209_v17 = vadd.f32 1.0, %v8205_v37  ;;  %v8204_v6 = vsel %vm8200_vm9, %v8198_v28, %v8202_v50 }
0x3aaf   :  { %v8208_v3 = vadd.f32 1.0, %v8204_v6 }
0x3ab0   :  { %v8211_v38 = vmul.f32 %v8209_v17, %v8207_v56 }
0x3ab1   :  { %v8210_v18 = vmul.f32 %v8208_v3, %v8206_v16 }
0x3ab3   :  { %9662 = vmatprep.mubr.f32.mxu0 %v8210_v18 }
0x3ab4   :  { %9663 = vmatmul.mubr.f32.vlgmr.msra.gmra.mrb[64].mxu0 %v8211_v38 }
0x3b87   :  { %v9664_v49 = vpop.f32.mrb[64].mxu0 }
0x3b88   :  { %v8305_v9 = vadd.f32 %v9664_v49, %v11558_v15  ;;  %v8295_v55 = vpop.f32.mrb[65].mxu0 }
0x3b89   :  { %v8304_v0 = vadd.f32 %v8295_v55, %v11560_v20 }
0x3b8a   :  { %v8315_v13 = vadd.f32 %v8701_v12, %v8305_v9 }
0x3b8b   :  { %v8314_v19 = vadd.f32 %v8701_v12, %v8304_v0 }
0x3b8c   :  { %v8321_v10 = vsel %vm202_vm0, %v8315_v13, 0.0 }
0x3b8d   :  { %8322 = vadd.xlane.f32.xlu1 %v8321_v10  ;;  %v8318_v42 = vsel %vm202_vm0, %v8314_v19, 0.0 }
0x3b8e   :  { %8319 = vadd.xlane.f32.xlu0 %v8318_v42 }
0x3c1a   :  { %v8323_v63 = vpop.xlane.xlu1 %8322 }
0x3c1b   :  { %v8325_v23 = vmul.f32 0.03125, %v8323_v63  ;;  %v8320_v7 = vpop.xlane.xlu0 %8319 }
0x3c1c   :  { %v8324_v25 = vmul.f32 0.03125, %v8320_v7 }
0x3c1d   :  { %v8327_v27 = vsub.f32 %v8315_v13, %v8325_v23 }
0x3c1e   :  { %v8326_v29 = vsub.f32 %v8314_v19, %v8324_v25 }
0x3c1f   :  { %v8329_v8 = vmul.f32 %v8327_v27, %v8327_v27 }
0x3c20   :  { %v8328_v4 = vmul.f32 %v8326_v29, %v8326_v29 }
0x3c21   :  { %v8333_v15 = vsel %vm202_vm0, %v8329_v8, 0.0 }
0x3c22   :  { %8334 = vadd.xlane.f32.xlu1 %v8333_v15  ;;  %v8330_v20 = vsel %vm202_vm0, %v8328_v4, 0.0 }
0x3c23   :  { %8331 = vadd.xlane.f32.xlu0 %v8330_v20 }
0x3caf   :  { %v8335_v33 = vpop.xlane.xlu1 %8334 }
0x3cb0   :  { %v8337_v34 = vmul.f32 0.03125, %v8335_v33  ;;  %v8332_v35 = vpop.xlane.xlu0 %8331 }
0x3cb1   :  { %v8336_v36 = vmul.f32 0.03125, %v8332_v35 }
0x3cb2   :  { %v8339_v57 = vadd.f32 1e-05, %v8337_v34 }
0x3cb3   :  { %v8338_v21 = vadd.f32 1e-05, %v8336_v36 }
0x3cb4   :  { %10285 = vrsqrt.f32 %v8339_v57 }
0x3cb5   :  { %10287 = vrsqrt.f32 %v8338_v21 }
0x3cbe   :  { %v10286_v40 = vpop.eup %10285 }
0x3cbf   :  { %v10288_v45 = vpop.eup %10287  ;;  %v8343_v61 = vmul.f32 %v10286_v40, %v8327_v27 }
0x3cc0   :  { %v8342_v24 = vmul.f32 %v10288_v45, %v8326_v29 }
0x3cc1   :  { %v8351_v46 = vmul.f32 %v8702_v44, %v8343_v61 }
0x3cc2   :  { %v8350_v47 = vmul.f32 %v8702_v44, %v8342_v24 }
0x3cc3   :  { %v8359_v48 = vadd.f32 %v8703_v1, %v8351_v46 }
0x3cc4   :  { %v8358_v54 = vadd.f32 %v8703_v1, %v8350_v47 }
0x3cc6   :  { %9673 = vmatprep.mubr.msk.f32.mxu1 %vm202_vm0, %v8358_v54 }
0x3cc7   :  { %9674 = vmatmul.mubr.msk.f32.vlgmr.msra.gmra.mrb[98].mxu1 %vm202_vm0, %v8359_v48 }
0x3d9a   :  { %v9675_v51 = vpop.f32.mrb[98].mxu1 }
0x3d9b   :  { %v8449_v58 = vadd.f32 %v9675_v51, %v8704_v53  ;;  %v8443_v59 = vpop.f32.mrb[99].mxu1 }
0x3d9c   :  { %v8444_v52 = vadd.f32 %v8704_v53, %v8443_v59 }
0x3d9d   :  { %8453 = vst [vmem:[#allocation2 + $0x8] sm:$0xff] %v8449_v58 }
0x3d9e   :  { %8452 = vst [vmem:[#allocation2] sm:$0xff] %v8444_v52 }
0x3d9f   :  { %10306 = shalt.err (!%p10303_p4)
}
0x3da0   :  { %s11791_s4 = sld [smem:[#allocation20_spill]] }
0x3da6   :  { %s10307_s23 = scalar_lea.hbm %s11791_s4, 256 }
0x3da7   :  { %p10308_p5 = scmp.ne.s32.totalorder %s11791_s4, %s10307_s23  ;;  %p10311_p6 = scmp.lt.u32.totalorder %s10307_s23, %s11791_s4 }
0x3da9   :  { %p10313_p7 = pnand %p10311_p6, %p10308_p5 }
0x3dab   :  { %10316 = shalt.err (!%p10313_p7)
}
0x3dac   :  { %s10334_s18 = smov 128   ;;  %s10335_s19 = smov 8  }
0x3dad   :  { %8465 = dma.vmem_to_hbm [thread:$0]  %s8460_s22, 256, %s11791_s4, [#allocation3], %s10334_s18, %s10334_s18, %s10335_s19  }
0x3dae   :  { %10317 = dma.done.wait [#allocation3], 256  }
0x3daf   :  { %10318 = vsyncadd [#allocation3], 4294967040 }
0x3db0   :  { %8469 = vsyncpa [#allocation3], 1 }

</bundles_post_ra>
